<compile_context>
chip_gen: v6e
topology: v6e:2x2x1
jax: 0.10.0
libtpu: 0.0.40
codegen_flags: <defaults>
</compile_context>

<pallas_src>
import functools

import numpy as np
import jax
import jax.numpy as jnp
from jax import lax
from jax.experimental import pallas as pl
from jax.experimental.pallas import tpu as pltpu

EPS = 1e-5    # PyTorch BatchNorm2d default eps
LANE = 128    # TPU lane width


def _round_up(x, m):
    return (x + m - 1) // m * m


# ---------------------------------------------------------------------------
# BlockSpec / compiler-param helpers
# ---------------------------------------------------------------------------
def _row_spec(tile_m, ncols):
    # One tile of `tile_m` pixel rows, full (lane-padded) channel width.
    return pl.BlockSpec((tile_m, ncols), lambda i: (i, 0))


def _pinned_spec(shape):
    # Whole array resident in VMEM for every grid step (weights, scale/shift).
    return pl.BlockSpec(shape, lambda i: (0,) * len(shape))


def _stat_spec(p_pad):
    # Per-tile stats block: rows 0/1 hold sum / sum-of-squares.
    return pl.BlockSpec((1, 8, p_pad), lambda i: (i, 0, 0))


def _compiler_params():
    return pltpu.CompilerParams(
        dimension_semantics=("parallel",),       # M tiles are independent
        vmem_limit_bytes=48 * 1024 * 1024)       # < 64 MiB (v7x physical)


# ---------------------------------------------------------------------------
# Pallas kernels
# ---------------------------------------------------------------------------
def _row_mask(tile_m, m_true):
    # 1.0 for real pixel rows, 0.0 for the rows added when padding M.
    row = pl.program_id(0) * tile_m + lax.broadcasted_iota(
        jnp.int32, (tile_m, 1), 0)
    return (row < m_true).astype(jnp.float32)


def _stat_block(acc, mask):
    # (8, Cp) block: row 0 = sum, row 1 = sum of squares (masked), rest zero.
    s = jnp.sum(acc * mask, axis=0, keepdims=True)
    q = jnp.sum(acc * acc * mask, axis=0, keepdims=True)
    pad = jnp.zeros((6, acc.shape[1]), jnp.float32)
    return jnp.concatenate([s, q, pad], axis=0)


def _conv_stats_kernel(x_ref, w_ref, y_ref, ps_ref, *, m_true, tile_m):
    # conv (im2col matmul) tile + per-tile BN statistics (from the f32 acc).
    acc = jnp.dot(x_ref[...], w_ref[...], preferred_element_type=jnp.float32)
    y_ref[...] = acc.astype(y_ref.dtype)
    ps_ref[0] = _stat_block(acc, _row_mask(tile_m, m_true))


def _conv_ds_stats_kernel(x_ref, w_ref, xd_ref, wd_ref, bd_ref,
                          y_ref, d_ref, psy_ref, psd_ref, *, m_true, tile_m):
    # conv1 tile + fused downsample (1x1 conv + bias) tile, each with stats.
    acc = jnp.dot(x_ref[...], w_ref[...], preferred_element_type=jnp.float32)
    dacc = jnp.dot(xd_ref[...], wd_ref[...],
                   preferred_element_type=jnp.float32) + bd_ref[...]
    y_ref[...] = acc.astype(y_ref.dtype)
    d_ref[...] = dacc.astype(d_ref.dtype)
    mask = _row_mask(tile_m, m_true)
    psy_ref[0] = _stat_block(acc, mask)
    psd_ref[0] = _stat_block(dacc, mask)


def _bn_relu_kernel(y_ref, s_ref, b_ref, o_ref):
    # BN apply (pre-folded scale/shift) + ReLU; emits conv2's matmul operand.
    y = y_ref[...].astype(jnp.float32)
    o_ref[...] = jnp.maximum(y * s_ref[...] + b_ref[...],
                             0.0).astype(o_ref.dtype)


def _bn_add_relu_kernel(y_ref, s_ref, b_ref, r_ref, rs_ref, rb_ref, o_ref):
    # BN2 apply + residual-branch BN apply + add + ReLU.
    main = y_ref[...].astype(jnp.float32) * s_ref[...] + b_ref[...]
    res = r_ref[...].astype(jnp.float32) * rs_ref[...] + rb_ref[...]
    o_ref[...] = jnp.maximum(main + res, 0.0).astype(o_ref.dtype)


def _bn_add_relu_identity_kernel(y_ref, s_ref, b_ref, r_ref, o_ref):
    # BN2 apply + identity residual add + ReLU (no residual scale/shift FMA).
    main = y_ref[...].astype(jnp.float32) * s_ref[...] + b_ref[...]
    o_ref[...] = jnp.maximum(main + r_ref[...].astype(jnp.float32),
                             0.0).astype(o_ref.dtype)


# ---------------------------------------------------------------------------
# pallas_call wrappers
# ---------------------------------------------------------------------------
def _conv_stats_call(x_cols, w_mat, m_true, tile_m, y_dtype):
    mp, k = x_cols.shape
    p_pad = w_mat.shape[1]
    nt = mp // tile_m
    kern = functools.partial(_conv_stats_kernel, m_true=m_true, tile_m=tile_m)
    return pl.pallas_call(
        kern,
        grid=(nt,),
        in_specs=[_row_spec(tile_m, k), _pinned_spec(w_mat.shape)],
        out_specs=[_row_spec(tile_m, p_pad), _stat_spec(p_pad)],
        out_shape=[jax.ShapeDtypeStruct((mp, p_pad), y_dtype),
                   jax.ShapeDtypeStruct((nt, 8, p_pad), jnp.float32)],
        compiler_params=_compiler_params(),
    )(x_cols, w_mat)


def _conv_ds_stats_call(x_cols, w_mat, xd, wd_mat, bd, m_true, tile_m,
                        y_dtype):
    mp, k = x_cols.shape
    p_pad = w_mat.shape[1]
    cin = xd.shape[1]
    nt = mp // tile_m
    kern = functools.partial(_conv_ds_stats_kernel,
                             m_true=m_true, tile_m=tile_m)
    return pl.pallas_call(
        kern,
        grid=(nt,),
        in_specs=[_row_spec(tile_m, k), _pinned_spec(w_mat.shape),
                  _row_spec(tile_m, cin), _pinned_spec(wd_mat.shape),
                  _pinned_spec(bd.shape)],
        out_specs=[_row_spec(tile_m, p_pad), _row_spec(tile_m, p_pad),
                   _stat_spec(p_pad), _stat_spec(p_pad)],
        out_shape=[jax.ShapeDtypeStruct((mp, p_pad), y_dtype),
                   jax.ShapeDtypeStruct((mp, p_pad), y_dtype),
                   jax.ShapeDtypeStruct((nt, 8, p_pad), jnp.float32),
                   jax.ShapeDtypeStruct((nt, 8, p_pad), jnp.float32)],
        compiler_params=_compiler_params(),
    )(x_cols, w_mat, xd, wd_mat, bd)


def _bn_relu_call(y_raw, scale, shift, out_dtype, tile_m):
    mp, p_pad = y_raw.shape
    nt = mp // tile_m
    return pl.pallas_call(
        _bn_relu_kernel,
        grid=(nt,),
        in_specs=[_row_spec(tile_m, p_pad),
                  _pinned_spec(scale.shape), _pinned_spec(shift.shape)],
        out_specs=_row_spec(tile_m, p_pad),
        out_shape=jax.ShapeDtypeStruct((mp, p_pad), out_dtype),
        compiler_params=_compiler_params(),
    )(y_raw, scale, shift)


def _bn_add_relu_call(y_raw, scale, shift, res, rscale, rshift, out_dtype,
                      tile_m):
    mp, p_pad = y_raw.shape
    nt = mp // tile_m
    if rscale is None:
        # Identity residual branch: plain add, no residual BN FMA.
        return pl.pallas_call(
            _bn_add_relu_identity_kernel,
            grid=(nt,),
            in_specs=[_row_spec(tile_m, p_pad),
                      _pinned_spec(scale.shape), _pinned_spec(shift.shape),
                      _row_spec(tile_m, p_pad)],
            out_specs=_row_spec(tile_m, p_pad),
            out_shape=jax.ShapeDtypeStruct((mp, p_pad), out_dtype),
            compiler_params=_compiler_params(),
        )(y_raw, scale, shift, res)
    return pl.pallas_call(
        _bn_add_relu_kernel,
        grid=(nt,),
        in_specs=[_row_spec(tile_m, p_pad),
                  _pinned_spec(scale.shape), _pinned_spec(shift.shape),
                  _row_spec(tile_m, p_pad),
                  _pinned_spec(rscale.shape), _pinned_spec(rshift.shape)],
        out_specs=_row_spec(tile_m, p_pad),
        out_shape=jax.ShapeDtypeStruct((mp, p_pad), out_dtype),
        compiler_params=_compiler_params(),
    )(y_raw, scale, shift, res, rscale, rshift)


# ---------------------------------------------------------------------------
# JAX glue: im2col, weight layout, BN stat finalization
# ---------------------------------------------------------------------------
def _im2col3x3(x_nhwc, stride):
    """x: (N,H,W,C) -> ((N*Ho*Wo, 9*C), Ho, Wo) for a 3x3, padding=1 conv."""
    N, H, W, C = x_nhwc.shape
    Ho = (H + 2 - 3) // stride + 1
    Wo = (W + 2 - 3) // stride + 1
    xp = jnp.pad(x_nhwc, ((0, 0), (1, 1), (1, 1), (0, 0)))
    cols = []
    for dy in range(3):
        for dx in range(3):
            cols.append(xp[:, dy::stride, dx::stride, :][:, :Ho, :Wo, :])
    cols = jnp.concatenate(cols, axis=-1)
    return cols.reshape(N * Ho * Wo, 9 * C), Ho, Wo


def _conv_w_to_mat(w, cin_pad=None, cout_pad=None):
    """OIHW conv weight -> (kh*kw*Ip, Op) im2col matmul matrix (zero padded)."""
    O, I, kh, kw = w.shape
    Ip = I if cin_pad is None else cin_pad
    Op = O if cout_pad is None else cout_pad
    w = jnp.pad(w, ((0, Op - O), (0, Ip - I), (0, 0), (0, 0)))
    return jnp.transpose(w, (2, 3, 1, 0)).reshape(kh * kw * Ip, Op)


def _bn_scale_shift(pstats, count, gamma, beta, p_pad):
    """Fold training-mode BN stats + affine params into (scale, shift)."""
    s = jnp.sum(pstats[:, 0, :], axis=0)
    q = jnp.sum(pstats[:, 1, :], axis=0)
    mean = s / count
    # NOTE: E[x^2]-E[x]^2 can cancel for huge activations; clamped at 0.
    var = jnp.maximum(q / count - mean * mean, 0.0)
    inv = lax.rsqrt(var + EPS)
    g = jnp.pad(gamma.astype(jnp.float32), (0, p_pad - gamma.shape[0]),
                constant_values=1.0)
    b = jnp.pad(beta.astype(jnp.float32), (0, p_pad - beta.shape[0]))
    scale = (g * inv).reshape(1, p_pad)
    shift = (b - mean * g * inv).reshape(1, p_pad)
    return scale, shift


# ---------------------------------------------------------------------------
# Forward wrapper
# ---------------------------------------------------------------------------
def basic_block_forward(x_nchw, params, *, stride=1, tile_m=256,
                        compute_dtype=jnp.bfloat16):
    assert tile_m % 16 == 0, "tile_m must be a multiple of 16"
    N, Cin, H, W = x_nchw.shape
    P = params["w1"].shape[0]
    Pp = _round_up(P, LANE)                       # lane-dense output channels

    x = jnp.transpose(x_nchw, (0, 2, 3, 1)).astype(jnp.float32)   # NHWC f32
    x_cd = x.astype(compute_dtype)                                # MXU operand

    # ---- conv1 (3x3, stride, pad 1, no bias): matmul pass + BN1 stats ----
    x1_cols, Ho, Wo = _im2col3x3(x_cd, stride)    # (M, 9*Cin) compute_dtype
    M = N * Ho * Wo
    Mp = _round_up(M, tile_m)
    pad_m = Mp - M

    x1_cols = jnp.pad(x1_cols, ((0, pad_m), (0, 0)))
    w1 = _conv_w_to_mat(params["w1"], cout_pad=Pp).astype(compute_dtype)

    has_ds = (stride != 1) or (Cin != P)
    if has_ds:
        # downsample = 1x1 conv (stride, with bias) + BN, fused into conv1's
        # pixel-tile grid so both branches share one DMA stream.
        xd = x_cd[:, ::stride, ::stride, :][:, :Ho, :Wo, :].reshape(M, Cin)
        xd = jnp.pad(xd, ((0, pad_m), (0, 0)))
        wd = _conv_w_to_mat(params["wd"], cout_pad=Pp).astype(compute_dtype)
        bd = jnp.pad(params["bd"].astype(jnp.float32),
                     (0, Pp - P)).reshape(1, Pp)
        y1_raw, ds_raw, ps1, psd = _conv_ds_stats_call(
            x1_cols, w1, xd, wd, bd, M, tile_m, compute_dtype)
    else:
        y1_raw, ps1 = _conv_stats_call(x1_cols, w1, M, tile_m, compute_dtype)

    scale1, shift1 = _bn_scale_shift(ps1, M, params["g1"], params["b1"], Pp)

    # ---- BN1 apply + ReLU (emitted in compute_dtype = conv2's operand) ----
    y1_act = _bn_relu_call(y1_raw, scale1, shift1, compute_dtype, tile_m)

    # ---- conv2 (3x3, stride 1, pad 1, no bias): matmul pass + BN2 stats ----
    # TODO(synk): this im2col still round-trips HBM at 9x the activation size.
    y1_nhwc = y1_act[:M].reshape(N, Ho, Wo, Pp)
    x2_cols, _, _ = _im2col3x3(y1_nhwc, 1)
    x2_cols = jnp.pad(x2_cols, ((0, pad_m), (0, 0)))
    w2 = _conv_w_to_mat(params["w2"], cin_pad=Pp,
                        cout_pad=Pp).astype(compute_dtype)
    y2_raw, ps2 = _conv_stats_call(x2_cols, w2, M, tile_m, compute_dtype)
    scale2, shift2 = _bn_scale_shift(ps2, M, params["g2"], params["b2"], Pp)

    # ---- residual branch scale/shift + fused BN2-apply + add + ReLU ----
    if has_ds:
        res = ds_raw
        rscale, rshift = _bn_scale_shift(psd, M, params["gd"],
                                         params["betad"], Pp)
    else:
        res = jnp.pad(x.astype(compute_dtype).reshape(M, Cin),
                      ((0, pad_m), (0, Pp - Cin)))
        rscale = rshift = None          # identity residual: plain add kernel

    out = _bn_add_relu_call(y2_raw, scale2, shift2, res, rscale, rshift,
                            x_nchw.dtype, tile_m)

    out = out[:M, :P].reshape(N, Ho, Wo, P)
    return jnp.transpose(out, (0, 3, 1, 2))                       # NCHW


# ---------------------------------------------------------------------------
# Deterministic parameter init (shapes from basic_block.__init__)
# ---------------------------------------------------------------------------
def init_params(key, in_planes, planes):
    ks = jax.random.split(key, 10)
    f32 = jnp.float32
    return {
        "w1": 0.1 * jax.random.normal(ks[0], (planes, in_planes, 3, 3), f32),
        "g1": 1.0 + 0.1 * jax.random.normal(ks[1], (planes,), f32),
        "b1": 0.1 * jax.random.normal(ks[2], (planes,), f32),
        "w2": 0.1 * jax.random.normal(ks[3], (planes, planes, 3, 3), f32),
        "g2": 1.0 + 0.1 * jax.random.normal(ks[4], (planes,), f32),
        "b2": 0.1 * jax.random.normal(ks[5], (planes,), f32),
        "wd": 0.1 * jax.random.normal(ks[6], (planes, in_planes, 1, 1), f32),
        "bd": 0.1 * jax.random.normal(ks[7], (planes,), f32),
        "gd": 1.0 + 0.1 * jax.random.normal(ks[8], (planes,), f32),
        "betad": 0.1 * jax.random.normal(ks[9], (planes,), f32),
    }


# ---------------------------------------------------------------------------
# Pure-JAX reference (training-mode BN, for correctness check only)
# ---------------------------------------------------------------------------
def reference_forward(x_nchw, params, *, stride=1):
    x = jnp.transpose(x_nchw, (0, 2, 3, 1)).astype(jnp.float32)

    def conv(x, w, s, pad, bias=None):
        y = lax.conv_general_dilated(
            x, jnp.transpose(w, (2, 3, 1, 0)), (s, s),
            [(pad, pad), (pad, pad)],
            dimension_numbers=("NHWC", "HWIO", "NHWC"),
            precision=lax.Precision.HIGHEST)
        return y if bias is None else y + bias

    def bn(x, g, b):
        m = jnp.mean(x, axis=(0, 1, 2), keepdims=True)
        v = jnp.mean(x * x, axis=(0, 1, 2), keepdims=True) - m * m
        return (x - m) * lax.rsqrt(v + EPS) * g + b

    y = jnp.maximum(bn(conv(x, params["w1"], stride, 1),
                       params["g1"], params["b1"]), 0.0)
    y = bn(conv(y, params["w2"], 1, 1), params["g2"], params["b2"])
    Cin, P = x.shape[-1], params["w1"].shape[0]
    if stride != 1 or Cin != P:
        r = bn(conv(x, params["wd"], stride, 0, params["bd"]),
               params["gd"], params["betad"])
    else:
        r = x
    out = jnp.maximum(y + r, 0.0)
    return jnp.transpose(out, (0, 3, 1, 2))


if __name__ == "__main__":
    key = jax.random.PRNGKey(0)

    configs = [
        # (name, N, Cin, H, W, planes, stride)
        ("downsample (Cin != planes, stride 1)", 2, 4, 16, 16, 8, 1),
        ("identity residual (Cin == planes)   ", 2, 8, 16, 16, 8, 1),
        ("downsample (stride 2, padded M)     ", 2, 4, 16, 16, 8, 2),
    ]

    for idx, (name, N, Cin, H, W, planes, stride) in enumerate(configs):
        kx, kp = jax.random.split(jax.random.fold_in(key, idx))
        x = jax.random.normal(kx, (N, Cin, H, W), jnp.float32)
        params = init_params(kp, Cin, planes)
        ref = reference_forward(x, params, stride=stride)

        # f32 MXU operands: tight check of conv/BN/residual kernel logic.
        fwd32 = jax.jit(functools.partial(
            basic_block_forward, stride=stride, compute_dtype=jnp.float32))
        out32 = jax.block_until_ready(fwd32(x, params))
        assert out32.shape == ref.shape
        np.testing.assert_allclose(np.asarray(out32), np.asarray(ref),
                                   rtol=2e-3, atol=2e-3)

        if idx == 0:
            # bf16 MXU operands (default, recommended path): looser tolerance
            # vs. the f32 reference, accumulation stays f32.
            fwd16 = jax.jit(functools.partial(
                basic_block_forward, stride=stride,
                compute_dtype=jnp.bfloat16))
            out16 = jax.block_until_ready(fwd16(x, params))
            np.testing.assert_allclose(np.asarray(out16), np.asarray(ref),
                                       rtol=1e-1, atol=1e-1)

    print("KERNEL_OK")
</pallas_src>

<mosaic_0001>
module attributes {stable_mosaic.version = 11 : i64} {
  func.func @_conv_ds_stats_kernel(%arg0: i32, %arg1: memref<256x36xf32, #tpu.memory_space<vmem>>, %arg2: memref<36x128xf32, #tpu.memory_space<vmem>>, %arg3: memref<256x4xf32, #tpu.memory_space<vmem>>, %arg4: memref<4x128xf32, #tpu.memory_space<vmem>>, %arg5: memref<1x128xf32, #tpu.memory_space<vmem>>, %arg6: memref<256x128xf32, #tpu.memory_space<vmem>>, %arg7: memref<256x128xf32, #tpu.memory_space<vmem>>, %arg8: memref<1x8x128xf32, #tpu.memory_space<vmem>>, %arg9: memref<1x8x128xf32, #tpu.memory_space<vmem>>) attributes {dimension_semantics = [#tpu.dimension_semantics<parallel>], iteration_bounds = array<i64: 2>, scalar_prefetch = 0 : i64, scratch_operands = 0 : i64, tpu.core_type = #tpu.core_type<tc>, window_params = [{transform_indices = @transform_0, window_bounds = array<i64: 256, 36>}, {pipeline_mode = #tpu.pipeline_mode<synchronous>, transform_indices = @transform_1, window_bounds = array<i64: 36, 128>}, {transform_indices = @transform_2, window_bounds = array<i64: 256, 4>}, {pipeline_mode = #tpu.pipeline_mode<synchronous>, transform_indices = @transform_3, window_bounds = array<i64: 4, 128>}, {pipeline_mode = #tpu.pipeline_mode<synchronous>, transform_indices = @transform_4, window_bounds = array<i64: 1, 128>}, {transform_indices = @transform_5, window_bounds = array<i64: 256, 128>}, {transform_indices = @transform_6, window_bounds = array<i64: 256, 128>}, {transform_indices = @transform_7, window_bounds = array<i64: 1, 8, 128>}, {transform_indices = @transform_8, window_bounds = array<i64: 1, 8, 128>}]} {
    %c0 = arith.constant 0 : index
    %c0_0 = arith.constant 0 : index
    %0 = vector.load %arg1[%c0, %c0_0] : memref<256x36xf32, #tpu.memory_space<vmem>>, vector<256x36xf32>
    %c0_1 = arith.constant 0 : index
    %c0_2 = arith.constant 0 : index
    %1 = vector.load %arg2[%c0_1, %c0_2] : memref<36x128xf32, #tpu.memory_space<vmem>>, vector<36x128xf32>
    %cst = arith.constant dense<0.000000e+00> : vector<256x128xf32>
    %2 = tpu.matmul %0, %1, %cst {dimension_numbers = #tpu.dot_dimension_numbers<[1], [0], [0], [1], [0, 0, 1, 1], [], []>} : vector<256x36xf32>, vector<36x128xf32>, vector<256x128xf32> -> vector<256x128xf32>
    %c0_3 = arith.constant 0 : index
    %c0_4 = arith.constant 0 : index
    %3 = vector.load %arg3[%c0_3, %c0_4] : memref<256x4xf32, #tpu.memory_space<vmem>>, vector<256x4xf32>
    %c0_5 = arith.constant 0 : index
    %c0_6 = arith.constant 0 : index
    %4 = vector.load %arg4[%c0_5, %c0_6] : memref<4x128xf32, #tpu.memory_space<vmem>>, vector<4x128xf32>
    %cst_7 = arith.constant dense<0.000000e+00> : vector<256x128xf32>
    %5 = tpu.matmul %3, %4, %cst_7 {dimension_numbers = #tpu.dot_dimension_numbers<[1], [0], [0], [1], [0, 0, 1, 1], [], []>} : vector<256x4xf32>, vector<4x128xf32>, vector<256x128xf32> -> vector<256x128xf32>
    %c0_8 = arith.constant 0 : index
    %c0_9 = arith.constant 0 : index
    %6 = vector.load %arg5[%c0_8, %c0_9] : memref<1x128xf32, #tpu.memory_space<vmem>>, vector<1x128xf32>
    %7 = vector.broadcast %6 : vector<1x128xf32> to vector<256x128xf32>
    %8 = arith.addf %5, %7 : vector<256x128xf32>
    %c0_10 = arith.constant 0 : index
    %c0_11 = arith.constant 0 : index
    %9 = vector.load %arg6[%c0_10, %c0_11] : memref<256x128xf32, #tpu.memory_space<vmem>>, vector<256x128xf32>
    tpu.vector_store %arg6[%c0_10, %c0_11], %2 {strides = array<i32>} : memref<256x128xf32, #tpu.memory_space<vmem>>, vector<256x128xf32>,
    %c0_12 = arith.constant 0 : index
    %c0_13 = arith.constant 0 : index
    %10 = vector.load %arg7[%c0_12, %c0_13] : memref<256x128xf32, #tpu.memory_space<vmem>>, vector<256x128xf32>
    tpu.vector_store %arg7[%c0_12, %c0_13], %8 {strides = array<i32>} : memref<256x128xf32, #tpu.memory_space<vmem>>, vector<256x128xf32>,
    %c256_i32 = arith.constant 256 : i32
    %11 = arith.muli %arg0, %c256_i32 : i32
    %12 = tpu.iota {dimensions = array<i32: 0>} : vector<256x1xi32>
    %13 = vector.broadcast %11 : i32 to vector<256x1xi32>
    %14 = arith.addi %13, %12 : vector<256x1xi32>
    %c512_i32 = arith.constant 512 : i32
    %15 = vector.broadcast %c512_i32 : i32 to vector<256x1xi32>
    %16 = arith.cmpi slt, %14, %15 : vector<256x1xi32>
    %17 = arith.extui %16 : vector<256x1xi1> to vector<256x1xi32>
    %18 = arith.sitofp %17 : vector<256x1xi32> to vector<256x1xf32>
    %19 = vector.broadcast %18 : vector<256x1xf32> to vector<256x128xf32>
    %20 = arith.mulf %2, %19 : vector<256x128xf32>
    %cst_14 = arith.constant dense<0.000000e+00> : vector<128xf32>
    %21 = vector.multi_reduction <add>, %20, %cst_14 [0] : vector<256x128xf32> to vector<128xf32>
    %22 = vector.shape_cast %21 : vector<128xf32> to vector<1x128xf32>
    %23 = arith.mulf %2, %2 : vector<256x128xf32>
    %24 = vector.broadcast %18 : vector<256x1xf32> to vector<256x128xf32>
    %25 = arith.mulf %23, %24 : vector<256x128xf32>
    %cst_15 = arith.constant dense<0.000000e+00> : vector<128xf32>
    %26 = vector.multi_reduction <add>, %25, %cst_15 [0] : vector<256x128xf32> to vector<128xf32>
    %27 = vector.shape_cast %26 : vector<128xf32> to vector<1x128xf32>
    %cst_16 = arith.constant 0.000000e+00 : f32
    %28 = vector.broadcast %cst_16 : f32 to vector<6x128xf32>
    %29 = tpu.concatenate %22, %27, %28 in 0 : vector<1x128xf32>, vector<1x128xf32>, vector<6x128xf32> -> vector<8x128xf32>
    %c0_17 = arith.constant 0 : index
    %c0_18 = arith.constant 0 : index
    %c0_19 = arith.constant 0 : index
    %30 = vector.load %arg8[%c0_17, %c0_18, %c0_19] : memref<1x8x128xf32, #tpu.memory_space<vmem>>, vector<1x8x128xf32>
    %31 = vector.shape_cast %30 : vector<1x8x128xf32> to vector<8x128xf32>
    %32 = vector.shape_cast %29 : vector<8x128xf32> to vector<1x8x128xf32>
    tpu.vector_store %arg8[%c0_17, %c0_18, %c0_19], %32 {strides = array<i32>} : memref<1x8x128xf32, #tpu.memory_space<vmem>>, vector<1x8x128xf32>,
    %33 = vector.broadcast %18 : vector<256x1xf32> to vector<256x128xf32>
    %34 = arith.mulf %8, %33 : vector<256x128xf32>
    %cst_20 = arith.constant dense<0.000000e+00> : vector<128xf32>
    %35 = vector.multi_reduction <add>, %34, %cst_20 [0] : vector<256x128xf32> to vector<128xf32>
    %36 = vector.shape_cast %35 : vector<128xf32> to vector<1x128xf32>
    %37 = arith.mulf %8, %8 : vector<256x128xf32>
    %38 = vector.broadcast %18 : vector<256x1xf32> to vector<256x128xf32>
    %39 = arith.mulf %37, %38 : vector<256x128xf32>
    %cst_21 = arith.constant dense<0.000000e+00> : vector<128xf32>
    %40 = vector.multi_reduction <add>, %39, %cst_21 [0] : vector<256x128xf32> to vector<128xf32>
    %41 = vector.shape_cast %40 : vector<128xf32> to vector<1x128xf32>
    %cst_22 = arith.constant 0.000000e+00 : f32
    %42 = vector.broadcast %cst_22 : f32 to vector<6x128xf32>
    %43 = tpu.concatenate %36, %41, %42 in 0 : vector<1x128xf32>, vector<1x128xf32>, vector<6x128xf32> -> vector<8x128xf32>
    %c0_23 = arith.constant 0 : index
    %c0_24 = arith.constant 0 : index
    %c0_25 = arith.constant 0 : index
    %44 = vector.load %arg9[%c0_23, %c0_24, %c0_25] : memref<1x8x128xf32, #tpu.memory_space<vmem>>, vector<1x8x128xf32>
    %45 = vector.shape_cast %44 : vector<1x8x128xf32> to vector<8x128xf32>
    %46 = vector.shape_cast %43 : vector<8x128xf32> to vector<1x8x128xf32>
    tpu.vector_store %arg9[%c0_23, %c0_24, %c0_25], %46 {strides = array<i32>} : memref<1x8x128xf32, #tpu.memory_space<vmem>>, vector<1x8x128xf32>,
    return
  }
  func.func @transform_0(%arg0: i32) -> (i32, i32) {
    %c0_i32 = arith.constant 0 : i32
    %c0_i32_0 = arith.constant 0 : i32
    return %arg0, %c0_i32 : i32, i32
  }
  func.func @transform_1(%arg0: i32) -> (i32, i32) {
    %c0_i32 = arith.constant 0 : i32
    %c0_i32_0 = arith.constant 0 : i32
    %c0_i32_1 = arith.constant 0 : i32
    return %c0_i32, %c0_i32_0 : i32, i32
  }
  func.func @transform_2(%arg0: i32) -> (i32, i32) {
    %c0_i32 = arith.constant 0 : i32
    %c0_i32_0 = arith.constant 0 : i32
    return %arg0, %c0_i32 : i32, i32
  }
  func.func @transform_3(%arg0: i32) -> (i32, i32) {
    %c0_i32 = arith.constant 0 : i32
    %c0_i32_0 = arith.constant 0 : i32
    %c0_i32_1 = arith.constant 0 : i32
    return %c0_i32, %c0_i32_0 : i32, i32
  }
  func.func @transform_4(%arg0: i32) -> (i32, i32) {
    %c0_i32 = arith.constant 0 : i32
    %c0_i32_0 = arith.constant 0 : i32
    %c0_i32_1 = arith.constant 0 : i32
    return %c0_i32, %c0_i32_0 : i32, i32
  }
  func.func @transform_5(%arg0: i32) -> (i32, i32) {
    %c0_i32 = arith.constant 0 : i32
    %c0_i32_0 = arith.constant 0 : i32
    return %arg0, %c0_i32 : i32, i32
  }
  func.func @transform_6(%arg0: i32) -> (i32, i32) {
    %c0_i32 = arith.constant 0 : i32
    %c0_i32_0 = arith.constant 0 : i32
    return %arg0, %c0_i32 : i32, i32
  }
  func.func @transform_7(%arg0: i32) -> (i32, i32, i32) {
    %c0_i32 = arith.constant 0 : i32
    %c0_i32_0 = arith.constant 0 : i32
    %c0_i32_1 = arith.constant 0 : i32
    return %arg0, %c0_i32, %c0_i32_0 : i32, i32, i32
  }
  func.func @transform_8(%arg0: i32) -> (i32, i32, i32) {
    %c0_i32 = arith.constant 0 : i32
    %c0_i32_0 = arith.constant 0 : i32
    %c0_i32_1 = arith.constant 0 : i32
    return %arg0, %c0_i32, %c0_i32_0 : i32, i32, i32
  }
}

module attributes {stable_mosaic.version = 11 : i64} {
  func.func @_bn_relu_kernel(%arg0: i32, %arg1: memref<256x128xf32, #tpu.memory_space<vmem>>, %arg2: memref<1x128xf32, #tpu.memory_space<vmem>>, %arg3: memref<1x128xf32, #tpu.memory_space<vmem>>, %arg4: memref<256x128xf32, #tpu.memory_space<vmem>>) attributes {dimension_semantics = [#tpu.dimension_semantics<parallel>], iteration_bounds = array<i64: 2>, scalar_prefetch = 0 : i64, scratch_operands = 0 : i64, tpu.core_type = #tpu.core_type<tc>, window_params = [{transform_indices = @transform_0, window_bounds = array<i64: 256, 128>}, {pipeline_mode = #tpu.pipeline_mode<synchronous>, transform_indices = @transform_1, window_bounds = array<i64: 1, 128>}, {pipeline_mode = #tpu.pipeline_mode<synchronous>, transform_indices = @transform_2, window_bounds = array<i64: 1, 128>}, {transform_indices = @transform_3, window_bounds = array<i64: 256, 128>}]} {
    %c0 = arith.constant 0 : index
    %c0_0 = arith.constant 0 : index
    %0 = vector.load %arg1[%c0, %c0_0] : memref<256x128xf32, #tpu.memory_space<vmem>>, vector<256x128xf32>
    %c0_1 = arith.constant 0 : index
    %c0_2 = arith.constant 0 : index
    %1 = vector.load %arg2[%c0_1, %c0_2] : memref<1x128xf32, #tpu.memory_space<vmem>>, vector<1x128xf32>
    %2 = vector.broadcast %1 : vector<1x128xf32> to vector<256x128xf32>
    %3 = arith.mulf %0, %2 : vector<256x128xf32>
    %c0_3 = arith.constant 0 : index
    %c0_4 = arith.constant 0 : index
    %4 = vector.load %arg3[%c0_3, %c0_4] : memref<1x128xf32, #tpu.memory_space<vmem>>, vector<1x128xf32>
    %5 = vector.broadcast %4 : vector<1x128xf32> to vector<256x128xf32>
    %6 = arith.addf %3, %5 : vector<256x128xf32>
    %cst = arith.constant 0.000000e+00 : f32
    %7 = vector.broadcast %cst : f32 to vector<256x128xf32>
    %8 = arith.maximumf %6, %7 : vector<256x128xf32>
    %c0_5 = arith.constant 0 : index
    %c0_6 = arith.constant 0 : index
    %9 = vector.load %arg4[%c0_5, %c0_6] : memref<256x128xf32, #tpu.memory_space<vmem>>, vector<256x128xf32>
    tpu.vector_store %arg4[%c0_5, %c0_6], %8 {strides = array<i32>} : memref<256x128xf32, #tpu.memory_space<vmem>>, vector<256x128xf32>,
    return
  }
  func.func @transform_0(%arg0: i32) -> (i32, i32) {
    %c0_i32 = arith.constant 0 : i32
    %c0_i32_0 = arith.constant 0 : i32
    return %arg0, %c0_i32 : i32, i32
  }
  func.func @transform_1(%arg0: i32) -> (i32, i32) {
    %c0_i32 = arith.constant 0 : i32
    %c0_i32_0 = arith.constant 0 : i32
    %c0_i32_1 = arith.constant 0 : i32
    return %c0_i32, %c0_i32_0 : i32, i32
  }
  func.func @transform_2(%arg0: i32) -> (i32, i32) {
    %c0_i32 = arith.constant 0 : i32
    %c0_i32_0 = arith.constant 0 : i32
    %c0_i32_1 = arith.constant 0 : i32
    return %c0_i32, %c0_i32_0 : i32, i32
  }
  func.func @transform_3(%arg0: i32) -> (i32, i32) {
    %c0_i32 = arith.constant 0 : i32
    %c0_i32_0 = arith.constant 0 : i32
    return %arg0, %c0_i32 : i32, i32
  }
}

module attributes {stable_mosaic.version = 11 : i64} {
  func.func @_conv_stats_kernel(%arg0: i32, %arg1: memref<256x1152xf32, #tpu.memory_space<vmem>>, %arg2: memref<1152x128xf32, #tpu.memory_space<vmem>>, %arg3: memref<256x128xf32, #tpu.memory_space<vmem>>, %arg4: memref<1x8x128xf32, #tpu.memory_space<vmem>>) attributes {dimension_semantics = [#tpu.dimension_semantics<parallel>], iteration_bounds = array<i64: 2>, scalar_prefetch = 0 : i64, scratch_operands = 0 : i64, tpu.core_type = #tpu.core_type<tc>, window_params = [{transform_indices = @transform_0, window_bounds = array<i64: 256, 1152>}, {pipeline_mode = #tpu.pipeline_mode<synchronous>, transform_indices = @transform_1, window_bounds = array<i64: 1152, 128>}, {transform_indices = @transform_2, window_bounds = array<i64: 256, 128>}, {transform_indices = @transform_3, window_bounds = array<i64: 1, 8, 128>}]} {
    %c0 = arith.constant 0 : index
    %c0_0 = arith.constant 0 : index
    %0 = vector.load %arg1[%c0, %c0_0] : memref<256x1152xf32, #tpu.memory_space<vmem>>, vector<256x1152xf32>
    %c0_1 = arith.constant 0 : index
    %c0_2 = arith.constant 0 : index
    %1 = vector.load %arg2[%c0_1, %c0_2] : memref<1152x128xf32, #tpu.memory_space<vmem>>, vector<1152x128xf32>
    %cst = arith.constant dense<0.000000e+00> : vector<256x128xf32>
    %2 = tpu.matmul %0, %1, %cst {dimension_numbers = #tpu.dot_dimension_numbers<[1], [0], [0], [1], [0, 0, 1, 1], [], []>} : vector<256x1152xf32>, vector<1152x128xf32>, vector<256x128xf32> -> vector<256x128xf32>
    %c0_3 = arith.constant 0 : index
    %c0_4 = arith.constant 0 : index
    %3 = vector.load %arg3[%c0_3, %c0_4] : memref<256x128xf32, #tpu.memory_space<vmem>>, vector<256x128xf32>
    tpu.vector_store %arg3[%c0_3, %c0_4], %2 {strides = array<i32>} : memref<256x128xf32, #tpu.memory_space<vmem>>, vector<256x128xf32>,
    %c256_i32 = arith.constant 256 : i32
    %4 = arith.muli %arg0, %c256_i32 : i32
    %5 = tpu.iota {dimensions = array<i32: 0>} : vector<256x1xi32>
    %6 = vector.broadcast %4 : i32 to vector<256x1xi32>
    %7 = arith.addi %6, %5 : vector<256x1xi32>
    %c512_i32 = arith.constant 512 : i32
    %8 = vector.broadcast %c512_i32 : i32 to vector<256x1xi32>
    %9 = arith.cmpi slt, %7, %8 : vector<256x1xi32>
    %10 = arith.extui %9 : vector<256x1xi1> to vector<256x1xi32>
    %11 = arith.sitofp %10 : vector<256x1xi32> to vector<256x1xf32>
    %12 = vector.broadcast %11 : vector<256x1xf32> to vector<256x128xf32>
    %13 = arith.mulf %2, %12 : vector<256x128xf32>
    %cst_5 = arith.constant dense<0.000000e+00> : vector<128xf32>
    %14 = vector.multi_reduction <add>, %13, %cst_5 [0] : vector<256x128xf32> to vector<128xf32>
    %15 = vector.shape_cast %14 : vector<128xf32> to vector<1x128xf32>
    %16 = arith.mulf %2, %2 : vector<256x128xf32>
    %17 = vector.broadcast %11 : vector<256x1xf32> to vector<256x128xf32>
    %18 = arith.mulf %16, %17 : vector<256x128xf32>
    %cst_6 = arith.constant dense<0.000000e+00> : vector<128xf32>
    %19 = vector.multi_reduction <add>, %18, %cst_6 [0] : vector<256x128xf32> to vector<128xf32>
    %20 = vector.shape_cast %19 : vector<128xf32> to vector<1x128xf32>
    %cst_7 = arith.constant 0.000000e+00 : f32
    %21 = vector.broadcast %cst_7 : f32 to vector<6x128xf32>
    %22 = tpu.concatenate %15, %20, %21 in 0 : vector<1x128xf32>, vector<1x128xf32>, vector<6x128xf32> -> vector<8x128xf32>
    %c0_8 = arith.constant 0 : index
    %c0_9 = arith.constant 0 : index
    %c0_10 = arith.constant 0 : index
    %23 = vector.load %arg4[%c0_8, %c0_9, %c0_10] : memref<1x8x128xf32, #tpu.memory_space<vmem>>, vector<1x8x128xf32>
    %24 = vector.shape_cast %23 : vector<1x8x128xf32> to vector<8x128xf32>
    %25 = vector.shape_cast %22 : vector<8x128xf32> to vector<1x8x128xf32>
    tpu.vector_store %arg4[%c0_8, %c0_9, %c0_10], %25 {strides = array<i32>} : memref<1x8x128xf32, #tpu.memory_space<vmem>>, vector<1x8x128xf32>,
    return
  }
  func.func @transform_0(%arg0: i32) -> (i32, i32) {
    %c0_i32 = arith.constant 0 : i32
    %c0_i32_0 = arith.constant 0 : i32
    return %arg0, %c0_i32 : i32, i32
  }
  func.func @transform_1(%arg0: i32) -> (i32, i32) {
    %c0_i32 = arith.constant 0 : i32
    %c0_i32_0 = arith.constant 0 : i32
    %c0_i32_1 = arith.constant 0 : i32
    return %c0_i32, %c0_i32_0 : i32, i32
  }
  func.func @transform_2(%arg0: i32) -> (i32, i32) {
    %c0_i32 = arith.constant 0 : i32
    %c0_i32_0 = arith.constant 0 : i32
    return %arg0, %c0_i32 : i32, i32
  }
  func.func @transform_3(%arg0: i32) -> (i32, i32, i32) {
    %c0_i32 = arith.constant 0 : i32
    %c0_i32_0 = arith.constant 0 : i32
    %c0_i32_1 = arith.constant 0 : i32
    return %arg0, %c0_i32, %c0_i32_0 : i32, i32, i32
  }
}

module attributes {stable_mosaic.version = 11 : i64} {
  func.func @_bn_add_relu_kernel(%arg0: i32, %arg1: memref<256x128xf32, #tpu.memory_space<vmem>>, %arg2: memref<1x128xf32, #tpu.memory_space<vmem>>, %arg3: memref<1x128xf32, #tpu.memory_space<vmem>>, %arg4: memref<256x128xf32, #tpu.memory_space<vmem>>, %arg5: memref<1x128xf32, #tpu.memory_space<vmem>>, %arg6: memref<1x128xf32, #tpu.memory_space<vmem>>, %arg7: memref<256x128xf32, #tpu.memory_space<vmem>>) attributes {dimension_semantics = [#tpu.dimension_semantics<parallel>], iteration_bounds = array<i64: 2>, scalar_prefetch = 0 : i64, scratch_operands = 0 : i64, tpu.core_type = #tpu.core_type<tc>, window_params = [{transform_indices = @transform_0, window_bounds = array<i64: 256, 128>}, {pipeline_mode = #tpu.pipeline_mode<synchronous>, transform_indices = @transform_1, window_bounds = array<i64: 1, 128>}, {pipeline_mode = #tpu.pipeline_mode<synchronous>, transform_indices = @transform_2, window_bounds = array<i64: 1, 128>}, {transform_indices = @transform_3, window_bounds = array<i64: 256, 128>}, {pipeline_mode = #tpu.pipeline_mode<synchronous>, transform_indices = @transform_4, window_bounds = array<i64: 1, 128>}, {pipeline_mode = #tpu.pipeline_mode<synchronous>, transform_indices = @transform_5, window_bounds = array<i64: 1, 128>}, {transform_indices = @transform_6, window_bounds = array<i64: 256, 128>}]} {
    %c0 = arith.constant 0 : index
    %c0_0 = arith.constant 0 : index
    %0 = vector.load %arg1[%c0, %c0_0] : memref<256x128xf32, #tpu.memory_space<vmem>>, vector<256x128xf32>
    %c0_1 = arith.constant 0 : index
    %c0_2 = arith.constant 0 : index
    %1 = vector.load %arg2[%c0_1, %c0_2] : memref<1x128xf32, #tpu.memory_space<vmem>>, vector<1x128xf32>
    %2 = vector.broadcast %1 : vector<1x128xf32> to vector<256x128xf32>
    %3 = arith.mulf %0, %2 : vector<256x128xf32>
    %c0_3 = arith.constant 0 : index
    %c0_4 = arith.constant 0 : index
    %4 = vector.load %arg3[%c0_3, %c0_4] : memref<1x128xf32, #tpu.memory_space<vmem>>, vector<1x128xf32>
    %5 = vector.broadcast %4 : vector<1x128xf32> to vector<256x128xf32>
    %6 = arith.addf %3, %5 : vector<256x128xf32>
    %c0_5 = arith.constant 0 : index
    %c0_6 = arith.constant 0 : index
    %7 = vector.load %arg4[%c0_5, %c0_6] : memref<256x128xf32, #tpu.memory_space<vmem>>, vector<256x128xf32>
    %c0_7 = arith.constant 0 : index
    %c0_8 = arith.constant 0 : index
    %8 = vector.load %arg5[%c0_7, %c0_8] : memref<1x128xf32, #tpu.memory_space<vmem>>, vector<1x128xf32>
    %9 = vector.broadcast %8 : vector<1x128xf32> to vector<256x128xf32>
    %10 = arith.mulf %7, %9 : vector<256x128xf32>
    %c0_9 = arith.constant 0 : index
    %c0_10 = arith.constant 0 : index
    %11 = vector.load %arg6[%c0_9, %c0_10] : memref<1x128xf32, #tpu.memory_space<vmem>>, vector<1x128xf32>
    %12 = vector.broadcast %11 : vector<1x128xf32> to vector<256x128xf32>
    %13 = arith.addf %10, %12 : vector<256x128xf32>
    %14 = arith.addf %6, %13 : vector<256x128xf32>
    %cst = arith.constant 0.000000e+00 : f32
    %15 = vector.broadcast %cst : f32 to vector<256x128xf32>
    %16 = arith.maximumf %14, %15 : vector<256x128xf32>
    %c0_11 = arith.constant 0 : index
    %c0_12 = arith.constant 0 : index
    %17 = vector.load %arg7[%c0_11, %c0_12] : memref<256x128xf32, #tpu.memory_space<vmem>>, vector<256x128xf32>
    tpu.vector_store %arg7[%c0_11, %c0_12], %16 {strides = array<i32>} : memref<256x128xf32, #tpu.memory_space<vmem>>, vector<256x128xf32>,
    return
  }
  func.func @transform_0(%arg0: i32) -> (i32, i32) {
    %c0_i32 = arith.constant 0 : i32
    %c0_i32_0 = arith.constant 0 : i32
    return %arg0, %c0_i32 : i32, i32
  }
  func.func @transform_1(%arg0: i32) -> (i32, i32) {
    %c0_i32 = arith.constant 0 : i32
    %c0_i32_0 = arith.constant 0 : i32
    %c0_i32_1 = arith.constant 0 : i32
    return %c0_i32, %c0_i32_0 : i32, i32
  }
  func.func @transform_2(%arg0: i32) -> (i32, i32) {
    %c0_i32 = arith.constant 0 : i32
    %c0_i32_0 = arith.constant 0 : i32
    %c0_i32_1 = arith.constant 0 : i32
    return %c0_i32, %c0_i32_0 : i32, i32
  }
  func.func @transform_3(%arg0: i32) -> (i32, i32) {
    %c0_i32 = arith.constant 0 : i32
    %c0_i32_0 = arith.constant 0 : i32
    return %arg0, %c0_i32 : i32, i32
  }
  func.func @transform_4(%arg0: i32) -> (i32, i32) {
    %c0_i32 = arith.constant 0 : i32
    %c0_i32_0 = arith.constant 0 : i32
    %c0_i32_1 = arith.constant 0 : i32
    return %c0_i32, %c0_i32_0 : i32, i32
  }
  func.func @transform_5(%arg0: i32) -> (i32, i32) {
    %c0_i32 = arith.constant 0 : i32
    %c0_i32_0 = arith.constant 0 : i32
    %c0_i32_1 = arith.constant 0 : i32
    return %c0_i32, %c0_i32_0 : i32, i32
  }
  func.func @transform_6(%arg0: i32) -> (i32, i32) {
    %c0_i32 = arith.constant 0 : i32
    %c0_i32_0 = arith.constant 0 : i32
    return %arg0, %c0_i32 : i32, i32
  }
}

</mosaic_0001>

<bundles_post_ra>
// kernel: basic_block_forward.5
= control target key start
LH: loop header
LB: loop body
LE: loop exit
PB: predicated region body
PF: predicated region fallthrough
CT: control target
= control target key end

     0   :  { %s453_s12 = smov 0   ;;  %s612_s0 = inlined_call_operand.vmem [shape: f32[512,128], index: 0, kind: input, shape index: {}]   ;;  %s613_s1 = inlined_call_operand.vmem [shape: f32[1,128], index: 1, kind: input, shape index: {}]   ;;  %s614_s2 = inlined_call_operand.vmem [shape: f32[1,128], index: 2, kind: input, shape index: {}]   ;;  %s615_s3 = inlined_call_operand.vmem [shape: f32[512,128], index: 3, kind: output, shape index: {}]  }
   0x1 LB: > { %s404_s13 = sadd.s32 4294967295, %s431_s12   ;;  %p408_p0 = scmp.ge.s32.totalorder %s431_s12, 1  ;;  %s431_s12 = sphi %s453_s12, %s13_s12  }
   0x2   : > { %p138_p1 = scmp.lt.s32.totalorder %s431_s12, 3 }
   0x4   : > { %p139_p2 = pnand %p408_p0, %p138_p1 }
   0x5   : > { %s409_s14 = sshll.u32 (!%p139_p2), %s404_s13, 5 }
   0x6   : > { %142 = sbr.rel (%p139_p2) target bundleno = 44 (0x2c), region = 32  ;;  %p163_p3 = scmp.lt.s32.totalorder (!%p139_p2), %s409_s14, 63 }
   0xb   : > { %s617_s14 = smov (!%p163_p3, %s409_s14), 63  ;;  %v464_v0 = vld [vmem:[%s613_s1] ss:$0 sm:$0xff] }
   0xc   : > { %s410_s15 = sshll.u32 %s617_s14, 3  ;;  %v474_v1 = vld [vmem:[%s614_s2] ss:$0 sm:$0xff] }
   0xd   : > { %s469_s20 = scalar_lea.vmem %s612_s0, %s410_s15  ;;  %s497_s25 = scalar_lea.vmem %s615_s3, %s410_s15 }
   0xe   : > { %v174_v2 = vld [vmem:[%s469_s20] sm:$0xff]  ;;  %v175_v3 = vld [vmem:[%s469_s20 + $0x8] sm:$0xff]  ;;  %v176_v4 = vld [vmem:[%s469_s20 + $0x10] sm:$0xff] }
   0xf   : > { %v213_v5 = vmul.f32 %v464_v0, %v174_v2  ;;  %v214_v6 = vmul.f32 %v464_v0, %v175_v3  ;;  %v215_v7 = vmul.f32 %v464_v0, %v176_v4  ;;  %v177_v8 = vld [vmem:[%s469_s20 + $0x18] sm:$0xff]  ;;  %v178_v9 = vld [vmem:[%s469_s20 + $0x20] sm:$0xff]  ;;  %v179_v10 = vld [vmem:[%s469_s20 + $0x28] sm:$0xff] }
  0x10   : > { %v216_v11 = vmul.f32 %v464_v0, %v177_v8  ;;  %v217_v12 = vmul.f32 %v464_v0, %v178_v9  ;;  %v218_v13 = vmul.f32 %v464_v0, %v179_v10  ;;  %v180_v14 = vld [vmem:[%s469_s20 + $0x30] sm:$0xff]  ;;  %v181_v15 = vld [vmem:[%s469_s20 + $0x38] sm:$0xff]  ;;  %v182_v24 = vld [vmem:[%s469_s20 + $0x40] sm:$0xff] }
  0x11   : > { %v252_v16 = vadd.f32 %v474_v1, %v213_v5  ;;  %v253_v17 = vadd.f32 %v474_v1, %v214_v6  ;;  %v254_v18 = vadd.f32 %v474_v1, %v215_v7  ;;  %v219_v19 = vmul.f32 %v464_v0, %v180_v14  ;;  %v183_v25 = vld [vmem:[%s469_s20 + $0x48] sm:$0xff]  ;;  %v184_v26 = vld [vmem:[%s469_s20 + $0x50] sm:$0xff]  ;;  %v185_v31 = vld [vmem:[%s469_s20 + $0x58] sm:$0xff] }
  0x12   : > { %v255_v20 = vadd.f32 %v474_v1, %v216_v11  ;;  %v256_v21 = vadd.f32 %v474_v1, %v217_v12  ;;  %v257_v22 = vadd.f32 %v474_v1, %v218_v13  ;;  %v220_v23 = vmul.f32 %v464_v0, %v181_v15  ;;  %v186_v32 = vld [vmem:[%s469_s20 + $0x60] sm:$0xff]  ;;  %v187_v33 = vld [vmem:[%s469_s20 + $0x68] sm:$0xff]  ;;  %v188_v38 = vld [vmem:[%s469_s20 + $0x70] sm:$0xff] }
  0x13   : > { %v284_v27 = vmax.f32 %v252_v16, 0.0  ;;  %v285_v28 = vmax.f32 %v253_v17, 0.0  ;;  %v286_v29 = vmax.f32 %v254_v18, 0.0  ;;  %v258_v30 = vadd.f32 %v474_v1, %v219_v19  ;;  %v189_v43 = vld [vmem:[%s469_s20 + $0x78] sm:$0xff]  ;;  %v190_v56 = vld [vmem:[%s469_s20 + $0x80] sm:$0xff]  ;;  %v191_v57 = vld [vmem:[%s469_s20 + $0x88] sm:$0xff] }
  0x14   : > { %v287_v34 = vmax.f32 %v255_v20, 0.0  ;;  %v288_v35 = vmax.f32 %v256_v21, 0.0  ;;  %v289_v36 = vmax.f32 %v257_v22, 0.0  ;;  %v259_v37 = vadd.f32 %v474_v1, %v220_v23  ;;  %v192_v58 = vld [vmem:[%s469_s20 + $0x90] sm:$0xff]  ;;  %v193_v63 = vld [vmem:[%s469_s20 + $0x98] sm:$0xff]  ;;  %v194_v2 = vld [vmem:[%s469_s20 + $0xa0] sm:$0xff] }
  0x15   : > { %316 = vst [vmem:[%s497_s25] sm:$0xff] %v284_v27  ;;  %317 = vst [vmem:[%s497_s25 + $0x8] sm:$0xff] %v285_v28  ;;  %v290_v39 = vmax.f32 %v258_v30, 0.0  ;;  %v221_v40 = vmul.f32 %v464_v0, %v182_v24  ;;  %v222_v41 = vmul.f32 %v464_v0, %v183_v25  ;;  %v223_v42 = vmul.f32 %v464_v0, %v184_v26  ;;  %v195_v3 = vld [vmem:[%s469_s20 + $0xa8] sm:$0xff]  ;;  %v196_v8 = vld [vmem:[%s469_s20 + $0xb0] sm:$0xff] }
  0x16   : > { %318 = vst [vmem:[%s497_s25 + $0x10] sm:$0xff] %v286_v29  ;;  %319 = vst [vmem:[%s497_s25 + $0x18] sm:$0xff] %v287_v34  ;;  %v291_v44 = vmax.f32 %v259_v37, 0.0  ;;  %v224_v45 = vmul.f32 %v464_v0, %v185_v31  ;;  %v225_v46 = vmul.f32 %v464_v0, %v186_v32  ;;  %v226_v47 = vmul.f32 %v464_v0, %v187_v33  ;;  %v197_v13 = vld [vmem:[%s469_s20 + $0xb8] sm:$0xff]  ;;  %v198_v26 = vld [vmem:[%s469_s20 + $0xc0] sm:$0xff] }
  0x17   : > { %320 = vst [vmem:[%s497_s25 + $0x20] sm:$0xff] %v288_v35  ;;  %321 = vst [vmem:[%s497_s25 + $0x28] sm:$0xff] %v289_v36  ;;  %v260_v48 = vadd.f32 %v474_v1, %v221_v40  ;;  %v261_v49 = vadd.f32 %v474_v1, %v222_v41  ;;  %v262_v50 = vadd.f32 %v474_v1, %v223_v42  ;;  %v199_v27 = vld [vmem:[%s469_s20 + $0xc8] sm:$0xff]  ;;  %v200_v28 = vld [vmem:[%s469_s20 + $0xd0] sm:$0xff] }
  0x18   : > { %322 = vst [vmem:[%s497_s25 + $0x30] sm:$0xff] %v290_v39  ;;  %v227_v51 = vmul.f32 %v464_v0, %v188_v38  ;;  %323 = vst [vmem:[%s497_s25 + $0x38] sm:$0xff] %v291_v44  ;;  %v263_v52 = vadd.f32 %v474_v1, %v224_v45  ;;  %v264_v53 = vadd.f32 %v474_v1, %v225_v46  ;;  %v201_v33 = vld [vmem:[%s469_s20 + $0xd8] sm:$0xff]  ;;  %v202_v34 = vld [vmem:[%s469_s20 + $0xe0] sm:$0xff] }
  0x19   : > { %v265_v54 = vadd.f32 %v474_v1, %v226_v47  ;;  %v228_v55 = vmul.f32 %v464_v0, %v189_v43  ;;  %v292_v59 = vmax.f32 %v260_v48, 0.0  ;;  %v293_v60 = vmax.f32 %v261_v49, 0.0  ;;  %v203_v35 = vld [vmem:[%s469_s20 + $0xe8] sm:$0xff]  ;;  %v204_v40 = vld [vmem:[%s469_s20 + $0xf0] sm:$0xff]  ;;  %v205_v45 = vld [vmem:[%s469_s20 + $0xf8] sm:$0xff] }
  0x1a   : > { %v294_v61 = vmax.f32 %v262_v50, 0.0  ;;  %v266_v62 = vadd.f32 %v474_v1, %v227_v51  ;;  %v295_v4 = vmax.f32 %v263_v52, 0.0  ;;  %v296_v5 = vmax.f32 %v264_v53, 0.0 }
  0x1b   : > { %v297_v6 = vmax.f32 %v265_v54, 0.0  ;;  %v267_v7 = vadd.f32 %v474_v1, %v228_v55  ;;  %324 = vst [vmem:[%s497_s25 + $0x40] sm:$0xff] %v292_v59  ;;  %325 = vst [vmem:[%s497_s25 + $0x48] sm:$0xff] %v293_v60  ;;  %v229_v10 = vmul.f32 %v464_v0, %v190_v56  ;;  %v230_v11 = vmul.f32 %v464_v0, %v191_v57 }
  0x1c   : > { %326 = vst [vmem:[%s497_s25 + $0x50] sm:$0xff] %v294_v61  ;;  %v298_v9 = vmax.f32 %v266_v62, 0.0  ;;  %v231_v12 = vmul.f32 %v464_v0, %v192_v58  ;;  %327 = vst [vmem:[%s497_s25 + $0x58] sm:$0xff] %v295_v4  ;;  %v232_v15 = vmul.f32 %v464_v0, %v193_v63  ;;  %v233_v16 = vmul.f32 %v464_v0, %v194_v2 }
  0x1d   : > { %328 = vst [vmem:[%s497_s25 + $0x60] sm:$0xff] %v296_v5  ;;  %329 = vst [vmem:[%s497_s25 + $0x68] sm:$0xff] %v297_v6  ;;  %v299_v14 = vmax.f32 %v267_v7, 0.0  ;;  %v234_v17 = vmul.f32 %v464_v0, %v195_v3  ;;  %v268_v18 = vadd.f32 %v474_v1, %v229_v10  ;;  %v269_v19 = vadd.f32 %v474_v1, %v230_v11 }
  0x1e   : > { %330 = vst [vmem:[%s497_s25 + $0x70] sm:$0xff] %v298_v9  ;;  %v270_v20 = vadd.f32 %v474_v1, %v231_v12  ;;  %v235_v21 = vmul.f32 %v464_v0, %v196_v8  ;;  %v271_v22 = vadd.f32 %v474_v1, %v232_v15  ;;  %v272_v23 = vadd.f32 %v474_v1, %v233_v16 }
  0x1f   : > { %331 = vst [vmem:[%s497_s25 + $0x78] sm:$0xff] %v299_v14  ;;  %v273_v24 = vadd.f32 %v474_v1, %v234_v17  ;;  %v236_v25 = vmul.f32 %v464_v0, %v197_v13  ;;  %v300_v29 = vmax.f32 %v268_v18, 0.0  ;;  %v301_v30 = vmax.f32 %v269_v19, 0.0 }
  0x20   : > { %v302_v31 = vmax.f32 %v270_v20, 0.0  ;;  %v274_v32 = vadd.f32 %v474_v1, %v235_v21  ;;  %v303_v36 = vmax.f32 %v271_v22, 0.0  ;;  %v304_v37 = vmax.f32 %v272_v23, 0.0 }
  0x21   : > { %v305_v38 = vmax.f32 %v273_v24, 0.0  ;;  %v275_v39 = vadd.f32 %v474_v1, %v236_v25  ;;  %332 = vst [vmem:[%s497_s25 + $0x80] sm:$0xff] %v300_v29  ;;  %333 = vst [vmem:[%s497_s25 + $0x88] sm:$0xff] %v301_v30  ;;  %v237_v42 = vmul.f32 %v464_v0, %v198_v26  ;;  %v238_v43 = vmul.f32 %v464_v0, %v199_v27 }
  0x22   : > { %334 = vst [vmem:[%s497_s25 + $0x90] sm:$0xff] %v302_v31  ;;  %v306_v41 = vmax.f32 %v274_v32, 0.0  ;;  %v239_v44 = vmul.f32 %v464_v0, %v200_v28  ;;  %335 = vst [vmem:[%s497_s25 + $0x98] sm:$0xff] %v303_v36  ;;  %v240_v47 = vmul.f32 %v464_v0, %v201_v33  ;;  %v241_v48 = vmul.f32 %v464_v0, %v202_v34 }
  0x23   : > { %336 = vst [vmem:[%s497_s25 + $0xa0] sm:$0xff] %v304_v37  ;;  %337 = vst [vmem:[%s497_s25 + $0xa8] sm:$0xff] %v305_v38  ;;  %v307_v46 = vmax.f32 %v275_v39, 0.0  ;;  %v242_v49 = vmul.f32 %v464_v0, %v203_v35  ;;  %v276_v50 = vadd.f32 %v474_v1, %v237_v42  ;;  %v277_v51 = vadd.f32 %v474_v1, %v238_v43 }
  0x24   : > { %338 = vst [vmem:[%s497_s25 + $0xb0] sm:$0xff] %v306_v41  ;;  %v278_v52 = vadd.f32 %v474_v1, %v239_v44  ;;  %v243_v53 = vmul.f32 %v464_v0, %v204_v40  ;;  %v279_v54 = vadd.f32 %v474_v1, %v240_v47  ;;  %v280_v55 = vadd.f32 %v474_v1, %v241_v48 }
  0x25   : > { %339 = vst [vmem:[%s497_s25 + $0xb8] sm:$0xff] %v307_v46  ;;  %v281_v56 = vadd.f32 %v474_v1, %v242_v49  ;;  %v244_v57 = vmul.f32 %v464_v0, %v205_v45  ;;  %v308_v58 = vmax.f32 %v276_v50, 0.0  ;;  %v309_v59 = vmax.f32 %v277_v51, 0.0 }
  0x26   : > { %v310_v60 = vmax.f32 %v278_v52, 0.0  ;;  %v282_v61 = vadd.f32 %v474_v1, %v243_v53  ;;  %v311_v62 = vmax.f32 %v279_v54, 0.0  ;;  %v312_v63 = vmax.f32 %v280_v55, 0.0 }
  0x27   : > { %v313_v2 = vmax.f32 %v281_v56, 0.0  ;;  %v283_v3 = vadd.f32 %v474_v1, %v244_v57  ;;  %340 = vst [vmem:[%s497_s25 + $0xc0] sm:$0xff] %v308_v58  ;;  %341 = vst [vmem:[%s497_s25 + $0xc8] sm:$0xff] %v309_v59 }
  0x28   : > { %342 = vst [vmem:[%s497_s25 + $0xd0] sm:$0xff] %v310_v60  ;;  %v314_v4 = vmax.f32 %v282_v61, 0.0  ;;  %343 = vst [vmem:[%s497_s25 + $0xd8] sm:$0xff] %v311_v62 }
  0x29   : > { %344 = vst [vmem:[%s497_s25 + $0xe0] sm:$0xff] %v312_v63  ;;  %345 = vst [vmem:[%s497_s25 + $0xe8] sm:$0xff] %v313_v2  ;;  %v315_v0 = vmax.f32 %v283_v3, 0.0 }
  0x2a   : > { %346 = vst [vmem:[%s497_s25 + $0xf0] sm:$0xff] %v314_v4 }
  0x2b   : > { %347 = vst [vmem:[%s497_s25 + $0xf8] sm:$0xff] %v315_v0 }
  0x2c PF: > { %s13_s12 = sadd.s32 1, %s431_s12  }
  0x2d   : > { %p10_p4 = scmp.ge.s32.totalorder %s13_s12, 4  }
  0x2f   :  { %12 = sbr.rel (!%p10_p4) target bundleno = 1 (0x1), region = 62 }

// kernel: basic_block_forward.4
= control target key start
LH: loop header
LB: loop body
LE: loop exit
PB: predicated region body
PF: predicated region fallthrough
CT: control target
= control target key end

     0   :  { %s2190_s27 = smov 0   ;;  %s2929_s0 = inlined_call_operand.vmem [shape: f32[512,36], index: 0, kind: input, shape index: {}]   ;;  %s2930_s1 = inlined_call_operand.vmem [shape: f32[36,128], index: 1, kind: input, shape index: {}]   ;;  %s2931_s2 = inlined_call_operand.vmem [shape: f32[512,4], index: 2, kind: input, shape index: {}]   ;;  %s2932_s3 = inlined_call_operand.vmem [shape: f32[4,128], index: 3, kind: input, shape index: {}]   ;;  %s2933_s4 = inlined_call_operand.vmem [shape: f32[1,128], index: 4, kind: input, shape index: {}]   ;;  %s2934_s5 = inlined_call_operand.vmem [shape: f32[512,128], index: 5, kind: output, shape index: {0}]   ;;  %s2935_s6 = inlined_call_operand.vmem [shape: f32[512,128], index: 6, kind: output, shape index: {1}]   ;;  %s2936_s7 = inlined_call_operand.vmem [shape: f32[2,8,128], index: 7, kind: output, shape index: {2}]   ;;  %s2937_s8 = inlined_call_operand.vmem [shape: f32[2,8,128], index: 8, kind: output, shape index: {3}]  }
   0x1 LB: > { %s2196_s28 = sadd.s32 4294967295, %s2142_s27   ;;  %p1836_p0 = scmp.ge.s32.totalorder %s2142_s27, 1  ;;  %s2142_s27 = sphi %s2190_s27, %s19_s27  }
   0x2   : > { %p281_p1 = scmp.lt.s32.totalorder %s2142_s27, 3 }
   0x4   : > { %p282_p2 = pnand %p1836_p0, %p281_p1 }
   0x5   : > { %s1837_s11 = sshll.u32 (!%p282_p2), %s2196_s28, 5  ;;  %s1914_s29 = sshll.u32 (!%p282_p2), %s2196_s28, 8 }
   0x6   : > { %285 = sbr.rel (%p282_p2) target bundleno = 322 (0x142), region = 40  ;;  %p334_p3 = scmp.lt.s32.totalorder (!%p282_p2), %s1837_s11, 63 }
   0x7   : > { %p357_p4 = scmp.lt.s32.totalorder (!%p282_p2), %s2196_s28, 1 }
   0xb   : > { %v401_v0 = vld [vmem:[%s2930_s1 + $0x20] sm:$0xf]  ;;  %vm499_vm0 = vcmask 1043456   ;;  %v400_v1 = vld [vmem:[%s2930_s1 + $0x18] sm:$0xff]  ;;  %v399_v3 = vld [vmem:[%s2930_s1 + $0x10] sm:$0xff]  ;;  %s2939_s11 = smov (!%p334_p3, %s1837_s11), 63 }
   0xc   : > { %2019 = vmatprep.subr.msk.mxu0 %vm499_vm0, %v401_v0  ;;  %v760_v2 = vld [vmem:[%s2932_s3] sm:$0xf]  ;;  %v398_v4 = vld [vmem:[%s2930_s1 + $0x8] sm:$0xff]  ;;  %s2216_s18 = sshll.u32 %s2939_s11, 3  ;;  %vm768_vm1 = vcmask 31744   ;;  %vm402_vm2 = vcmask 293888  }
   0xd   : > { %2020 = vmatpush3.msk.msra.mxu0 %vm499_vm0, %v401_v0  ;;  %2077 = vmatprep.subr.msk.mxu1 %vm499_vm0, %v760_v2  ;;  %s2222_s21 = scalar_lea.vmem %s2931_s2, %s2216_s18  ;;  %v397_v5 = vld [vmem:[%s2930_s1] sm:$0xff]  ;;  %s2231_s26 = scalar_lea.vmem %s2929_s0, %s2216_s18 }
   0xe   : > { %2021 = vmatprep.subr.mxu0 %v400_v1  ;;  %2078 = vmatpush3.msk.msra.mxu1 %vm499_vm0, %v760_v2  ;;  %v728_v6 = vld [vmem:[%s2222_s21] sm:$0xff]  ;;  %v729_v7 = vld [vmem:[%s2222_s21 + $0x8] sm:$0xff]  ;;  %v730_v10 = vld [vmem:[%s2222_s21 + $0x10] sm:$0xff]  ;;  %s2508_s12 = scalar_lea.vmem %s2935_s6, %s2216_s18  ;;  %s2514_s15 = scalar_lea.vmem %s2934_s5, %s2216_s18 }
   0xf   : > { %2022 = vmatpush3.msra.mxu0 %v400_v1  ;;  %v365_v8 = vld [vmem:[%s2231_s26] sm:$0xff]  ;;  %2079 = vmatprep.mubr.msk.f32.mxu1 %vm768_vm1, %v728_v6  ;;  %v366_v9 = vld [vmem:[%s2231_s26 + $0x8] sm:$0xff]  ;;  %v367_v11 = vld [vmem:[%s2231_s26 + $0x10] sm:$0xff]  ;;  %v1158_v6 = vlaneseq  ;;  %s2941_s28 = smov (!%p357_p4, %s2196_s28), 1 }
  0x10   : > { %2023 = vmatprep.subr.mxu0 %v399_v3  ;;  %2080 = vmatmul.mubr.msk.f32.vlgmr.msra.gmra.mxu1 %vm768_vm1, %v729_v7  ;;  %v731_v12 = vld [vmem:[%s2222_s21 + $0x18] sm:$0xff]  ;;  %v732_v13 = vld [vmem:[%s2222_s21 + $0x20] sm:$0xff]  ;;  %v733_v16 = vld [vmem:[%s2222_s21 + $0x28] sm:$0xff]  ;;  %s1845_s16 = sshll.u32 %s2941_s28, 3 }
  0x11   : > { %2024 = vmatpush3.msra.mxu0 %v399_v3  ;;  %2029 = vmatprep.mubr.msk.f32.mxu0 %vm402_vm2, %v365_v8  ;;  %v368_v14 = vld [vmem:[%s2231_s26 + $0x18] sm:$0xff]  ;;  %v369_v15 = vld [vmem:[%s2231_s26 + $0x20] sm:$0xff]  ;;  %v734_v17 = vld [vmem:[%s2222_s21 + $0x30] sm:$0xff]  ;;  %v2361_v7 = vshrl.u32 %v1158_v6, 7  ;;  %s360_s19 = scalar_lea.vmem %s2936_s7, %s1845_s16  ;;  %s364_s22 = scalar_lea.vmem %s2937_s8, %s1845_s16 }
  0x12   : > { %2025 = vmatprep.subr.mxu0 %v398_v4  ;;  %2082 = vmatprep.mubr.msk.f32.mxu1 %vm768_vm1, %v730_v10  ;;  %v370_v18 = vld [vmem:[%s2231_s26 + $0x28] sm:$0xff]  ;;  %v371_v19 = vld [vmem:[%s2231_s26 + $0x30] sm:$0xff]  ;;  %v735_v20 = vld [vmem:[%s2222_s21 + $0x38] sm:$0xff]  ;;  %v2366_v10 = vstv %s1914_s29 }
  0x13   : > { %2026 = vmatpush3.msra.mxu0 %v398_v4  ;;  %v736_v21 = vld [vmem:[%s2222_s21 + $0x40] sm:$0xff]  ;;  %v372_v22 = vld [vmem:[%s2231_s26 + $0x38] sm:$0xff]  ;;  %v737_v24 = vld [vmem:[%s2222_s21 + $0x48] sm:$0xff]  ;;  %v1160_v8 = vadd.s32 8, %v2361_v7  ;;  %v1183_v6 = vadd.s32 192, %v2361_v7 }
  0x14   : > { %2027 = vmatprep.subr.mxu0 %v397_v5  ;;  %2083 = vmatmul.mubr.msk.f32.gmra.mxu1 %vm768_vm1, %v731_v12  ;;  %v373_v23 = vld [vmem:[%s2231_s26 + $0x40] sm:$0xff]  ;;  %v738_v25 = vld [vmem:[%s2222_s21 + $0x50] sm:$0xff]  ;;  %v374_v26 = vld [vmem:[%s2231_s26 + $0x48] sm:$0xff]  ;;  %v1164_v12 = vadd.s32 40, %v2361_v7 }
  0x15   : > { %2028 = vmatpush3.msra.mxu0 %v397_v5  ;;  %2085 = vmatprep.mubr.msk.f32.mxu1 %vm768_vm1, %v732_v13  ;;  %v375_v27 = vld [vmem:[%s2231_s26 + $0x50] sm:$0xff]  ;;  %v739_v28 = vld [vmem:[%s2222_s21 + $0x58] sm:$0xff]  ;;  %v740_v29 = vld [vmem:[%s2222_s21 + $0x60] sm:$0xff]  ;;  %v1163_v13 = vadd.s32 32, %v2361_v7 }
  0x16   : > { %2030 = vmatmul.mubr.msk.f32.vlgmr.msra.gmra.mxu0 %vm402_vm2, %v366_v9  ;;  %v376_v30 = vld [vmem:[%s2231_s26 + $0x58] sm:$0xff]  ;;  %v377_v31 = vld [vmem:[%s2231_s26 + $0x60] sm:$0xff]  ;;  %v741_v32 = vld [vmem:[%s2222_s21 + $0x68] sm:$0xff]  ;;  %v1162_v9 = vadd.s32 24, %v2361_v7 }
  0x17   : > { %2032 = vmatprep.mubr.msk.f32.mxu0 %vm402_vm2, %v367_v11  ;;  %v742_v33 = vld [vmem:[%s2222_s21 + $0x70] sm:$0xff]  ;;  %v378_v34 = vld [vmem:[%s2231_s26 + $0x68] sm:$0xff]  ;;  %v743_v36 = vld [vmem:[%s2222_s21 + $0x78] sm:$0xff]  ;;  %v1161_v11 = vadd.s32 16, %v2361_v7 }
  0x18   : > { %2086 = vmatmul.mubr.msk.f32.gmra.mxu1 %vm768_vm1, %v733_v16  ;;  %v379_v35 = vld [vmem:[%s2231_s26 + $0x70] sm:$0xff]  ;;  %v744_v37 = vld [vmem:[%s2222_s21 + $0x80] sm:$0xff]  ;;  %v380_v38 = vld [vmem:[%s2231_s26 + $0x78] sm:$0xff]  ;;  %v1195_v16 = vadd.s32 %v2366_v10, %v1162_v9  ;;  %v1185_v9 = vadd.s32 208, %v2361_v7 }
  0x19   : > { %2088 = vmatprep.mubr.msk.f32.mxu1 %vm768_vm1, %v734_v17  ;;  %v381_v39 = vld [vmem:[%s2231_s26 + $0x80] sm:$0xff]  ;;  %v745_v40 = vld [vmem:[%s2222_s21 + $0x88] sm:$0xff]  ;;  %v746_v41 = vld [vmem:[%s2222_s21 + $0x90] sm:$0xff]  ;;  %v1194_v17 = vadd.s32 %v2366_v10, %v1161_v11 }
  0x1a   : > { %2033 = vmatmul.mubr.msk.f32.gmra.mxu0 %vm402_vm2, %v368_v14  ;;  %v382_v42 = vld [vmem:[%s2231_s26 + $0x88] sm:$0xff]  ;;  %v383_v43 = vld [vmem:[%s2231_s26 + $0x90] sm:$0xff]  ;;  %v747_v44 = vld [vmem:[%s2222_s21 + $0x98] sm:$0xff]  ;;  %v1193_v14 = vadd.s32 %v2366_v10, %v1160_v8  ;;  %vm1227_vm5 = vcmp.lt.s32.totalorder %v1195_v16, 512  ;;  %v1186_v8 = vadd.s32 216, %v2361_v7 }
  0x1b   : > { %2035 = vmatprep.mubr.msk.f32.mxu0 %vm402_vm2, %v369_v15  ;;  %v748_v45 = vld [vmem:[%s2222_s21 + $0xa0] sm:$0xff]  ;;  %v384_v46 = vld [vmem:[%s2231_s26 + $0x98] sm:$0xff]  ;;  %v749_v48 = vld [vmem:[%s2222_s21 + $0xa8] sm:$0xff]  ;;  %v1192_v15 = vadd.s32 %v2366_v10, %v2361_v7  ;;  %vm1226_vm6 = vcmp.lt.s32.totalorder %v1194_v17, 512 }
  0x1c   : > { %2089 = vmatmul.mubr.msk.f32.gmra.mxu1 %vm768_vm1, %v735_v20  ;;  %v385_v47 = vld [vmem:[%s2231_s26 + $0xa0] sm:$0xff]  ;;  %v750_v49 = vld [vmem:[%s2222_s21 + $0xb0] sm:$0xff]  ;;  %v386_v50 = vld [vmem:[%s2231_s26 + $0xa8] sm:$0xff]  ;;  %v1166_v20 = vadd.s32 56, %v2361_v7  ;;  %vm1225_vm3 = vcmp.lt.s32.totalorder %v1193_v14, 512  ;;  %v1187_v14 = vadd.s32 224, %v2361_v7 }
  0x1d   : > { %2091 = vmatprep.mubr.msk.f32.mxu1 %vm768_vm1, %v736_v21  ;;  %v387_v51 = vld [vmem:[%s2231_s26 + $0xb0] sm:$0xff]  ;;  %v751_v52 = vld [vmem:[%s2222_s21 + $0xb8] sm:$0xff]  ;;  %v752_v53 = vld [vmem:[%s2222_s21 + $0xc0] sm:$0xff]  ;;  %v1165_v21 = vadd.s32 48, %v2361_v7  ;;  %vm1224_vm4 = vcmp.lt.s32.totalorder %v1192_v15, 512  ;;  %v1190_v15 = vadd.s32 248, %v2361_v7 }
  0x1e   : > { %2036 = vmatmul.mubr.msk.f32.gmra.mxu0 %vm402_vm2, %v370_v18  ;;  %v388_v54 = vld [vmem:[%s2231_s26 + $0xb8] sm:$0xff]  ;;  %v389_v55 = vld [vmem:[%s2231_s26 + $0xc0] sm:$0xff]  ;;  %v753_v56 = vld [vmem:[%s2222_s21 + $0xc8] sm:$0xff]  ;;  %v1197_v18 = vadd.s32 %v2366_v10, %v1164_v12 }
  0x1f   : > { %2038 = vmatprep.mubr.msk.f32.mxu0 %vm402_vm2, %v371_v19  ;;  %v754_v57 = vld [vmem:[%s2222_s21 + $0xd0] sm:$0xff]  ;;  %v390_v58 = vld [vmem:[%s2231_s26 + $0xc8] sm:$0xff]  ;;  %v755_v60 = vld [vmem:[%s2222_s21 + $0xd8] sm:$0xff]  ;;  %v1196_v19 = vadd.s32 %v2366_v10, %v1163_v13  ;;  %v1188_v13 = vadd.s32 232, %v2361_v7 }
  0x20   : > { %2092 = vmatmul.mubr.msk.f32.gmra.mxu1 %vm768_vm1, %v737_v24  ;;  %v391_v59 = vld [vmem:[%s2231_s26 + $0xd0] sm:$0xff]  ;;  %v756_v61 = vld [vmem:[%s2222_s21 + $0xe0] sm:$0xff]  ;;  %v392_v62 = vld [vmem:[%s2231_s26 + $0xd8] sm:$0xff]  ;;  %v1170_v24 = vadd.s32 88, %v2361_v7  ;;  %vm1229_vm7 = vcmp.lt.s32.totalorder %v1197_v18, 512 }
  0x21   : > { %2094 = vmatprep.mubr.msk.f32.mxu1 %vm768_vm1, %v738_v25  ;;  %v393_v63 = vld [vmem:[%s2231_s26 + $0xe0] sm:$0xff]  ;;  %v757_v0 = vld [vmem:[%s2222_s21 + $0xe8] sm:$0xff]  ;;  %v758_v1 = vld [vmem:[%s2222_s21 + $0xf0] sm:$0xff]  ;;  %v1169_v25 = vadd.s32 80, %v2361_v7  ;;  %vm1228_vm8 = vcmp.lt.s32.totalorder %v1196_v19, 512  ;;  %v1216_v19 = vadd.s32 %v2366_v10, %v1183_v6 }
  0x22   : > { %2039 = vmatmul.mubr.msk.f32.gmra.mxu0 %vm402_vm2, %v372_v22  ;;  %v394_v2 = vld [vmem:[%s2231_s26 + $0xe8] sm:$0xff]  ;;  %v395_v3 = vld [vmem:[%s2231_s26 + $0xf0] sm:$0xff]  ;;  %v759_v4 = vld [vmem:[%s2222_s21 + $0xf8] sm:$0xff]  ;;  %v1168_v22 = vadd.s32 72, %v2361_v7 }
  0x23   : > { %2041 = vmatprep.mubr.msk.f32.mxu0 %vm402_vm2, %v373_v23  ;;  %v396_v5 = vld [vmem:[%s2231_s26 + $0xf8] sm:$0xff]  ;;  %v1167_v23 = vadd.s32 64, %v2361_v7 }
  0x24   : > { %2095 = vmatmul.mubr.msk.f32.gmra.mxu1 %vm768_vm1, %v739_v28  ;;  %v1174_v28 = vadd.s32 120, %v2361_v7 }
  0x25   : > { %2097 = vmatprep.mubr.msk.f32.mxu1 %vm768_vm1, %v740_v29  ;;  %v1199_v29 = vadd.s32 %v2366_v10, %v1166_v20  ;;  %v1219_v20 = vadd.s32 %v2366_v10, %v1186_v8 }
  0x26   : > { %2042 = vmatmul.mubr.msk.f32.gmra.mxu0 %vm402_vm2, %v374_v26  ;;  %v1172_v26 = vadd.s32 104, %v2361_v7 }
  0x27   : > { %2044 = vmatprep.mubr.msk.f32.mxu0 %vm402_vm2, %v375_v27  ;;  %v1171_v27 = vadd.s32 96, %v2361_v7  ;;  %vm1231_vm9 = vcmp.lt.s32.totalorder %v1199_v29, 512  ;;  %v1223_v29 = vadd.s32 %v2366_v10, %v1190_v15 }
  0x28   : > { %2098 = vmatmul.mubr.msk.f32.gmra.mxu1 %vm768_vm1, %v741_v32  ;;  %v1200_v32 = vadd.s32 %v2366_v10, %v1167_v23  ;;  %v1221_v23 = vadd.s32 %v2366_v10, %v1188_v13 }
  0x29   : > { %2100 = vmatprep.mubr.msk.f32.mxu1 %vm768_vm1, %v742_v33  ;;  %v1203_v33 = vadd.s32 %v2366_v10, %v1170_v24  ;;  %v1220_v24 = vadd.s32 %v2366_v10, %v1187_v14 }
  0x2a   : > { %2045 = vmatmul.mubr.msk.f32.gmra.mxu0 %vm402_vm2, %v376_v30  ;;  %v1198_v30 = vadd.s32 %v2366_v10, %v1165_v21  ;;  %vm1232_vm12 = vcmp.lt.s32.totalorder %v1200_v32, 512  ;;  %v1218_v21 = vadd.s32 %v2366_v10, %v1185_v9 }
  0x2b   : > { %2047 = vmatprep.mubr.msk.f32.mxu0 %vm402_vm2, %v377_v31  ;;  %v1201_v31 = vadd.s32 %v2366_v10, %v1168_v22  ;;  %vm1235_vm13 = vcmp.lt.s32.totalorder %v1203_v33, 512 }
  0x2c   : > { %2101 = vmatmul.mubr.msk.f32.gmra.mxu1 %vm768_vm1, %v743_v36  ;;  %v1204_v36 = vadd.s32 %v2366_v10, %v1171_v27  ;;  %vm1230_vm10 = vcmp.lt.s32.totalorder %v1198_v30, 512 }
  0x2d   : > { %2103 = vmatprep.mubr.msk.f32.mxu1 %vm768_vm1, %v744_v37  ;;  %v1207_v37 = vadd.s32 %v2366_v10, %v1174_v28  ;;  %vm1233_vm11 = vcmp.lt.s32.totalorder %v1201_v31, 512 }
  0x2e   : > { %2048 = vmatmul.mubr.msk.f32.gmra.mxu0 %vm402_vm2, %v378_v34  ;;  %v1202_v34 = vadd.s32 %v2366_v10, %v1169_v25  ;;  %vm1236_vm0 = vcmp.lt.s32.totalorder %v1204_v36, 512  ;;  %v2487_v25 = vld [vmem:[%s2933_s4] ss:$0 sm:$0xff] }
  0x2f   : > { %2050 = vmatprep.mubr.msk.f32.mxu0 %vm402_vm2, %v379_v35  ;;  %v1205_v35 = vadd.s32 %v2366_v10, %v1172_v26 }
  0x30   : > { %2104 = vmatmul.mubr.msk.f32.gmra.mxu1 %vm768_vm1, %v745_v40  ;;  %vm1234_vm14 = vcmp.lt.s32.totalorder %v1202_v34, 512  ;;  %v1189_v34 = vadd.s32 240, %v2361_v7 }
  0x31   : > { %2106 = vmatprep.mubr.msk.f32.mxu1 %vm768_vm1, %v746_v41  ;;  %vm1237_vm15 = vcmp.lt.s32.totalorder %v1205_v35, 512 }
  0x32   : > { %2051 = vmatmul.mubr.msk.f32.gmra.mxu0 %vm402_vm2, %v380_v38  ;;  %v2144_v38 = vmov 0.0  }
  0x33   : > { %2053 = vmatprep.mubr.msk.f32.mxu0 %vm402_vm2, %v381_v39  ;;  %v2398_v39 = vsel %vm1225_vm3, 1.0, %v2144_v38  ;;  %v2402_v40 = vsel %vm1224_vm4, 1.0, %v2144_v38  ;;  %v2406_v41 = vsel %vm1227_vm5, 1.0, %v2144_v38 }
  0x34   : > { %2107 = vmatmul.mubr.msk.f32.gmra.mxu1 %vm768_vm1, %v747_v44  ;;  %v2415_v44 = vsel %vm1229_vm7, 1.0, %v2144_v38 }
  0x35   : > { %2109 = vmatprep.mubr.msk.f32.mxu1 %vm768_vm1, %v748_v45  ;;  %v2419_v45 = vsel %vm1228_vm8, 1.0, %v2144_v38 }
  0x36   : > { %2054 = vmatmul.mubr.msk.f32.gmra.mxu0 %vm402_vm2, %v382_v42  ;;  %v1173_v42 = vadd.s32 112, %v2361_v7 }
  0x37   : > { %2056 = vmatprep.mubr.msk.f32.mxu0 %vm402_vm2, %v383_v43  ;;  %v2411_v43 = vsel %vm1226_vm6, 1.0, %v2144_v38 }
  0x38   : > { %2110 = vmatmul.mubr.msk.f32.gmra.mxu1 %vm768_vm1, %v749_v48  ;;  %v1175_v48 = vadd.s32 128, %v2361_v7 }
  0x39   : > { %2112 = vmatprep.mubr.msk.f32.mxu1 %vm768_vm1, %v750_v49  ;;  %v1178_v49 = vadd.s32 152, %v2361_v7 }
  0x3a   : > { %2057 = vmatmul.mubr.msk.f32.gmra.mxu0 %vm402_vm2, %v384_v46  ;;  %v1206_v46 = vadd.s32 %v2366_v10, %v1173_v42 }
  0x3b   : > { %2059 = vmatprep.mubr.msk.f32.mxu0 %vm402_vm2, %v385_v47  ;;  %v1176_v47 = vadd.s32 136, %v2361_v7 }
  0x3c   : > { %2113 = vmatmul.mubr.msk.f32.gmra.mxu1 %vm768_vm1, %v751_v52  ;;  %v2432_v52 = vsel %vm1233_vm11, 1.0, %v2144_v38 }
  0x3d   : > { %2115 = vmatprep.mubr.msk.f32.mxu1 %vm768_vm1, %v752_v53  ;;  %v1177_v53 = vadd.s32 144, %v2361_v7 }
  0x3e   : > { %2060 = vmatmul.mubr.msk.f32.gmra.mxu0 %vm402_vm2, %v386_v50  ;;  %v2426_v50 = vsel %vm1231_vm9, 1.0, %v2144_v38 }
  0x3f   : > { %2062 = vmatprep.mubr.msk.f32.mxu0 %vm402_vm2, %v387_v51  ;;  %v2429_v51 = vsel %vm1230_vm10, 1.0, %v2144_v38 }
  0x40   : > { %2116 = vmatmul.mubr.msk.f32.gmra.mxu1 %vm768_vm1, %v753_v56  ;;  %v2442_v56 = vsel %vm1234_vm14, 1.0, %v2144_v38  ;;  %vm1250_vm14 = vcmp.lt.s32.totalorder %v1218_v21, 512 }
  0x41   : > { %2118 = vmatprep.mubr.msk.f32.mxu1 %vm768_vm1, %v754_v57  ;;  %v1180_v57 = vadd.s32 168, %v2361_v7 }
  0x42   : > { %2063 = vmatmul.mubr.msk.f32.gmra.mxu0 %vm402_vm2, %v388_v54  ;;  %v2436_v54 = vsel %vm1232_vm12, 1.0, %v2144_v38  ;;  %vm1248_vm12 = vcmp.lt.s32.totalorder %v1216_v19, 512 }
  0x43   : > { %2065 = vmatprep.mubr.msk.f32.mxu0 %vm402_vm2, %v389_v55  ;;  %v2439_v55 = vsel %vm1235_vm13, 1.0, %v2144_v38  ;;  %vm1251_vm13 = vcmp.lt.s32.totalorder %v1219_v20, 512 }
  0x44   : > { %2119 = vmatmul.mubr.msk.f32.gmra.mxu1 %vm768_vm1, %v755_v60 }
  0x45   : > { %2121 = vmatprep.mubr.msk.f32.mxu1 %vm768_vm1, %v756_v61  ;;  %v1179_v61 = vadd.s32 160, %v2361_v7 }
  0x46   : > { %2066 = vmatmul.mubr.msk.f32.gmra.mxu0 %vm402_vm2, %v390_v58  ;;  %v2446_v58 = vsel %vm1237_vm15, 1.0, %v2144_v38  ;;  %vm1253_vm15 = vcmp.lt.s32.totalorder %v1221_v23, 512 }
  0x47   : > { %2068 = vmatprep.mubr.msk.f32.mxu0 %vm402_vm2, %v391_v59  ;;  %v2449_v59 = vsel %vm1236_vm0, 1.0, %v2144_v38  ;;  %v1212_v12 = vadd.s32 %v2366_v10, %v1179_v61  ;;  %vm1252_vm0 = vcmp.lt.s32.totalorder %v1220_v24, 512 }
  0x48   : > { %2122 = vmatmul.mubr.msk.f32.gmra.mxu1 %vm768_vm1, %v757_v0  ;;  %v1211_v0 = vadd.s32 %v2366_v10, %v1178_v49  ;;  %v2545_v49 = vsel %vm1250_vm14, 1.0, %v2144_v38 }
  0x49   : > { %2124 = vmatprep.mubr.msk.f32.mxu1 %vm768_vm1, %v758_v1  ;;  %v1210_v1 = vadd.s32 %v2366_v10, %v1177_v53  ;;  %vm1244_vm8 = vcmp.lt.s32.totalorder %v1212_v12, 512 }
  0x4a   : > { %2069 = vmatmul.mubr.msk.f32.gmra.mxu0 %vm402_vm2, %v392_v62  ;;  %v1209_v62 = vadd.s32 %v2366_v10, %v1176_v47  ;;  %vm1243_vm5 = vcmp.lt.s32.totalorder %v1211_v0, 512  ;;  %v2517_v32 = vsel %vm1244_vm8, 1.0, %v2144_v38  ;;  %v2554_v0 = vsel %vm1252_vm0, 1.0, %v2144_v38 }
  0x4b   : > { %2071 = vmatprep.mubr.msk.f32.mxu0 %vm402_vm2, %v393_v63  ;;  %v1208_v63 = vadd.s32 %v2366_v10, %v1175_v48  ;;  %vm1242_vm6 = vcmp.lt.s32.totalorder %v1210_v1, 512  ;;  %v2495_v27 = vsel %vm1243_vm5, 1.0, %v2144_v38  ;;  %v2541_v48 = vsel %vm1251_vm13, 1.0, %v2144_v38 }
  0x4c   : > { %2125 = vmatmul.mubr.msk.f32.gmra.mxu1 %vm768_vm1, %v759_v4  ;;  %vm1239_vm1 = vcmp.lt.s32.totalorder %v1207_v37, 512  ;;  %v1184_v4 = vadd.s32 200, %v2361_v7  ;;  %vm1241_vm3 = vcmp.lt.s32.totalorder %v1209_v62, 512  ;;  %v2498_v28 = vsel %vm1242_vm6, 1.0, %v2144_v38 }
  0x4d   : > { %v2452_v60 = vsel %vm1239_vm1, 1.0, %v2144_v38  ;;  %vm1240_vm4 = vcmp.lt.s32.totalorder %v1208_v63, 512  ;;  %v2480_v22 = vsel %vm1241_vm3, 1.0, %v2144_v38  ;;  %vm1255_vm1 = vcmp.lt.s32.totalorder %v1223_v29, 512 }
  0x4e   : > { %2072 = vmatmul.mubr.msk.f32.gmra.mxu0 %vm402_vm2, %v394_v2  ;;  %v1182_v2 = vadd.s32 184, %v2361_v7  ;;  %v1217_v18 = vadd.s32 %v2366_v10, %v1184_v4  ;;  %v2491_v26 = vsel %vm1240_vm4, 1.0, %v2144_v38  ;;  %v2550_v63 = vsel %vm1253_vm15, 1.0, %v2144_v38 }
  0x4f   : > { %2074 = vmatprep.mubr.msk.f32.mxu0 %vm402_vm2, %v395_v3  ;;  %v1181_v3 = vadd.s32 176, %v2361_v7  ;;  %v2537_v7 = vsel %vm1248_vm12, 1.0, %v2144_v38  ;;  %v2563_v4 = vadd.s32 %v2366_v10, %v1189_v34  ;;  %vm1490_vm3 = vcmask 1040384  }
  0x50   : > { %v1215_v16 = vadd.s32 %v2366_v10, %v1182_v2  ;;  %vm1249_vm11 = vcmp.lt.s32.totalorder %v1217_v18, 512  ;;  %vm1492_vm4 = vcmask 1041408  }
  0x51   : > { %v1214_v17 = vadd.s32 %v2366_v10, %v1181_v3  ;;  %v2560_v3 = vsel %vm1255_vm1, 1.0, %v2144_v38 }
  0x52   : > { %2075 = vmatmul.mubr.msk.f32.gmra.mxu0 %vm402_vm2, %v396_v5  ;;  %vm1238_vm2 = vcmp.lt.s32.totalorder %v1206_v46, 512  ;;  %v1213_v5 = vadd.s32 %v2366_v10, %v1180_v57  ;;  %vm1247_vm9 = vcmp.lt.s32.totalorder %v1215_v16, 512  ;;  %v2531_v46 = vsel %vm1249_vm11, 1.0, %v2144_v38 }
  0x53   : > { %v2467_v11 = vsel %vm1238_vm2, 1.0, %v2144_v38  ;;  %vm1246_vm10 = vcmp.lt.s32.totalorder %v1214_v17, 512  ;;  %v2523_v37 = vsel %vm1247_vm9, 1.0, %v2144_v38  ;;  %vm1254_vm2 = vcmp.lt.s32.totalorder %v2563_v4, 512 }
  0x54   : > { %vm1245_vm7 = vcmp.lt.s32.totalorder %v1213_v5, 512  ;;  %v2527_v42 = vsel %vm1246_vm10, 1.0, %v2144_v38 }
  0x55   : > { %v2502_v30 = vsel %vm1245_vm7, 1.0, %v2144_v38 }
  0xd0   : > { %v2081_v31 = vpop.f32.mrf.mxu1 }
  0xd1   : > { %v940_v33 = vadd.f32 %v2081_v31, %v2487_v25 }
  0xd2   : > { %v934_v36 = vpop.f32.mrf.mxu1 }
  0xd3   : > { %1126 = vst [vmem:[%s2508_s12 + $0x8] sm:$0xff] %v940_v33  ;;  %v1565_v47 = vmul.f32 %v940_v33, %v940_v33  ;;  %v935_v57 = vadd.f32 %v2487_v25, %v934_v36  ;;  %v1496_v14 = vmul.f32 %v2398_v39, %v940_v33 }
  0xd4   : > { %v2084_v62 = vpop.f32.mrf.mxu1 }
  0xd5   : > { %1125 = vst [vmem:[%s2508_s12] sm:$0xff] %v935_v57  ;;  %v1495_v6 = vmul.f32 %v2402_v40, %v935_v57  ;;  %v1564_v8 = vmul.f32 %v935_v57, %v935_v57  ;;  %v950_v9 = vadd.f32 %v2084_v62, %v2487_v25  ;;  %v1597_v15 = vmul.f32 %v2398_v39, %v1565_v47 }
  0xd6   : > { %v2031_v35 = vpop.f32.mrf.mxu0  ;;  %v944_v13 = vpop.f32.mrf.mxu1 }
  0xd7   : > { %1094 = vst [vmem:[%s2514_s15 + $0x8] sm:$0xff] %v2031_v35  ;;  %v1390_v53 = vmul.f32 %v2031_v35, %v2031_v35  ;;  %v1321_v5 = vmul.f32 %v2031_v35, %v2398_v39  ;;  %v1596_v18 = vmul.f32 %v2402_v40, %v1564_v8  ;;  %1128 = vst [vmem:[%s2508_s12 + $0x18] sm:$0xff] %v950_v9 }
  0xd8   : > { %v569_v61 = vpop.f32.mrf.mxu0  ;;  %v1567_v20 = vmul.f32 %v950_v9, %v950_v9  ;;  %v2087_v23 = vpop.f32.mrf.mxu1  ;;  %v1527_v24 = vadd.f32 %v1496_v14, %v1495_v6  ;;  %v945_v31 = vadd.f32 %v2487_v25, %v944_v13 }
  0xd9   : > { %1093 = vst [vmem:[%s2514_s15] sm:$0xff] %v569_v61  ;;  %v1320_v1 = vmul.f32 %v2402_v40, %v569_v61  ;;  %v1389_v2 = vmul.f32 %v569_v61, %v569_v61  ;;  %v1422_v17 = vmul.f32 %v2398_v39, %v1390_v53  ;;  %v1498_v39 = vmul.f32 %v2406_v41, %v950_v9 }
  0xda   : > { %v2034_v12 = vpop.f32.mrf.mxu0  ;;  %v960_v35 = vadd.f32 %v2087_v23, %v2487_v25  ;;  %v954_v47 = vpop.f32.mrf.mxu1  ;;  %1127 = vst [vmem:[%s2508_s12 + $0x10] sm:$0xff] %v945_v31  ;;  %v1497_v57 = vmul.f32 %v2411_v43, %v945_v31  ;;  %v1566_v61 = vmul.f32 %v945_v31, %v945_v31 }
  0xdb   : > { %v1421_v16 = vmul.f32 %v2402_v40, %v1389_v2  ;;  %1096 = vst [vmem:[%s2514_s15 + $0x18] sm:$0xff] %v2034_v12  ;;  %v1392_v10 = vmul.f32 %v2034_v12, %v2034_v12  ;;  %v1352_v19 = vadd.f32 %v1321_v5, %v1320_v1  ;;  %v1323_v29 = vmul.f32 %v2034_v12, %v2406_v41 }
  0xdc   : > { %v579_v21 = vpop.f32.mrf.mxu0  ;;  %v1628_v1 = vadd.f32 %v1597_v15, %v1596_v18  ;;  %v1599_v2 = vmul.f32 %v2406_v41, %v1567_v20  ;;  %1130 = vst [vmem:[%s2508_s12 + $0x28] sm:$0xff] %v960_v35  ;;  %v2090_v9 = vpop.f32.mrf.mxu1  ;;  %v1528_v12 = vadd.f32 %v1527_v24, %v1497_v57  ;;  %v1598_v13 = vmul.f32 %v2411_v43, %v1566_v61 }
  0xdd   : > { %1095 = vst [vmem:[%s2514_s15 + $0x10] sm:$0xff] %v579_v21  ;;  %v1322_v33 = vmul.f32 %v2411_v43, %v579_v21  ;;  %v1453_v34 = vadd.f32 %v1422_v17, %v1421_v16  ;;  %v1391_v40 = vmul.f32 %v579_v21, %v579_v21  ;;  %v1424_v53 = vmul.f32 %v2406_v41, %v1392_v10 }
  0xde   : > { %v2037_v36 = vpop.f32.mrf.mxu0  ;;  %v955_v14 = vadd.f32 %v2487_v25, %v954_v47  ;;  %v1569_v10 = vmul.f32 %v960_v35, %v960_v35  ;;  %v1629_v20 = vadd.f32 %v1628_v1, %v1598_v13  ;;  %v1529_v23 = vadd.f32 %v1528_v12, %v1498_v39 }
  0xdf   : > { %v1353_v62 = vadd.f32 %v1352_v19, %v1322_v33  ;;  %1098 = vst [vmem:[%s2514_s15 + $0x28] sm:$0xff] %v2037_v36  ;;  %v1423_v5 = vmul.f32 %v2411_v43, %v1391_v40  ;;  %v1325_v6 = vmul.f32 %v2037_v36, %v2415_v44  ;;  %v1394_v41 = vmul.f32 %v2037_v36, %v2037_v36  ;;  %v964_v19 = vpop.f32.mrf.mxu1 }
  0xe0   : > { %v589_v8 = vpop.f32.mrf.mxu0  ;;  %1129 = vst [vmem:[%s2508_s12 + $0x20] sm:$0xff] %v955_v14  ;;  %v1499_v21 = vmul.f32 %v2419_v45, %v955_v14  ;;  %v1568_v24 = vmul.f32 %v955_v14, %v955_v14  ;;  %v970_v40 = vadd.f32 %v2090_v9, %v2487_v25  ;;  %v1630_v61 = vadd.f32 %v1629_v20, %v1599_v2 }
  0xe1   : > { %1097 = vst [vmem:[%s2514_s15 + $0x20] sm:$0xff] %v589_v8  ;;  %v1324_v16 = vmul.f32 %v2419_v45, %v589_v8  ;;  %v1454_v15 = vadd.f32 %v1453_v34, %v1423_v5  ;;  %v1354_v17 = vadd.f32 %v1353_v62, %v1323_v29  ;;  %v1393_v31 = vmul.f32 %v589_v8, %v589_v8  ;;  %v2093_v47 = vpop.f32.mrf.mxu1 }
  0xe2   : > { %v2040_v18 = vpop.f32.mrf.mxu0  ;;  %v1500_v29 = vmul.f32 %v2415_v44, %v960_v35  ;;  %v1530_v36 = vadd.f32 %v1529_v23, %v1499_v21  ;;  %v1600_v57 = vmul.f32 %v2419_v45, %v1568_v24  ;;  %v1601_v39 = vmul.f32 %v2415_v44, %v1569_v10  ;;  %1132 = vst [vmem:[%s2508_s12 + $0x38] sm:$0xff] %v970_v40 }
  0xe3   : > { %1100 = vst [vmem:[%s2514_s15 + $0x38] sm:$0xff] %v2040_v18  ;;  %v1355_v43 = vadd.f32 %v1354_v17, %v1324_v16  ;;  %v1455_v33 = vadd.f32 %v1454_v15, %v1424_v53  ;;  %v1426_v62 = vmul.f32 %v2415_v44, %v1394_v41  ;;  %v1425_v1 = vmul.f32 %v2419_v45, %v1393_v31  ;;  %v974_v8 = vpop.f32.mrf.mxu1 }
  0xe4   : > { %v599_v34 = vpop.f32.mrf.mxu0  ;;  %v1571_v53 = vmul.f32 %v970_v40, %v970_v40  ;;  %v1631_v9 = vadd.f32 %v1630_v61, %v1600_v57  ;;  %v965_v35 = vadd.f32 %v2487_v25, %v964_v19  ;;  %v1531_v12 = vadd.f32 %v1530_v36, %v1500_v29 }
  0xe5   : > { %1099 = vst [vmem:[%s2514_s15 + $0x30] sm:$0xff] %v599_v34  ;;  %v1326_v13 = vmul.f32 %v2429_v51, %v599_v34  ;;  %v1456_v2 = vadd.f32 %v1455_v33, %v1425_v1  ;;  %v1327_v14 = vmul.f32 %v2040_v18, %v2426_v50  ;;  %v1396_v16 = vmul.f32 %v2040_v18, %v2040_v18  ;;  %v2096_v45 = vpop.f32.mrf.mxu1 }
  0xe6   : > { %v2043_v5 = vpop.f32.mrf.mxu0  ;;  %v1356_v44 = vadd.f32 %v1355_v43, %v1325_v6  ;;  %1131 = vst [vmem:[%s2508_s12 + $0x30] sm:$0xff] %v965_v35  ;;  %v1501_v10 = vmul.f32 %v2429_v51, %v965_v35  ;;  %v1570_v41 = vmul.f32 %v965_v35, %v965_v35  ;;  %v1632_v17 = vadd.f32 %v1631_v9, %v1601_v39 }
  0xe7   : > { %1102 = vst [vmem:[%s2514_s15 + $0x48] sm:$0xff] %v2043_v5  ;;  %v1395_v20 = vmul.f32 %v599_v34, %v599_v34  ;;  %v1502_v19 = vmul.f32 %v2426_v50, %v970_v40  ;;  %v1457_v23 = vadd.f32 %v1456_v2, %v1426_v62  ;;  %v980_v24 = vadd.f32 %v2093_v47, %v2487_v25  ;;  %v984_v18 = vpop.f32.mrf.mxu1 }
  0xe8   : > { %v609_v15 = vpop.f32.mrf.mxu0  ;;  %v1357_v21 = vadd.f32 %v1356_v44, %v1326_v13  ;;  %v1603_v6 = vmul.f32 %v2426_v50, %v1571_v53  ;;  %v1532_v43 = vadd.f32 %v1531_v12, %v1501_v10  ;;  %v1602_v33 = vmul.f32 %v2429_v51, %v1570_v41 }
  0xe9   : > { %1101 = vst [vmem:[%s2514_s15 + $0x40] sm:$0xff] %v609_v15  ;;  %v1427_v29 = vmul.f32 %v2429_v51, %v1395_v20  ;;  %v1428_v34 = vmul.f32 %v2426_v50, %v1396_v16  ;;  %1134 = vst [vmem:[%s2508_s12 + $0x48] sm:$0xff] %v980_v24  ;;  %v1398_v40 = vmul.f32 %v2043_v5, %v2043_v5  ;;  %v2099_v61 = vpop.f32.mrf.mxu1 }
  0xea   : > { %v2046_v31 = vpop.f32.mrf.mxu0  ;;  %v975_v36 = vadd.f32 %v2487_v25, %v974_v8  ;;  %v1328_v47 = vmul.f32 %v2436_v54, %v609_v15  ;;  %v1633_v39 = vadd.f32 %v1632_v17, %v1602_v33  ;;  %v1573_v1 = vmul.f32 %v980_v24, %v980_v24 }
  0xeb   : > { %1104 = vst [vmem:[%s2514_s15 + $0x58] sm:$0xff] %v2046_v31  ;;  %v1458_v62 = vadd.f32 %v1457_v23, %v1427_v29  ;;  %v1533_v53 = vadd.f32 %v1532_v43, %v1502_v19  ;;  %v1329_v9 = vmul.f32 %v2043_v5, %v2432_v52  ;;  %v1358_v35 = vadd.f32 %v1357_v21, %v1327_v14  ;;  %v994_v8 = vpop.f32.mrf.mxu1 }
  0xec   : > { %v619_v57 = vpop.f32.mrf.mxu0  ;;  %1133 = vst [vmem:[%s2508_s12 + $0x40] sm:$0xff] %v975_v36  ;;  %v1503_v51 = vmul.f32 %v2436_v54, %v975_v36  ;;  %v1572_v50 = vmul.f32 %v975_v36, %v975_v36  ;;  %v1634_v13 = vadd.f32 %v1633_v39, %v1603_v6  ;;  %v1397_v2 = vmul.f32 %v609_v15, %v609_v15 }
  0xed   : > { %1103 = vst [vmem:[%s2514_s15 + $0x50] sm:$0xff] %v619_v57  ;;  %v1459_v16 = vadd.f32 %v1458_v62, %v1428_v34  ;;  %v990_v44 = vadd.f32 %v2096_v45, %v2487_v25  ;;  %v1504_v10 = vmul.f32 %v2432_v52, %v980_v24  ;;  %v1359_v17 = vadd.f32 %v1358_v35, %v1328_v47  ;;  %v2102_v19 = vpop.f32.mrf.mxu1 }
  0xee   : > { %v2049_v12 = vpop.f32.mrf.mxu0  ;;  %v1534_v41 = vadd.f32 %v1533_v53, %v1503_v51  ;;  %v1604_v5 = vmul.f32 %v2436_v54, %v1572_v50  ;;  %v1605_v14 = vmul.f32 %v2432_v52, %v1573_v1  ;;  %v1430_v21 = vmul.f32 %v2432_v52, %v1398_v40 }
  0xef   : > { %1106 = vst [vmem:[%s2514_s15 + $0x68] sm:$0xff] %v2049_v12  ;;  %v1429_v15 = vmul.f32 %v2436_v54, %v1397_v2  ;;  %1136 = vst [vmem:[%s2508_s12 + $0x58] sm:$0xff] %v990_v44  ;;  %v1575_v23 = vmul.f32 %v990_v44, %v990_v44  ;;  %v985_v24 = vadd.f32 %v2487_v25, %v984_v18  ;;  %v1004_v29 = vpop.f32.mrf.mxu1 }
  0xf0   : > { %v629_v20 = vpop.f32.mrf.mxu0  ;;  %v1635_v45 = vadd.f32 %v1634_v13, %v1604_v5  ;;  %v1535_v6 = vadd.f32 %v1534_v41, %v1504_v10  ;;  %v1330_v43 = vmul.f32 %v2442_v56, %v619_v57  ;;  %v1331_v36 = vmul.f32 %v2046_v31, %v2439_v55 }
  0xf1   : > { %1105 = vst [vmem:[%s2514_s15 + $0x60] sm:$0xff] %v629_v20  ;;  %v1460_v34 = vadd.f32 %v1459_v16, %v1429_v15  ;;  %v1400_v52 = vmul.f32 %v2046_v31, %v2046_v31  ;;  %v1360_v40 = vadd.f32 %v1359_v17, %v1329_v9  ;;  %1135 = vst [vmem:[%s2508_s12 + $0x50] sm:$0xff] %v985_v24  ;;  %v2646_v1 = vpop.f32.mrf.mxu1 }
  0xf2   : > { %v2637_v33 = vpop.f32.mrf.mxu0  ;;  %v1505_v54 = vmul.f32 %v2442_v56, %v985_v24  ;;  %v1574_v47 = vmul.f32 %v985_v24, %v985_v24  ;;  %v1636_v39 = vadd.f32 %v1635_v45, %v1605_v14  ;;  %v1399_v18 = vmul.f32 %v619_v57, %v619_v57 }
  0xf3   : > { %1108 = vst [vmem:[%s2514_s15 + $0x78] sm:$0xff] %v2637_v33  ;;  %v1506_v53 = vmul.f32 %v2439_v55, %v990_v44  ;;  %v1361_v51 = vadd.f32 %v1360_v40, %v1330_v43  ;;  %v1461_v50 = vadd.f32 %v1460_v34, %v1430_v21  ;;  %v1000_v31 = vadd.f32 %v2099_v61, %v2487_v25  ;;  %v2657_v16 = vpop.f32.mrf.mxu1 }
  0xf4   : > { %v2644_v62 = vpop.f32.mrf.mxu0  ;;  %v1607_v9 = vmul.f32 %v2439_v55, %v1575_v23  ;;  %v1536_v35 = vadd.f32 %v1535_v6, %v1505_v54  ;;  %v1606_v13 = vmul.f32 %v2442_v56, %v1574_v47  ;;  %v1431_v57 = vmul.f32 %v2442_v56, %v1399_v18 }
  0xf5   : > { %1107 = vst [vmem:[%s2514_s15 + $0x70] sm:$0xff] %v2644_v62  ;;  %v1432_v44 = vmul.f32 %v2439_v55, %v1400_v52  ;;  %1138 = vst [vmem:[%s2508_s12 + $0x68] sm:$0xff] %v1000_v31  ;;  %v1402_v10 = vmul.f32 %v2049_v12, %v2049_v12  ;;  %v995_v61 = vadd.f32 %v2487_v25, %v994_v8  ;;  %v2667_v15 = vpop.f32.mrf.mxu1 }
  0xf6   : > { %v2655_v2 = vpop.f32.mrf.mxu0  ;;  %v1332_v41 = vmul.f32 %v2449_v59, %v629_v20  ;;  %v1637_v5 = vadd.f32 %v1636_v39, %v1606_v13  ;;  %v1462_v17 = vadd.f32 %v1461_v50, %v1431_v57  ;;  %v1577_v14 = vmul.f32 %v1000_v31, %v1000_v31 }
  0xf7   : > { %1110 = vst [vmem:[%s2514_s15 + $0x88] sm:$0xff] %v2655_v2  ;;  %v1537_v56 = vadd.f32 %v1536_v35, %v1506_v53  ;;  %v1333_v23 = vmul.f32 %v2049_v12, %v2446_v58  ;;  %1137 = vst [vmem:[%s2508_s12 + $0x60] sm:$0xff] %v995_v61  ;;  %v1507_v55 = vmul.f32 %v2449_v59, %v995_v61  ;;  %v2677_v40 = vpop.f32.mrf.mxu1 }
  0xf8   : > { %v2665_v21 = vpop.f32.mrf.mxu0  ;;  %v1576_v45 = vmul.f32 %v995_v61, %v995_v61  ;;  %v1362_v8 = vadd.f32 %v1361_v51, %v1331_v36  ;;  %v1638_v24 = vadd.f32 %v1637_v5, %v1607_v9  ;;  %v1401_v6 = vmul.f32 %v629_v20, %v629_v20 }
  0xf9   : > { %1109 = vst [vmem:[%s2514_s15 + $0x80] sm:$0xff] %v2665_v21  ;;  %v1463_v43 = vadd.f32 %v1462_v17, %v1432_v44  ;;  %v1010_v34 = vadd.f32 %v2102_v19, %v2487_v25  ;;  %v1508_v12 = vmul.f32 %v2446_v58, %v1000_v31  ;;  %v1538_v54 = vadd.f32 %v1537_v56, %v1507_v55  ;;  %v2689_v51 = vpop.f32.mrf.mxu1 }
  0xfa   : > { %v2675_v52 = vpop.f32.mrf.mxu0  ;;  %v1608_v47 = vmul.f32 %v2449_v59, %v1576_v45  ;;  %v1363_v39 = vadd.f32 %v1362_v8, %v1332_v41  ;;  %v1609_v36 = vmul.f32 %v2446_v58, %v1577_v14  ;;  %v1434_v20 = vmul.f32 %v2446_v58, %v1402_v10 }
  0xfb   : > { %1112 = vst [vmem:[%s2514_s15 + $0x98] sm:$0xff] %v2675_v52  ;;  %v1433_v18 = vmul.f32 %v2449_v59, %v1401_v6  ;;  %1140 = vst [vmem:[%s2508_s12 + $0x78] sm:$0xff] %v1010_v34  ;;  %v1579_v19 = vmul.f32 %v1010_v34, %v1010_v34  ;;  %v1005_v31 = vadd.f32 %v2487_v25, %v1004_v29  ;;  %v2702_v10 = vpop.f32.mrf.mxu1 }
  0xfc   : > { %v2687_v53 = vpop.f32.mrf.mxu0  ;;  %v1639_v50 = vadd.f32 %v1638_v24, %v1608_v47  ;;  %v1539_v9 = vadd.f32 %v1538_v54, %v1508_v12  ;;  %v1334_v35 = vmul.f32 %v2467_v11, %v2644_v62  ;;  %v1335_v59 = vmul.f32 %v2637_v33, %v2452_v60 }
  0xfd   : > { %1111 = vst [vmem:[%s2514_s15 + $0x90] sm:$0xff] %v2687_v53  ;;  %v1464_v58 = vadd.f32 %v1463_v43, %v1433_v18  ;;  %v1404_v13 = vmul.f32 %v2637_v33, %v2637_v33  ;;  %v1364_v57 = vadd.f32 %v1363_v39, %v1333_v23  ;;  %1139 = vst [vmem:[%s2508_s12 + $0x70] sm:$0xff] %v1005_v31 }
  0xfe   : > { %v2700_v44 = vpop.f32.mrf.mxu0  ;;  %v1509_v29 = vmul.f32 %v2467_v11, %v1005_v31  ;;  %v1578_v61 = vmul.f32 %v1005_v31, %v1005_v31  ;;  %v1640_v41 = vadd.f32 %v1639_v50, %v1609_v36  ;;  %v1403_v5 = vmul.f32 %v2644_v62, %v2644_v62 }
  0xff   : > { %1114 = vst [vmem:[%s2514_s15 + $0xa8] sm:$0xff] %v2700_v44  ;;  %v1510_v17 = vmul.f32 %v2452_v60, %v1010_v34  ;;  %v1365_v33 = vadd.f32 %v1364_v57, %v1334_v35  ;;  %v1465_v14 = vadd.f32 %v1464_v58, %v1434_v20  ;;  %v1020_v56 = vadd.f32 %v2646_v1, %v2487_v25  ;;  %v2728_v34 = vpop.f32.mrf.mxu1 }
 0x100   : > { %v2713_v23 = vpop.f32.mrf.mxu0  ;;  %v1611_v55 = vmul.f32 %v2452_v60, %v1579_v19  ;;  %v1540_v45 = vadd.f32 %v1539_v9, %v1509_v29  ;;  %v1610_v8 = vmul.f32 %v2467_v11, %v1578_v61  ;;  %v1435_v62 = vmul.f32 %v2467_v11, %v1403_v5 }
 0x101   : > { %1113 = vst [vmem:[%s2514_s15 + $0xa0] sm:$0xff] %v2713_v23  ;;  %v1436_v24 = vmul.f32 %v2452_v60, %v1404_v13  ;;  %1142 = vst [vmem:[%s2508_s12 + $0x88] sm:$0xff] %v1020_v56  ;;  %v1406_v6 = vmul.f32 %v2655_v2, %v2655_v2  ;;  %v1015_v1 = vadd.f32 %v2487_v25, %v2657_v16  ;;  %v2748_v13 = vpop.f32.mrf.mxu1 }
 0x102   : > { %v1336_v43 = vmul.f32 %v2491_v26, %v2665_v21  ;;  %v2730_v12 = vpop.f32.mrf.mxu0  ;;  %v1641_v11 = vadd.f32 %v1640_v41, %v1610_v8  ;;  %v1466_v54 = vadd.f32 %v1465_v14, %v1435_v62  ;;  %v1581_v47 = vmul.f32 %v1020_v56, %v1020_v56 }
 0x103   : > { %v1541_v39 = vadd.f32 %v1540_v45, %v1510_v17  ;;  %1116 = vst [vmem:[%s2514_s15 + $0xb8] sm:$0xff] %v2730_v12  ;;  %v1337_v60 = vmul.f32 %v2655_v2, %v2480_v22  ;;  %1141 = vst [vmem:[%s2508_s12 + $0x80] sm:$0xff] %v1015_v1  ;;  %v1511_v16 = vmul.f32 %v2491_v26, %v1015_v1 }
 0x104   : > { %v1580_v36 = vmul.f32 %v1015_v1, %v1015_v1  ;;  %v1366_v20 = vadd.f32 %v1365_v33, %v1335_v59  ;;  %v2738_v18 = vpop.f32.mrf.mxu0  ;;  %v1642_v19 = vadd.f32 %v1641_v11, %v1611_v55  ;;  %v1405_v50 = vmul.f32 %v2665_v21, %v2665_v21 }
 0x105   : > { %v1467_v31 = vadd.f32 %v1466_v54, %v1436_v24  ;;  %v1030_v9 = vadd.f32 %v2667_v15, %v2487_v25  ;;  %1115 = vst [vmem:[%s2514_s15 + $0xb0] sm:$0xff] %v2738_v18  ;;  %v1512_v2 = vmul.f32 %v2480_v22, %v1020_v56  ;;  %v1542_v35 = vadd.f32 %v1541_v39, %v1511_v16  ;;  %v2774_v24 = vpop.f32.mrf.mxu1 }
 0x106   : > { %v1612_v58 = vmul.f32 %v2491_v26, %v1580_v36  ;;  %v1367_v59 = vadd.f32 %v1366_v20, %v1336_v43  ;;  %v2750_v57 = vpop.f32.mrf.mxu0  ;;  %v1613_v29 = vmul.f32 %v2480_v22, %v1581_v47  ;;  %v1438_v21 = vmul.f32 %v2480_v22, %v1406_v6 }
 0x107   : > { %v1437_v15 = vmul.f32 %v2491_v26, %v1405_v50  ;;  %1144 = vst [vmem:[%s2508_s12 + $0x98] sm:$0xff] %v1030_v9  ;;  %v1583_v61 = vmul.f32 %v1030_v9, %v1030_v9  ;;  %1118 = vst [vmem:[%s2514_s15 + $0xc8] sm:$0xff] %v2750_v57  ;;  %v1025_v5 = vadd.f32 %v2487_v25, %v2677_v40 }
 0x108   : > { %v1643_v41 = vadd.f32 %v1642_v19, %v1612_v58  ;;  %v1543_v17 = vadd.f32 %v1542_v35, %v1512_v2  ;;  %v1338_v33 = vmul.f32 %v2498_v28, %v2687_v53  ;;  %v2762_v14 = vpop.f32.mrf.mxu0  ;;  %v1339_v22 = vmul.f32 %v2675_v52, %v2495_v27 }
 0x109   : > { %v1468_v56 = vadd.f32 %v1467_v31, %v1437_v15  ;;  %v1408_v26 = vmul.f32 %v2675_v52, %v2675_v52  ;;  %v1368_v55 = vadd.f32 %v1367_v59, %v1337_v60  ;;  %1117 = vst [vmem:[%s2514_s15 + $0xc0] sm:$0xff] %v2762_v14  ;;  %1143 = vst [vmem:[%s2508_s12 + $0x90] sm:$0xff] %v1025_v5 }
 0x10a   : > { %v1513_v40 = vmul.f32 %v2498_v28, %v1025_v5  ;;  %v1582_v45 = vmul.f32 %v1025_v5, %v1025_v5  ;;  %v1644_v8 = vadd.f32 %v1643_v41, %v1613_v29  ;;  %v1407_v62 = vmul.f32 %v2687_v53, %v2687_v53  ;;  %v2776_v6 = vpop.f32.mrf.mxu0 }
 0x10b   : > { %v1514_v1 = vmul.f32 %v2495_v27, %v1030_v9  ;;  %v1369_v52 = vadd.f32 %v1368_v55, %v1338_v33  ;;  %v1469_v43 = vadd.f32 %v1468_v56, %v1438_v21  ;;  %v1040_v11 = vadd.f32 %v2689_v51, %v2487_v25  ;;  %1120 = vst [vmem:[%s2514_s15 + $0xd8] sm:$0xff] %v2776_v6  ;;  %v1054_v9 = vpop.f32.mrf.mxu1 }
 0x10c   : > { %v1615_v54 = vmul.f32 %v2495_v27, %v1583_v61  ;;  %v1544_v47 = vadd.f32 %v1543_v17, %v1513_v40  ;;  %v1614_v39 = vmul.f32 %v2498_v28, %v1582_v45  ;;  %v1439_v53 = vmul.f32 %v2498_v28, %v1407_v62  ;;  %v2786_v60 = vpop.f32.mrf.mxu0 }
 0x10d   : > { %v1440_v16 = vmul.f32 %v2495_v27, %v1408_v26  ;;  %1146 = vst [vmem:[%s2508_s12 + $0xa8] sm:$0xff] %v1040_v11  ;;  %v1410_v36 = vmul.f32 %v2700_v44, %v2700_v44  ;;  %v1035_v51 = vadd.f32 %v2487_v25, %v2702_v10  ;;  %v1340_v20 = vmul.f32 %v2517_v32, %v2713_v23 }
 0x10e   : > { %1119 = vst [vmem:[%s2514_s15 + $0xd0] sm:$0xff] %v2786_v60  ;;  %v1645_v19 = vadd.f32 %v1644_v8, %v1614_v39  ;;  %v1470_v50 = vadd.f32 %v1469_v43, %v1439_v53  ;;  %v1585_v28 = vmul.f32 %v1040_v11, %v1040_v11  ;;  %v1545_v31 = vadd.f32 %v1544_v47, %v1514_v1  ;;  %v2798_v2 = vpop.f32.mrf.mxu0 }
 0x10f   : > { %v1341_v27 = vmul.f32 %v2700_v44, %v2502_v30  ;;  %1145 = vst [vmem:[%s2508_s12 + $0xa0] sm:$0xff] %v1035_v51  ;;  %v1515_v35 = vmul.f32 %v2517_v32, %v1035_v51  ;;  %v1584_v10 = vmul.f32 %v1035_v51, %v1035_v51  ;;  %v1370_v58 = vadd.f32 %v1369_v52, %v1339_v22  ;;  %v2120_v22 = vpop.f32.mrf.mxu1 }
 0x110   : > { %1122 = vst [vmem:[%s2514_s15 + $0xe8] sm:$0xff] %v2798_v2  ;;  %v1646_v59 = vadd.f32 %v1645_v19, %v1615_v54  ;;  %v1409_v29 = vmul.f32 %v2713_v23, %v2713_v23  ;;  %v1471_v21 = vadd.f32 %v1470_v50, %v1440_v16  ;;  %v1050_v15 = vadd.f32 %v2728_v34, %v2487_v25  ;;  %v2810_v61 = vpop.f32.mrf.mxu0 }
 0x111   : > { %v1516_v44 = vmul.f32 %v2502_v30, %v1040_v11  ;;  %v1546_v41 = vadd.f32 %v1545_v31, %v1515_v35  ;;  %v1616_v5 = vmul.f32 %v2517_v32, %v1584_v10  ;;  %v1371_v17 = vadd.f32 %v1370_v58, %v1340_v20  ;;  %1121 = vst [vmem:[%s2514_s15 + $0xe0] sm:$0xff] %v2810_v61  ;;  %v1064_v16 = vpop.f32.mrf.mxu1 }
 0x112   : > { %v1617_v33 = vmul.f32 %v2502_v30, %v1585_v28  ;;  %v1442_v56 = vmul.f32 %v2502_v30, %v1410_v36  ;;  %v1441_v23 = vmul.f32 %v2517_v32, %v1409_v29  ;;  %1148 = vst [vmem:[%s2508_s12 + $0xb8] sm:$0xff] %v1050_v15  ;;  %v1587_v34 = vmul.f32 %v1050_v15, %v1050_v15  ;;  %v2820_v26 = vpop.f32.mrf.mxu0 }
 0x113   : > { %v1647_v55 = vadd.f32 %v1646_v59, %v1616_v5  ;;  %v1045_v40 = vadd.f32 %v2487_v25, %v2748_v13  ;;  %v1547_v45 = vadd.f32 %v1546_v41, %v1516_v44  ;;  %v1342_v8 = vmul.f32 %v2527_v42, %v2738_v18  ;;  %1124 = vst [vmem:[%s2514_s15 + $0xf8] sm:$0xff] %v2820_v26  ;;  %v2123_v29 = vpop.f32.mrf.mxu1 }
 0x114   : > { %v1472_v30 = vadd.f32 %v1471_v21, %v1441_v23  ;;  %v1343_v32 = vmul.f32 %v2730_v12, %v2523_v37  ;;  %v1412_v62 = vmul.f32 %v2730_v12, %v2730_v12  ;;  %v1372_v1 = vadd.f32 %v1371_v17, %v1341_v27  ;;  %v2832_v52 = vpop.f32.mrf.mxu0 }
 0x115   : > { %1147 = vst [vmem:[%s2508_s12 + $0xb0] sm:$0xff] %v1045_v40  ;;  %v1517_v13 = vmul.f32 %v2527_v42, %v1045_v40  ;;  %v1586_v43 = vmul.f32 %v1045_v40, %v1045_v40  ;;  %v1648_v11 = vadd.f32 %v1647_v55, %v1617_v33  ;;  %v1411_v54 = vmul.f32 %v2738_v18, %v2738_v18 }
 0x116   : > { %1123 = vst [vmem:[%s2514_s15 + $0xf0] sm:$0xff] %v2832_v52  ;;  %v1518_v47 = vmul.f32 %v2523_v37, %v1050_v15  ;;  %v1373_v39 = vadd.f32 %v1372_v1, %v1342_v8  ;;  %v1473_v53 = vadd.f32 %v1472_v30, %v1442_v56  ;;  %v1060_v12 = vadd.f32 %v2774_v24, %v2487_v25 }
 0x117   : > { %v1619_v36 = vmul.f32 %v2523_v37, %v1587_v34  ;;  %v1548_v51 = vadd.f32 %v1547_v45, %v1517_v13  ;;  %v1618_v20 = vmul.f32 %v2527_v42, %v1586_v43  ;;  %v1443_v19 = vmul.f32 %v2527_v42, %v1411_v54  ;;  %v1074_v45 = vpop.f32.mrf.mxu1 }
 0x118   : > { %v1444_v18 = vmul.f32 %v2523_v37, %v1412_v62  ;;  %1150 = vst [vmem:[%s2508_s12 + $0xc8] sm:$0xff] %v1060_v12  ;;  %v1414_v50 = vmul.f32 %v2750_v57, %v2750_v57  ;;  %v1055_v28 = vadd.f32 %v2487_v25, %v1054_v9  ;;  %v1344_v24 = vmul.f32 %v2537_v7, %v2762_v14 }
 0x119   : > { %v1649_v31 = vadd.f32 %v1648_v11, %v1618_v20  ;;  %v1474_v27 = vadd.f32 %v1473_v53, %v1443_v19  ;;  %v1589_v35 = vmul.f32 %v1060_v12, %v1060_v12  ;;  %v1549_v10 = vadd.f32 %v1548_v51, %v1518_v47 }
 0x11a   : > { %v1345_v58 = vmul.f32 %v2750_v57, %v2531_v46  ;;  %1149 = vst [vmem:[%s2508_s12 + $0xc0] sm:$0xff] %v1055_v28  ;;  %v1519_v42 = vmul.f32 %v2537_v7, %v1055_v28  ;;  %v1588_v37 = vmul.f32 %v1055_v28, %v1055_v28  ;;  %v1374_v59 = vadd.f32 %v1373_v39, %v1343_v32 }
 0x11b   : > { %v1650_v9 = vadd.f32 %v1649_v31, %v1619_v36  ;;  %v1413_v21 = vmul.f32 %v2762_v14, %v2762_v14  ;;  %v1475_v15 = vadd.f32 %v1474_v27, %v1444_v18  ;;  %v1070_v44 = vadd.f32 %v2120_v22, %v2487_v25 }
 0x11c   : > { %v1520_v41 = vmul.f32 %v2531_v46, %v1060_v12  ;;  %v1550_v5 = vadd.f32 %v1549_v10, %v1519_v42  ;;  %v1620_v57 = vmul.f32 %v2537_v7, %v1588_v37  ;;  %v1375_v17 = vadd.f32 %v1374_v59, %v1344_v24 }
 0x11d   : > { %v1621_v33 = vmul.f32 %v2531_v46, %v1589_v35  ;;  %v1446_v56 = vmul.f32 %v2531_v46, %v1414_v50  ;;  %v1445_v23 = vmul.f32 %v2537_v7, %v1413_v21  ;;  %1152 = vst [vmem:[%s2508_s12 + $0xd8] sm:$0xff] %v1070_v44  ;;  %v1591_v34 = vmul.f32 %v1070_v44, %v1070_v44 }
 0x11e   : > { %v1651_v55 = vadd.f32 %v1650_v9, %v1620_v57  ;;  %v1065_v14 = vadd.f32 %v2487_v25, %v1064_v16  ;;  %v1551_v40 = vadd.f32 %v1550_v5, %v1520_v41  ;;  %v1346_v22 = vmul.f32 %v2545_v49, %v2786_v60  ;;  %v2126_v16 = vpop.f32.mrf.mxu1 }
 0x11f   : > { %v1476_v8 = vadd.f32 %v1475_v15, %v1445_v23  ;;  %v1347_v30 = vmul.f32 %v2776_v6, %v2541_v48  ;;  %v1416_v32 = vmul.f32 %v2776_v6, %v2776_v6  ;;  %v1376_v46 = vadd.f32 %v1375_v17, %v1345_v58 }
 0x120   : > { %1151 = vst [vmem:[%s2508_s12 + $0xd0] sm:$0xff] %v1065_v14  ;;  %v1521_v7 = vmul.f32 %v2545_v49, %v1065_v14  ;;  %v1590_v62 = vmul.f32 %v1065_v14, %v1065_v14  ;;  %v1652_v1 = vadd.f32 %v1651_v55, %v1621_v33  ;;  %v1415_v13 = vmul.f32 %v2786_v60, %v2786_v60  ;;  %v1084_v42 = vpop.f32.mrf.mxu1 }
 0x121   : > { %v1522_v43 = vmul.f32 %v2541_v48, %v1070_v44  ;;  %v1377_v11 = vadd.f32 %v1376_v46, %v1346_v22  ;;  %v1477_v54 = vadd.f32 %v1476_v8, %v1446_v56  ;;  %v1080_v47 = vadd.f32 %v2123_v29, %v2487_v25 }
 0x122   : > { %v1623_v39 = vmul.f32 %v2541_v48, %v1591_v34  ;;  %v1552_v6 = vadd.f32 %v1551_v40, %v1521_v7  ;;  %v1622_v53 = vmul.f32 %v2545_v49, %v1590_v62  ;;  %v1447_v12 = vmul.f32 %v2545_v49, %v1415_v13 }
 0x123   : > { %v1448_v36 = vmul.f32 %v2541_v48, %v1416_v32  ;;  %1154 = vst [vmem:[%s2508_s12 + $0xe8] sm:$0xff] %v1080_v47  ;;  %v1418_v60 = vmul.f32 %v2798_v2, %v2798_v2  ;;  %v1075_v51 = vadd.f32 %v2487_v25, %v1074_v45  ;;  %v1348_v20 = vmul.f32 %v2554_v0, %v2810_v61 }
 0x124   : > { %v1653_v19 = vadd.f32 %v1652_v1, %v1622_v53  ;;  %v1478_v18 = vadd.f32 %v1477_v54, %v1447_v12  ;;  %v1593_v50 = vmul.f32 %v1080_v47, %v1080_v47  ;;  %v1553_v28 = vadd.f32 %v1552_v6, %v1522_v43 }
 0x125   : > { %1153 = vst [vmem:[%s2508_s12 + $0xe0] sm:$0xff] %v1075_v51  ;;  %v1523_v24 = vmul.f32 %v2554_v0, %v1075_v51  ;;  %v1592_v49 = vmul.f32 %v1075_v51, %v1075_v51  ;;  %v1378_v31 = vadd.f32 %v1377_v11, %v1347_v30  ;;  %v1945_v48 = vsel %vm1254_vm2, 1.0, %v2144_v38 }
 0x126   : > { %v1654_v27 = vadd.f32 %v1653_v19, %v1623_v39  ;;  %v1417_v35 = vmul.f32 %v2810_v61, %v2810_v61  ;;  %v1479_v10 = vadd.f32 %v1478_v18, %v1448_v36  ;;  %v1090_v58 = vadd.f32 %v2126_v16, %v2487_v25 }
 0x127   : > { %v1524_v37 = vmul.f32 %v2550_v63, %v1080_v47  ;;  %v1554_v59 = vadd.f32 %v1553_v28, %v1523_v24  ;;  %v1624_v29 = vmul.f32 %v2554_v0, %v1592_v49  ;;  %v1379_v9 = vadd.f32 %v1378_v31, %v1348_v20 }
 0x128   : > { %v1625_v21 = vmul.f32 %v2550_v63, %v1593_v50  ;;  %v1349_v38 = vmul.f32 %v2798_v2, %v2550_v63  ;;  %v1450_v4 = vmul.f32 %v2550_v63, %v1418_v60  ;;  %v1449_v61 = vmul.f32 %v2554_v0, %v1417_v35  ;;  %1156 = vst [vmem:[%s2508_s12 + $0xf8] sm:$0xff] %v1090_v58 }
 0x129   : > { %v1655_v15 = vadd.f32 %v1654_v27, %v1624_v29  ;;  %v1085_v44 = vadd.f32 %v2487_v25, %v1084_v42  ;;  %v1555_v41 = vadd.f32 %v1554_v59, %v1524_v37  ;;  %v1350_v5 = vmul.f32 %v1945_v48, %v2832_v52 }
 0x12a   : > { %v1480_v57 = vadd.f32 %v1479_v10, %v1449_v61  ;;  %v1595_v17 = vmul.f32 %v1090_v58, %v1090_v58  ;;  %v1420_v33 = vmul.f32 %v2820_v26, %v2820_v26  ;;  %v1380_v56 = vadd.f32 %v1379_v9, %v1349_v38 }
 0x12b   : > { %1155 = vst [vmem:[%s2508_s12 + $0xf0] sm:$0xff] %v1085_v44  ;;  %v1525_v23 = vmul.f32 %v1945_v48, %v1085_v44  ;;  %v1594_v2 = vmul.f32 %v1085_v44, %v1085_v44  ;;  %v1656_v34 = vadd.f32 %v1655_v15, %v1625_v21  ;;  %v1419_v63 = vmul.f32 %v2832_v52, %v2832_v52 }
 0x12c   : > { %v1351_v0 = vmul.f32 %v2820_v26, %v2560_v3  ;;  %v1381_v25 = vadd.f32 %v1380_v56, %v1350_v5  ;;  %v1481_v55 = vadd.f32 %v1480_v57, %v1450_v4  ;;  %v1526_v14 = vmul.f32 %v2560_v3, %v1090_v58 }
 0x12d   : > { %v1556_v40 = vadd.f32 %v1555_v41, %v1525_v23  ;;  %v1626_v22 = vmul.f32 %v1945_v48, %v1594_v2  ;;  %v1451_v45 = vmul.f32 %v1945_v48, %v1419_v63  ;;  %v1627_v8 = vmul.f32 %v2560_v3, %v1595_v17 }
 0x12e   : > { %v1382_v30 = vadd.f32 %v1381_v25, %v1351_v0  ;;  %v1452_v32 = vmul.f32 %v2560_v3, %v1420_v33 }
 0x12f   : > { %v1557_v46 = vadd.f32 %v1556_v40, %v1526_v14  ;;  %v1657_v7 = vadd.f32 %v1656_v34, %v1626_v22  ;;  %v1482_v62 = vadd.f32 %v1481_v55, %v1451_v45 }
 0x130   : > { %v1383_v52 = vrot.slane %v1382_v30, 4 }
 0x131   : > { %v1558_v1 = vrot.slane %v1557_v46, 4  ;;  %v1658_v26 = vadd.f32 %v1657_v7, %v1627_v8  ;;  %v1483_v13 = vadd.f32 %v1482_v62, %v1452_v32 }
 0x132   : > { %v1384_v43 = vadd.f32 %v1383_v52, %v1382_v30 }
 0x133   : > { %v1559_v11 = vadd.f32 %v1558_v1, %v1557_v46  ;;  %v1659_v54 = vrot.slane %v1658_v26, 4  ;;  %v1484_v47 = vrot.slane %v1483_v13, 4 }
 0x134   : > { %v1385_v39 = vrot.slane %v1384_v43, 2 }
 0x135   : > { %v1560_v6 = vrot.slane %v1559_v11, 2  ;;  %v1660_v53 = vadd.f32 %v1659_v54, %v1658_v26  ;;  %v1485_v12 = vadd.f32 %v1484_v47, %v1483_v13 }
 0x136   : > { %v1386_v16 = vadd.f32 %v1385_v39, %v1384_v43 }
 0x137   : > { %v1561_v36 = vadd.f32 %v1560_v6, %v1559_v11  ;;  %v1661_v3 = vrot.slane %v1660_v53, 2  ;;  %v1486_v60 = vrot.slane %v1485_v12, 2 }
 0x138   : > { %v1387_v19 = vrot.slane %v1386_v16, 1 }
 0x139   : > { %v1562_v51 = vrot.slane %v1561_v36, 1  ;;  %v1662_v20 = vadd.f32 %v1661_v3, %v1660_v53  ;;  %v1487_v18 = vadd.f32 %v1486_v60, %v1485_v12 }
 0x13a   : > { %v1388_v31 = vadd.f32 %v1387_v19, %v1386_v16 }
 0x13b   : > { %v1663_v50 = vrot.slane %v1662_v20, 1  ;;  %v1488_v28 = vrot.slane %v1487_v18, 1  ;;  %v1563_v24 = vadd.f32 %v1562_v51, %v1561_v36 }
 0x13d   : > { %v1664_v49 = vadd.f32 %v1663_v50, %v1662_v20  ;;  %v1489_v48 = vadd.f32 %v1488_v28, %v1487_v18 }
 0x13f   : > { %v1491_v27 = vsel %vm1490_vm3, %v1388_v31, %v1489_v48  ;;  %v1665_v35 = vsel %vm1490_vm3, %v1563_v24, %v1664_v49 }
 0x140   : > { %v1493_v10 = vsel %vm1492_vm4, %v1491_v27, 0.0  ;;  %v1666_v58 = vsel %vm1492_vm4, %v1665_v35, 0.0 }
 0x141   : > { %1494 = vst [vmem:[%s360_s19] sm:$0xff] %v1493_v10  ;;  %1667 = vst [vmem:[%s364_s22] sm:$0xff] %v1666_v58 }
 0x142 PF: > { %s19_s27 = sadd.s32 1, %s2142_s27  }
 0x143   : > { %p16_p5 = scmp.ge.s32.totalorder %s19_s27, 4  }
 0x145   :  { %18 = sbr.rel (!%p16_p5) target bundleno = 1 (0x1), region = 109 }

// kernel: basic_block_forward.7
= control target key start
LH: loop header
LB: loop body
LE: loop exit
PB: predicated region body
PF: predicated region fallthrough
CT: control target
= control target key end

     0   :  { %s729_s21 = smov 0   ;;  %s1004_s0 = inlined_call_operand.vmem [shape: f32[512,128], index: 0, kind: input, shape index: {}]   ;;  %s1005_s1 = inlined_call_operand.vmem [shape: f32[1,128], index: 1, kind: input, shape index: {}]   ;;  %s1006_s2 = inlined_call_operand.vmem [shape: f32[1,128], index: 2, kind: input, shape index: {}]   ;;  %s1007_s3 = inlined_call_operand.vmem [shape: f32[512,128], index: 3, kind: input, shape index: {}]   ;;  %s1008_s4 = inlined_call_operand.vmem [shape: f32[1,128], index: 4, kind: input, shape index: {}]   ;;  %s1009_s5 = inlined_call_operand.vmem [shape: f32[1,128], index: 5, kind: input, shape index: {}]   ;;  %s1010_s6 = inlined_call_operand.vmem [shape: f32[512,128], index: 6, kind: output, shape index: {}]  }
   0x1 LB: > { %s661_s22 = sadd.s32 4294967295, %s692_s21   ;;  %p665_p0 = scmp.ge.s32.totalorder %s692_s21, 1  ;;  %s692_s21 = sphi %s729_s21, %s16_s21  }
   0x2   : > { %p224_p1 = scmp.lt.s32.totalorder %s692_s21, 3 }
   0x4   : > { %p225_p2 = pnand %p665_p0, %p224_p1 }
   0x5   : > { %s666_s23 = sshll.u32 (!%p225_p2), %s661_s22, 5 }
   0x6   : > { %228 = sbr.rel (%p225_p2) target bundleno = 69 (0x45), region = 44  ;;  %p260_p3 = scmp.lt.s32.totalorder (!%p225_p2), %s666_s23, 63 }
   0xb   : > { %s1012_s23 = smov (!%p260_p3, %s666_s23), 63  ;;  %v742_v0 = vld [vmem:[%s1005_s1] ss:$0 sm:$0xff] }
   0xc   : > { %s737_s24 = sshll.u32 %s1012_s23, 3  ;;  %v747_v1 = vld [vmem:[%s1008_s4] ss:$0 sm:$0xff] }
   0xd   : > { %s753_s7 = scalar_lea.vmem %s1004_s0, %s737_s24  ;;  %s759_s10 = scalar_lea.vmem %s1007_s3, %s737_s24  ;;  %v764_v2 = vld [vmem:[%s1006_s2] ss:$0 sm:$0xff] }
   0xe   : > { %v769_v3 = vld [vmem:[%s1009_s5] ss:$0 sm:$0xff]  ;;  %v278_v6 = vld [vmem:[%s753_s7 + $0x8] sm:$0xff]  ;;  %v279_v11 = vld [vmem:[%s753_s7 + $0x10] sm:$0xff]  ;;  %s804_s17 = scalar_lea.vmem %s1010_s6, %s737_s24 }
   0xf   : > { %v277_v4 = vld [vmem:[%s753_s7] sm:$0xff]  ;;  %v317_v9 = vmul.f32 %v742_v0, %v278_v6  ;;  %v388_v10 = vld [vmem:[%s759_s10 + $0x8] sm:$0xff]  ;;  %v389_v12 = vld [vmem:[%s759_s10 + $0x10] sm:$0xff]  ;;  %v318_v14 = vmul.f32 %v742_v0, %v279_v11 }
  0x10   : > { %v387_v5 = vld [vmem:[%s759_s10] sm:$0xff]  ;;  %v316_v7 = vmul.f32 %v742_v0, %v277_v4  ;;  %v427_v13 = vmul.f32 %v747_v1, %v388_v10  ;;  %v428_v15 = vmul.f32 %v747_v1, %v389_v12  ;;  %v280_v16 = vld [vmem:[%s753_s7 + $0x18] sm:$0xff]  ;;  %v282_v24 = vld [vmem:[%s753_s7 + $0x28] sm:$0xff] }
  0x11   : > { %v426_v8 = vmul.f32 %v747_v1, %v387_v5  ;;  %v390_v17 = vld [vmem:[%s759_s10 + $0x18] sm:$0xff]  ;;  %v281_v18 = vld [vmem:[%s753_s7 + $0x20] sm:$0xff]  ;;  %v356_v21 = vadd.f32 %v764_v2, %v317_v9  ;;  %v319_v22 = vmul.f32 %v742_v0, %v280_v16  ;;  %v357_v26 = vadd.f32 %v764_v2, %v318_v14  ;;  %v392_v29 = vld [vmem:[%s759_s10 + $0x28] sm:$0xff] }
  0x12   : > { %v355_v19 = vadd.f32 %v764_v2, %v316_v7  ;;  %v391_v23 = vld [vmem:[%s759_s10 + $0x20] sm:$0xff]  ;;  %v466_v25 = vadd.f32 %v769_v3, %v427_v13  ;;  %v467_v27 = vadd.f32 %v769_v3, %v428_v15  ;;  %v429_v28 = vmul.f32 %v747_v1, %v390_v17  ;;  %v283_v38 = vld [vmem:[%s753_s7 + $0x30] sm:$0xff]  ;;  %v284_v44 = vld [vmem:[%s753_s7 + $0x38] sm:$0xff] }
  0x13   : > { %v465_v20 = vadd.f32 %v769_v3, %v426_v8  ;;  %v358_v31 = vadd.f32 %v764_v2, %v319_v22  ;;  %v320_v32 = vmul.f32 %v742_v0, %v281_v18  ;;  %v430_v33 = vmul.f32 %v747_v1, %v391_v23  ;;  %v393_v39 = vld [vmem:[%s759_s10 + $0x30] sm:$0xff]  ;;  %v394_v45 = vld [vmem:[%s759_s10 + $0x38] sm:$0xff]  ;;  %v285_v46 = vld [vmem:[%s753_s7 + $0x40] sm:$0xff] }
  0x14   : > { %v498_v34 = vadd.f32 %v466_v25, %v356_v21  ;;  %v499_v35 = vadd.f32 %v467_v27, %v357_v26  ;;  %v468_v36 = vadd.f32 %v769_v3, %v429_v28  ;;  %v321_v37 = vmul.f32 %v742_v0, %v282_v24  ;;  %v395_v55 = vld [vmem:[%s759_s10 + $0x40] sm:$0xff]  ;;  %v286_v60 = vld [vmem:[%s753_s7 + $0x48] sm:$0xff]  ;;  %v287_v6 = vld [vmem:[%s753_s7 + $0x50] sm:$0xff] }
  0x15   : > { %v497_v30 = vadd.f32 %v465_v20, %v355_v19  ;;  %v359_v41 = vadd.f32 %v764_v2, %v320_v32  ;;  %v469_v42 = vadd.f32 %v769_v3, %v430_v33  ;;  %v431_v43 = vmul.f32 %v747_v1, %v392_v29  ;;  %v396_v61 = vld [vmem:[%s759_s10 + $0x48] sm:$0xff]  ;;  %v397_v7 = vld [vmem:[%s759_s10 + $0x50] sm:$0xff]  ;;  %v288_v12 = vld [vmem:[%s753_s7 + $0x58] sm:$0xff] }
  0x16   : > { %v530_v47 = vmax.f32 %v498_v34, 0.0  ;;  %v531_v48 = vmax.f32 %v499_v35, 0.0  ;;  %v500_v49 = vadd.f32 %v468_v36, %v358_v31  ;;  %v360_v50 = vadd.f32 %v764_v2, %v321_v37  ;;  %v398_v21 = vld [vmem:[%s759_s10 + $0x58] sm:$0xff]  ;;  %v289_v22 = vld [vmem:[%s753_s7 + $0x60] sm:$0xff]  ;;  %v290_v28 = vld [vmem:[%s753_s7 + $0x68] sm:$0xff] }
  0x17   : > { %v529_v40 = vmax.f32 %v497_v30, 0.0  ;;  %v501_v51 = vadd.f32 %v469_v42, %v359_v41  ;;  %v470_v52 = vadd.f32 %v769_v3, %v431_v43  ;;  %v322_v53 = vmul.f32 %v742_v0, %v283_v38  ;;  %v399_v27 = vld [vmem:[%s759_s10 + $0x60] sm:$0xff]  ;;  %v400_v33 = vld [vmem:[%s759_s10 + $0x68] sm:$0xff]  ;;  %v291_v38 = vld [vmem:[%s753_s7 + $0x70] sm:$0xff] }
  0x18   : > { %v432_v54 = vmul.f32 %v747_v1, %v393_v39  ;;  %562 = vst [vmem:[%s804_s17 + $0x8] sm:$0xff] %v530_v47  ;;  %563 = vst [vmem:[%s804_s17 + $0x10] sm:$0xff] %v531_v48  ;;  %v532_v56 = vmax.f32 %v500_v49, 0.0  ;;  %v323_v57 = vmul.f32 %v742_v0, %v284_v44  ;;  %v433_v58 = vmul.f32 %v747_v1, %v394_v45  ;;  %v401_v43 = vld [vmem:[%s759_s10 + $0x70] sm:$0xff]  ;;  %v292_v44 = vld [vmem:[%s753_s7 + $0x78] sm:$0xff] }
  0x19   : > { %561 = vst [vmem:[%s804_s17] sm:$0xff] %v529_v40  ;;  %v324_v59 = vmul.f32 %v742_v0, %v285_v46  ;;  %v533_v62 = vmax.f32 %v501_v51, 0.0  ;;  %v502_v63 = vadd.f32 %v470_v52, %v360_v50  ;;  %v361_v4 = vadd.f32 %v764_v2, %v322_v53  ;;  %v402_v49 = vld [vmem:[%s759_s10 + $0x78] sm:$0xff]  ;;  %v293_v50 = vld [vmem:[%s753_s7 + $0x80] sm:$0xff] }
  0x1a   : > { %v471_v5 = vadd.f32 %v769_v3, %v432_v54  ;;  %564 = vst [vmem:[%s804_s17 + $0x18] sm:$0xff] %v532_v56  ;;  %v362_v8 = vadd.f32 %v764_v2, %v323_v57  ;;  %v472_v9 = vadd.f32 %v769_v3, %v433_v58  ;;  %v434_v11 = vmul.f32 %v747_v1, %v395_v55 }
  0x1b   : > { %v363_v10 = vadd.f32 %v764_v2, %v324_v59  ;;  %565 = vst [vmem:[%s804_s17 + $0x20] sm:$0xff] %v533_v62  ;;  %v534_v13 = vmax.f32 %v502_v63, 0.0  ;;  %v325_v15 = vmul.f32 %v742_v0, %v286_v60  ;;  %v435_v16 = vmul.f32 %v747_v1, %v396_v61  ;;  %v403_v59 = vld [vmem:[%s759_s10 + $0x80] sm:$0xff] }
  0x1c   : > { %v503_v14 = vadd.f32 %v471_v5, %v361_v4  ;;  %v504_v17 = vadd.f32 %v472_v9, %v362_v8  ;;  %v473_v18 = vadd.f32 %v769_v3, %v434_v11  ;;  %v326_v19 = vmul.f32 %v742_v0, %v287_v6  ;;  %v294_v4 = vld [vmem:[%s753_s7 + $0x88] sm:$0xff]  ;;  %v405_v11 = vld [vmem:[%s759_s10 + $0x90] sm:$0xff] }
  0x1d   : > { %v436_v20 = vmul.f32 %v747_v1, %v397_v7  ;;  %566 = vst [vmem:[%s804_s17 + $0x28] sm:$0xff] %v534_v13  ;;  %v364_v24 = vadd.f32 %v764_v2, %v325_v15  ;;  %v474_v25 = vadd.f32 %v769_v3, %v435_v16  ;;  %v327_v26 = vmul.f32 %v742_v0, %v288_v12  ;;  %v404_v5 = vld [vmem:[%s759_s10 + $0x88] sm:$0xff]  ;;  %v296_v16 = vld [vmem:[%s753_s7 + $0x98] sm:$0xff] }
  0x1e   : > { %v535_v23 = vmax.f32 %v503_v14, 0.0  ;;  %v536_v29 = vmax.f32 %v504_v17, 0.0  ;;  %v505_v30 = vadd.f32 %v473_v18, %v363_v10  ;;  %v365_v31 = vadd.f32 %v764_v2, %v326_v19  ;;  %v295_v10 = vld [vmem:[%s753_s7 + $0x90] sm:$0xff] }
  0x1f   : > { %v475_v32 = vadd.f32 %v769_v3, %v436_v20  ;;  %v506_v34 = vadd.f32 %v474_v25, %v364_v24  ;;  %v366_v35 = vadd.f32 %v764_v2, %v327_v26  ;;  %v437_v36 = vmul.f32 %v747_v1, %v398_v21  ;;  %v406_v25 = vld [vmem:[%s759_s10 + $0x98] sm:$0xff]  ;;  %v297_v26 = vld [vmem:[%s753_s7 + $0xa0] sm:$0xff] }
  0x20   : > { %567 = vst [vmem:[%s804_s17 + $0x30] sm:$0xff] %v535_v23  ;;  %v328_v37 = vmul.f32 %v742_v0, %v289_v22  ;;  %568 = vst [vmem:[%s804_s17 + $0x38] sm:$0xff] %v536_v29  ;;  %v537_v39 = vmax.f32 %v505_v30, 0.0  ;;  %v438_v41 = vmul.f32 %v747_v1, %v399_v27  ;;  %v329_v42 = vmul.f32 %v742_v0, %v290_v28 }
  0x21   : > { %v507_v40 = vadd.f32 %v475_v32, %v365_v31  ;;  %v538_v45 = vmax.f32 %v506_v34, 0.0  ;;  %v476_v46 = vadd.f32 %v769_v3, %v437_v36  ;;  %v439_v48 = vmul.f32 %v747_v1, %v400_v33  ;;  %v407_v31 = vld [vmem:[%s759_s10 + $0xa0] sm:$0xff]  ;;  %v298_v32 = vld [vmem:[%s753_s7 + $0xa8] sm:$0xff] }
  0x22   : > { %v367_v47 = vadd.f32 %v764_v2, %v328_v37  ;;  %569 = vst [vmem:[%s804_s17 + $0x40] sm:$0xff] %v537_v39  ;;  %v477_v52 = vadd.f32 %v769_v3, %v438_v41  ;;  %v368_v53 = vadd.f32 %v764_v2, %v329_v42  ;;  %v330_v54 = vmul.f32 %v742_v0, %v291_v38  ;;  %v408_v37 = vld [vmem:[%s759_s10 + $0xa8] sm:$0xff]  ;;  %v299_v42 = vld [vmem:[%s753_s7 + $0xb0] sm:$0xff] }
  0x23   : > { %v539_v51 = vmax.f32 %v507_v40, 0.0  ;;  %570 = vst [vmem:[%s804_s17 + $0x48] sm:$0xff] %v538_v45  ;;  %v508_v55 = vadd.f32 %v476_v46, %v366_v35  ;;  %v478_v56 = vadd.f32 %v769_v3, %v439_v48  ;;  %v440_v57 = vmul.f32 %v747_v1, %v401_v43  ;;  %v300_v48 = vld [vmem:[%s753_s7 + $0xb8] sm:$0xff] }
  0x24   : > { %v331_v58 = vmul.f32 %v742_v0, %v292_v44  ;;  %v509_v60 = vadd.f32 %v477_v52, %v367_v47  ;;  %v369_v61 = vadd.f32 %v764_v2, %v330_v54  ;;  %v441_v62 = vmul.f32 %v747_v1, %v402_v49  ;;  %v409_v47 = vld [vmem:[%s759_s10 + $0xb0] sm:$0xff]  ;;  %v301_v54 = vld [vmem:[%s753_s7 + $0xc0] sm:$0xff] }
  0x25   : > { %571 = vst [vmem:[%s804_s17 + $0x50] sm:$0xff] %v539_v51  ;;  %v332_v63 = vmul.f32 %v742_v0, %v293_v50  ;;  %v540_v6 = vmax.f32 %v508_v55, 0.0  ;;  %v510_v7 = vadd.f32 %v478_v56, %v368_v53  ;;  %v479_v8 = vadd.f32 %v769_v3, %v440_v57  ;;  %v410_v53 = vld [vmem:[%s759_s10 + $0xb8] sm:$0xff] }
  0x26   : > { %v370_v9 = vadd.f32 %v764_v2, %v331_v58  ;;  %v541_v12 = vmax.f32 %v509_v60, 0.0  ;;  %v480_v13 = vadd.f32 %v769_v3, %v441_v62  ;;  %v442_v15 = vmul.f32 %v747_v1, %v403_v59 }
  0x27   : > { %v371_v14 = vadd.f32 %v764_v2, %v332_v63  ;;  %572 = vst [vmem:[%s804_s17 + $0x58] sm:$0xff] %v540_v6  ;;  %v542_v17 = vmax.f32 %v510_v7, 0.0  ;;  %v511_v18 = vadd.f32 %v479_v8, %v369_v61  ;;  %v333_v19 = vmul.f32 %v742_v0, %v294_v4  ;;  %v411_v63 = vld [vmem:[%s759_s10 + $0xc0] sm:$0xff]  ;;  %v302_v8 = vld [vmem:[%s753_s7 + $0xc8] sm:$0xff] }
  0x28   : > { %v443_v20 = vmul.f32 %v747_v1, %v404_v5  ;;  %573 = vst [vmem:[%s804_s17 + $0x60] sm:$0xff] %v541_v12  ;;  %v512_v21 = vadd.f32 %v480_v13, %v370_v9  ;;  %v481_v22 = vadd.f32 %v769_v3, %v442_v15  ;;  %v334_v23 = vmul.f32 %v742_v0, %v295_v10  ;;  %v412_v9 = vld [vmem:[%s759_s10 + $0xc8] sm:$0xff]  ;;  %v413_v15 = vld [vmem:[%s759_s10 + $0xd0] sm:$0xff] }
  0x29   : > { %v444_v24 = vmul.f32 %v747_v1, %v405_v11  ;;  %574 = vst [vmem:[%s804_s17 + $0x68] sm:$0xff] %v542_v17  ;;  %v543_v27 = vmax.f32 %v511_v18, 0.0  ;;  %v372_v28 = vadd.f32 %v764_v2, %v333_v19  ;;  %v335_v30 = vmul.f32 %v742_v0, %v296_v16 }
  0x2a   : > { %v482_v29 = vadd.f32 %v769_v3, %v443_v20  ;;  %v544_v33 = vmax.f32 %v512_v21, 0.0  ;;  %v513_v34 = vadd.f32 %v481_v22, %v371_v14  ;;  %v373_v35 = vadd.f32 %v764_v2, %v334_v23  ;;  %v303_v14 = vld [vmem:[%s753_s7 + $0xd0] sm:$0xff]  ;;  %v304_v20 = vld [vmem:[%s753_s7 + $0xd8] sm:$0xff] }
  0x2b   : > { %v483_v36 = vadd.f32 %v769_v3, %v444_v24  ;;  %575 = vst [vmem:[%s804_s17 + $0x70] sm:$0xff] %v543_v27  ;;  %v374_v39 = vadd.f32 %v764_v2, %v335_v30  ;;  %v445_v40 = vmul.f32 %v747_v1, %v406_v25  ;;  %v336_v41 = vmul.f32 %v742_v0, %v297_v26  ;;  %v305_v30 = vld [vmem:[%s753_s7 + $0xe0] sm:$0xff] }
  0x2c   : > { %v514_v38 = vadd.f32 %v482_v29, %v372_v28  ;;  %576 = vst [vmem:[%s804_s17 + $0x78] sm:$0xff] %v544_v33  ;;  %v545_v43 = vmax.f32 %v513_v34, 0.0  ;;  %v446_v45 = vmul.f32 %v747_v1, %v407_v31  ;;  %v337_v46 = vmul.f32 %v742_v0, %v298_v32  ;;  %v414_v29 = vld [vmem:[%s759_s10 + $0xd8] sm:$0xff] }
  0x2d   : > { %v515_v44 = vadd.f32 %v483_v36, %v373_v35  ;;  %v484_v50 = vadd.f32 %v769_v3, %v445_v40  ;;  %v375_v51 = vadd.f32 %v764_v2, %v336_v41  ;;  %v447_v52 = vmul.f32 %v747_v1, %v408_v37  ;;  %v415_v35 = vld [vmem:[%s759_s10 + $0xe0] sm:$0xff]  ;;  %v306_v36 = vld [vmem:[%s753_s7 + $0xe8] sm:$0xff] }
  0x2e   : > { %v546_v49 = vmax.f32 %v514_v38, 0.0  ;;  %577 = vst [vmem:[%s804_s17 + $0x80] sm:$0xff] %v545_v43  ;;  %v485_v56 = vadd.f32 %v769_v3, %v446_v45  ;;  %v376_v57 = vadd.f32 %v764_v2, %v337_v46  ;;  %v338_v58 = vmul.f32 %v742_v0, %v299_v42  ;;  %v416_v41 = vld [vmem:[%s759_s10 + $0xe8] sm:$0xff]  ;;  %v307_v46 = vld [vmem:[%s753_s7 + $0xf0] sm:$0xff] }
  0x2f   : > { %v547_v55 = vmax.f32 %v515_v44, 0.0  ;;  %v516_v59 = vadd.f32 %v484_v50, %v374_v39  ;;  %v486_v60 = vadd.f32 %v769_v3, %v447_v52  ;;  %v448_v61 = vmul.f32 %v747_v1, %v409_v47  ;;  %v308_v52 = vld [vmem:[%s753_s7 + $0xf8] sm:$0xff] }
  0x30   : > { %578 = vst [vmem:[%s804_s17 + $0x88] sm:$0xff] %v546_v49  ;;  %v339_v62 = vmul.f32 %v742_v0, %v300_v48  ;;  %v517_v4 = vadd.f32 %v485_v56, %v375_v51  ;;  %v377_v5 = vadd.f32 %v764_v2, %v338_v58  ;;  %v449_v6 = vmul.f32 %v747_v1, %v410_v53  ;;  %v417_v51 = vld [vmem:[%s759_s10 + $0xf0] sm:$0xff] }
  0x31   : > { %579 = vst [vmem:[%s804_s17 + $0x90] sm:$0xff] %v547_v55  ;;  %v340_v7 = vmul.f32 %v742_v0, %v301_v54  ;;  %v548_v10 = vmax.f32 %v516_v59, 0.0  ;;  %v518_v11 = vadd.f32 %v486_v60, %v376_v57  ;;  %v487_v12 = vadd.f32 %v769_v3, %v448_v61  ;;  %v418_v57 = vld [vmem:[%s759_s10 + $0xf8] sm:$0xff] }
  0x32   : > { %v378_v13 = vadd.f32 %v764_v2, %v339_v62  ;;  %v549_v16 = vmax.f32 %v517_v4, 0.0  ;;  %v488_v17 = vadd.f32 %v769_v3, %v449_v6  ;;  %v450_v19 = vmul.f32 %v747_v1, %v411_v63 }
  0x33   : > { %v379_v18 = vadd.f32 %v764_v2, %v340_v7  ;;  %580 = vst [vmem:[%s804_s17 + $0x98] sm:$0xff] %v548_v10  ;;  %v550_v21 = vmax.f32 %v518_v11, 0.0  ;;  %v519_v22 = vadd.f32 %v487_v12, %v377_v5  ;;  %v341_v23 = vmul.f32 %v742_v0, %v302_v8 }
  0x34   : > { %v451_v24 = vmul.f32 %v747_v1, %v412_v9  ;;  %581 = vst [vmem:[%s804_s17 + $0xa0] sm:$0xff] %v549_v16  ;;  %v520_v25 = vadd.f32 %v488_v17, %v378_v13  ;;  %v489_v26 = vadd.f32 %v769_v3, %v450_v19  ;;  %v342_v27 = vmul.f32 %v742_v0, %v303_v14 }
  0x35   : > { %v452_v28 = vmul.f32 %v747_v1, %v413_v15  ;;  %582 = vst [vmem:[%s804_s17 + $0xa8] sm:$0xff] %v550_v21  ;;  %v551_v31 = vmax.f32 %v519_v22, 0.0  ;;  %v380_v32 = vadd.f32 %v764_v2, %v341_v23  ;;  %v343_v34 = vmul.f32 %v742_v0, %v304_v20 }
  0x36   : > { %v490_v33 = vadd.f32 %v769_v3, %v451_v24  ;;  %v552_v37 = vmax.f32 %v520_v25, 0.0  ;;  %v521_v38 = vadd.f32 %v489_v26, %v379_v18  ;;  %v381_v39 = vadd.f32 %v764_v2, %v342_v27 }
  0x37   : > { %v491_v40 = vadd.f32 %v769_v3, %v452_v28  ;;  %583 = vst [vmem:[%s804_s17 + $0xb0] sm:$0xff] %v551_v31  ;;  %v382_v43 = vadd.f32 %v764_v2, %v343_v34  ;;  %v453_v44 = vmul.f32 %v747_v1, %v414_v29  ;;  %v344_v45 = vmul.f32 %v742_v0, %v305_v30 }
  0x38   : > { %v522_v42 = vadd.f32 %v490_v33, %v380_v32  ;;  %584 = vst [vmem:[%s804_s17 + $0xb8] sm:$0xff] %v552_v37  ;;  %v553_v47 = vmax.f32 %v521_v38, 0.0  ;;  %v454_v49 = vmul.f32 %v747_v1, %v415_v35  ;;  %v345_v50 = vmul.f32 %v742_v0, %v306_v36 }
  0x39   : > { %v523_v48 = vadd.f32 %v491_v40, %v381_v39  ;;  %v492_v54 = vadd.f32 %v769_v3, %v453_v44  ;;  %v383_v55 = vadd.f32 %v764_v2, %v344_v45  ;;  %v455_v56 = vmul.f32 %v747_v1, %v416_v41 }
  0x3a   : > { %v554_v53 = vmax.f32 %v522_v42, 0.0  ;;  %585 = vst [vmem:[%s804_s17 + $0xc0] sm:$0xff] %v553_v47  ;;  %v493_v59 = vadd.f32 %v769_v3, %v454_v49  ;;  %v384_v60 = vadd.f32 %v764_v2, %v345_v50  ;;  %v346_v61 = vmul.f32 %v742_v0, %v307_v46 }
  0x3b   : > { %v555_v58 = vmax.f32 %v523_v48, 0.0  ;;  %v524_v62 = vadd.f32 %v492_v54, %v382_v43  ;;  %v494_v63 = vadd.f32 %v769_v3, %v455_v56  ;;  %v456_v4 = vmul.f32 %v747_v1, %v417_v51 }
  0x3c   : > { %586 = vst [vmem:[%s804_s17 + $0xc8] sm:$0xff] %v554_v53  ;;  %v347_v5 = vmul.f32 %v742_v0, %v308_v52  ;;  %v525_v6 = vadd.f32 %v493_v59, %v383_v55  ;;  %v385_v7 = vadd.f32 %v764_v2, %v346_v61  ;;  %v457_v8 = vmul.f32 %v747_v1, %v418_v57 }
  0x3d   : > { %587 = vst [vmem:[%s804_s17 + $0xd0] sm:$0xff] %v555_v58  ;;  %v556_v9 = vmax.f32 %v524_v62, 0.0  ;;  %v526_v10 = vadd.f32 %v494_v63, %v384_v60  ;;  %v495_v11 = vadd.f32 %v769_v3, %v456_v4 }
  0x3e   : > { %v386_v12 = vadd.f32 %v764_v2, %v347_v5  ;;  %v557_v13 = vmax.f32 %v525_v6, 0.0  ;;  %v496_v14 = vadd.f32 %v769_v3, %v457_v8 }
  0x3f   : > { %588 = vst [vmem:[%s804_s17 + $0xd8] sm:$0xff] %v556_v9  ;;  %v558_v0 = vmax.f32 %v526_v10, 0.0  ;;  %v527_v15 = vadd.f32 %v495_v11, %v385_v7 }
  0x40   : > { %589 = vst [vmem:[%s804_s17 + $0xe0] sm:$0xff] %v557_v13  ;;  %v528_v16 = vadd.f32 %v496_v14, %v386_v12 }
  0x41   : > { %590 = vst [vmem:[%s804_s17 + $0xe8] sm:$0xff] %v558_v0  ;;  %v559_v17 = vmax.f32 %v527_v15, 0.0 }
  0x42   : > { %v560_v18 = vmax.f32 %v528_v16, 0.0 }
  0x43   : > { %591 = vst [vmem:[%s804_s17 + $0xf0] sm:$0xff] %v559_v17 }
  0x44   : > { %592 = vst [vmem:[%s804_s17 + $0xf8] sm:$0xff] %v560_v18 }
  0x45 PF: > { %s16_s21 = sadd.s32 1, %s692_s21  }
  0x46   : > { %p13_p4 = scmp.ge.s32.totalorder %s16_s21, 4  }
  0x48   :  { %15 = sbr.rel (!%p13_p4) target bundleno = 1 (0x1), region = 77 }

// kernel: basic_block_forward.6
= control target key start
LH: loop header
LB: loop body
LE: loop exit
PB: predicated region body
PF: predicated region fallthrough
CT: control target
= control target key end

     0   :  { %s2446_s12 = smov 0   ;;  %s3898_s0 = inlined_call_operand.vmem [shape: f32[512,1152], index: 0, kind: input, shape index: {}]   ;;  %s3899_s1 = inlined_call_operand.vmem [shape: f32[1152,128], index: 1, kind: input, shape index: {}]   ;;  %s3900_s2 = inlined_call_operand.vmem [shape: f32[512,128], index: 2, kind: output, shape index: {0}]   ;;  %s3901_s3 = inlined_call_operand.vmem [shape: f32[2,8,128], index: 3, kind: output, shape index: {1}]  }
   0x1 LB: > { %s2452_s13 = sadd.s32 4294967295, %s2423_s12   ;;  %p2206_p0 = scmp.ge.s32.totalorder %s2423_s12, 1  ;;  %s2423_s12 = sphi %s2446_s12, %s14_s12  }
   0x2   : > { %p142_p1 = scmp.lt.s32.totalorder %s2423_s12, 3 }
   0x4   : > { %p143_p2 = pnand %p2206_p0, %p142_p1 }
   0x6   : > { %146 = sbr.rel (%p143_p2) target bundleno = 618 (0x26a), region = 28 }
   0xb   : > { %v491_v0 = vld [vmem:[%s3899_s1 + $0x78] sm:$0xff]  ;;  %v3902_v2 = vmov 0.0   ;;  %v490_v3 = vld [vmem:[%s3899_s1 + $0x70] sm:$0xff]  ;;  %v489_v5 = vld [vmem:[%s3899_s1 + $0x68] sm:$0xff]  ;;  %s2207_s4 = sshll.u32 %s2452_s13, 5  ;;  %p184_p4 = scmp.lt.s32.totalorder %s2452_s13, 1 }
   0xc   : > { %v523_v1 = vld [vmem:[%s3899_s1 + $0x178] sm:$0xff]  ;;  %620 = vmatprep.subr.mxu0 %v3902_v2  ;;  %845 = vmatprep.subr.mxu1 %v3902_v2  ;;  %v522_v4 = vld [vmem:[%s3899_s1 + $0x170] sm:$0xff]  ;;  %v521_v6 = vld [vmem:[%s3899_s1 + $0x168] sm:$0xff]  ;;  %p172_p3 = scmp.lt.s32.totalorder %s2207_s4, 63 }
   0xd   : > { %621 = vmatpush1.msra.mxu0 %v491_v0  ;;  %846 = vmatpush1.msra.mxu1 %v523_v1  ;;  %v488_v7 = vld [vmem:[%s3899_s1 + $0x60] sm:$0xff]  ;;  %v487_v9 = vld [vmem:[%s3899_s1 + $0x58] sm:$0xff]  ;;  %v486_v11 = vld [vmem:[%s3899_s1 + $0x50] sm:$0xff] }
   0xe   : > { %622 = vmatprep.subr.mxu0 %v3902_v2  ;;  %847 = vmatprep.subr.mxu1 %v3902_v2  ;;  %v520_v8 = vld [vmem:[%s3899_s1 + $0x160] sm:$0xff]  ;;  %v519_v10 = vld [vmem:[%s3899_s1 + $0x158] sm:$0xff]  ;;  %v518_v12 = vld [vmem:[%s3899_s1 + $0x150] sm:$0xff]  ;;  %s3964_s4 = smov (!%p172_p3, %s2207_s4), 63 }
   0xf   : > { %623 = vmatpush1.msra.mxu0 %v490_v3  ;;  %848 = vmatpush1.msra.mxu1 %v522_v4  ;;  %v485_v13 = vld [vmem:[%s3899_s1 + $0x48] sm:$0xff]  ;;  %v484_v15 = vld [vmem:[%s3899_s1 + $0x40] sm:$0xff]  ;;  %v483_v17 = vld [vmem:[%s3899_s1 + $0x38] sm:$0xff]  ;;  %s2407_s27 = smul.u32 72, %s3964_s4  ;;  %s2210_s22 = sshll.u32 %s3964_s4, 3 }
  0x10   : > { %624 = vmatprep.subr.mxu0 %v3902_v2  ;;  %849 = vmatprep.subr.mxu1 %v3902_v2  ;;  %v517_v14 = vld [vmem:[%s3899_s1 + $0x148] sm:$0xff]  ;;  %v516_v16 = vld [vmem:[%s3899_s1 + $0x140] sm:$0xff]  ;;  %v515_v18 = vld [vmem:[%s3899_s1 + $0x138] sm:$0xff]  ;;  %s3566_s24 = scalar_lea.vmem %s3900_s2, %s2210_s22 }
  0x11   : > { %625 = vmatpush1.msra.mxu0 %v489_v5  ;;  %850 = vmatpush1.msra.mxu1 %v521_v6  ;;  %v482_v19 = vld [vmem:[%s3899_s1 + $0x30] sm:$0xff]  ;;  %v481_v21 = vld [vmem:[%s3899_s1 + $0x28] sm:$0xff]  ;;  %v480_v23 = vld [vmem:[%s3899_s1 + $0x20] sm:$0xff]  ;;  %s2701_s14 = scalar_lea.vmem %s3898_s0, %s2407_s27 }
  0x12   : > { %626 = vmatprep.subr.mxu0 %v3902_v2  ;;  %851 = vmatprep.subr.mxu1 %v3902_v2  ;;  %v514_v20 = vld [vmem:[%s3899_s1 + $0x130] sm:$0xff]  ;;  %v513_v22 = vld [vmem:[%s3899_s1 + $0x128] sm:$0xff]  ;;  %v512_v24 = vld [vmem:[%s3899_s1 + $0x120] sm:$0xff] }
  0x13   : > { %627 = vmatpush1.msra.mxu0 %v488_v7  ;;  %852 = vmatpush1.msra.mxu1 %v520_v8  ;;  %v479_v25 = vld [vmem:[%s3899_s1 + $0x18] sm:$0xff]  ;;  %v478_v27 = vld [vmem:[%s3899_s1 + $0x10] sm:$0xff]  ;;  %v477_v29 = vld [vmem:[%s3899_s1 + $0x8] sm:$0xff] }
  0x14   : > { %628 = vmatprep.subr.mxu0 %v3902_v2  ;;  %853 = vmatprep.subr.mxu1 %v3902_v2  ;;  %v511_v26 = vld [vmem:[%s3899_s1 + $0x118] sm:$0xff]  ;;  %v510_v28 = vld [vmem:[%s3899_s1 + $0x110] sm:$0xff]  ;;  %v509_v30 = vld [vmem:[%s3899_s1 + $0x108] sm:$0xff] }
  0x15   : > { %629 = vmatpush1.msra.mxu0 %v487_v9  ;;  %854 = vmatpush1.msra.mxu1 %v519_v10  ;;  %v476_v31 = vld [vmem:[%s3899_s1] sm:$0xff]  ;;  %v507_v33 = vld [vmem:[%s3899_s1 + $0xf8] sm:$0xff]  ;;  %v506_v35 = vld [vmem:[%s3899_s1 + $0xf0] sm:$0xff] }
  0x16   : > { %630 = vmatprep.subr.mxu0 %v3902_v2  ;;  %855 = vmatprep.subr.mxu1 %v3902_v2  ;;  %v508_v32 = vld [vmem:[%s3899_s1 + $0x100] sm:$0xff]  ;;  %v539_v34 = vld [vmem:[%s3899_s1 + $0x1f8] sm:$0xff]  ;;  %v538_v36 = vld [vmem:[%s3899_s1 + $0x1f0] sm:$0xff] }
  0x17   : > { %631 = vmatpush1.msra.mxu0 %v486_v11  ;;  %856 = vmatpush1.msra.mxu1 %v518_v12  ;;  %v505_v37 = vld [vmem:[%s3899_s1 + $0xe8] sm:$0xff]  ;;  %v504_v39 = vld [vmem:[%s3899_s1 + $0xe0] sm:$0xff]  ;;  %v503_v41 = vld [vmem:[%s3899_s1 + $0xd8] sm:$0xff] }
  0x18   : > { %632 = vmatprep.subr.mxu0 %v3902_v2  ;;  %857 = vmatprep.subr.mxu1 %v3902_v2  ;;  %v537_v38 = vld [vmem:[%s3899_s1 + $0x1e8] sm:$0xff]  ;;  %v536_v40 = vld [vmem:[%s3899_s1 + $0x1e0] sm:$0xff]  ;;  %v535_v42 = vld [vmem:[%s3899_s1 + $0x1d8] sm:$0xff] }
  0x19   : > { %633 = vmatpush1.msra.mxu0 %v485_v13  ;;  %858 = vmatpush1.msra.mxu1 %v517_v14  ;;  %v502_v43 = vld [vmem:[%s3899_s1 + $0xd0] sm:$0xff]  ;;  %v501_v45 = vld [vmem:[%s3899_s1 + $0xc8] sm:$0xff]  ;;  %v500_v47 = vld [vmem:[%s3899_s1 + $0xc0] sm:$0xff] }
  0x1a   : > { %634 = vmatprep.subr.mxu0 %v3902_v2  ;;  %859 = vmatprep.subr.mxu1 %v3902_v2  ;;  %v534_v44 = vld [vmem:[%s3899_s1 + $0x1d0] sm:$0xff]  ;;  %v533_v46 = vld [vmem:[%s3899_s1 + $0x1c8] sm:$0xff]  ;;  %v532_v48 = vld [vmem:[%s3899_s1 + $0x1c0] sm:$0xff] }
  0x1b   : > { %635 = vmatpush1.msra.mxu0 %v484_v15  ;;  %860 = vmatpush1.msra.mxu1 %v516_v16  ;;  %v499_v49 = vld [vmem:[%s3899_s1 + $0xb8] sm:$0xff]  ;;  %v498_v51 = vld [vmem:[%s3899_s1 + $0xb0] sm:$0xff]  ;;  %v497_v53 = vld [vmem:[%s3899_s1 + $0xa8] sm:$0xff] }
  0x1c   : > { %636 = vmatprep.subr.mxu0 %v3902_v2  ;;  %861 = vmatprep.subr.mxu1 %v3902_v2  ;;  %v531_v50 = vld [vmem:[%s3899_s1 + $0x1b8] sm:$0xff]  ;;  %v530_v52 = vld [vmem:[%s3899_s1 + $0x1b0] sm:$0xff]  ;;  %v529_v54 = vld [vmem:[%s3899_s1 + $0x1a8] sm:$0xff] }
  0x1d   : > { %637 = vmatpush1.msra.mxu0 %v483_v17  ;;  %862 = vmatpush1.msra.mxu1 %v515_v18  ;;  %v496_v55 = vld [vmem:[%s3899_s1 + $0xa0] sm:$0xff]  ;;  %v495_v57 = vld [vmem:[%s3899_s1 + $0x98] sm:$0xff]  ;;  %v494_v59 = vld [vmem:[%s3899_s1 + $0x90] sm:$0xff] }
  0x1e   : > { %638 = vmatprep.subr.mxu0 %v3902_v2  ;;  %863 = vmatprep.subr.mxu1 %v3902_v2  ;;  %v528_v56 = vld [vmem:[%s3899_s1 + $0x1a0] sm:$0xff]  ;;  %v527_v58 = vld [vmem:[%s3899_s1 + $0x198] sm:$0xff]  ;;  %v526_v60 = vld [vmem:[%s3899_s1 + $0x190] sm:$0xff] }
  0x1f   : > { %639 = vmatpush1.msra.mxu0 %v482_v19  ;;  %864 = vmatpush1.msra.mxu1 %v514_v20  ;;  %v493_v61 = vld [vmem:[%s3899_s1 + $0x88] sm:$0xff]  ;;  %v492_v63 = vld [vmem:[%s3899_s1 + $0x80] sm:$0xff]  ;;  %v191_v3 = vld [vmem:[%s2701_s14 + $0x18] sm:$0xff] }
  0x20   : > { %640 = vmatprep.subr.mxu0 %v3902_v2  ;;  %865 = vmatprep.subr.mxu1 %v3902_v2  ;;  %v525_v62 = vld [vmem:[%s3899_s1 + $0x188] sm:$0xff]  ;;  %v524_v1 = vld [vmem:[%s3899_s1 + $0x180] sm:$0xff]  ;;  %v190_v5 = vld [vmem:[%s2701_s14 + $0x10] sm:$0xff] }
  0x21   : > { %641 = vmatpush1.msra.mxu0 %v481_v21  ;;  %866 = vmatpush1.msra.mxu1 %v513_v22  ;;  %v189_v0 = vld [vmem:[%s2701_s14 + $0x8] sm:$0xff]  ;;  %v188_v4 = vld [vmem:[%s2701_s14] sm:$0xff]  ;;  %v198_v6 = vld [vmem:[%s2701_s14 + $0x50] sm:$0xff] }
  0x22   : > { %642 = vmatprep.subr.mxu0 %v3902_v2  ;;  %867 = vmatprep.subr.mxu1 %v3902_v2  ;;  %v555_v7 = vld [vmem:[%s3899_s1 + $0x278] sm:$0xff]  ;;  %v200_v8 = vld [vmem:[%s2701_s14 + $0x60] sm:$0xff]  ;;  %v197_v9 = vld [vmem:[%s2701_s14 + $0x48] sm:$0xff] }
  0x23   : > { %643 = vmatpush1.msra.mxu0 %v480_v23  ;;  %868 = vmatpush1.msra.mxu1 %v512_v24  ;;  %v199_v10 = vld [vmem:[%s2701_s14 + $0x58] sm:$0xff]  ;;  %v554_v11 = vld [vmem:[%s3899_s1 + $0x270] sm:$0xff]  ;;  %v209_v13 = vld [vmem:[%s2701_s14 + $0xa8] sm:$0xff] }
  0x24   : > { %644 = vmatprep.subr.mxu0 %v3902_v2  ;;  %869 = vmatprep.subr.mxu1 %v3902_v2  ;;  %v207_v12 = vld [vmem:[%s2701_s14 + $0x98] sm:$0xff]  ;;  %v553_v14 = vld [vmem:[%s3899_s1 + $0x268] sm:$0xff]  ;;  %v206_v16 = vld [vmem:[%s2701_s14 + $0x90] sm:$0xff] }
  0x25   : > { %645 = vmatpush1.msra.mxu0 %v479_v25  ;;  %870 = vmatpush1.msra.mxu1 %v511_v26  ;;  %v587_v15 = vld [vmem:[%s3899_s1 + $0x378] sm:$0xff]  ;;  %v208_v17 = vld [vmem:[%s2701_s14 + $0xa0] sm:$0xff]  ;;  %v218_v19 = vld [vmem:[%s2701_s14 + $0xf0] sm:$0xff] }
  0x26   : > { %646 = vmatprep.subr.mxu0 %v3902_v2  ;;  %871 = vmatprep.subr.mxu1 %v3902_v2  ;;  %v216_v18 = vld [vmem:[%s2701_s14 + $0xe0] sm:$0xff]  ;;  %v586_v21 = vld [vmem:[%s3899_s1 + $0x370] sm:$0xff]  ;;  %v215_v22 = vld [vmem:[%s2701_s14 + $0xd8] sm:$0xff] }
  0x27   : > { %647 = vmatpush1.msra.mxu0 %v478_v27  ;;  %872 = vmatpush1.msra.mxu1 %v510_v28  ;;  %v552_v20 = vld [vmem:[%s3899_s1 + $0x260] sm:$0xff]  ;;  %v217_v23 = vld [vmem:[%s2701_s14 + $0xe8] sm:$0xff]  ;;  %v227_v25 = vld [vmem:[%s2701_s14 + $0x138] sm:$0xff] }
  0x28   : > { %648 = vmatprep.subr.mxu0 %v3902_v2  ;;  %873 = vmatprep.subr.mxu1 %v3902_v2  ;;  %v225_v24 = vld [vmem:[%s2701_s14 + $0x128] sm:$0xff]  ;;  %v551_v26 = vld [vmem:[%s3899_s1 + $0x258] sm:$0xff]  ;;  %v224_v28 = vld [vmem:[%s2701_s14 + $0x120] sm:$0xff] }
  0x29   : > { %649 = vmatpush1.msra.mxu0 %v477_v29  ;;  %874 = vmatpush1.msra.mxu1 %v509_v30  ;;  %v585_v27 = vld [vmem:[%s3899_s1 + $0x368] sm:$0xff]  ;;  %v226_v29 = vld [vmem:[%s2701_s14 + $0x130] sm:$0xff] }
  0x2a   : > { %650 = vmatprep.subr.mxu0 %v3902_v2  ;;  %875 = vmatprep.subr.mxu1 %v3902_v2  ;;  %v234_v30 = vld [vmem:[%s2701_s14 + $0x170] sm:$0xff] }
  0x2b   : > { %651 = vmatpush1.msra.mxu0 %v476_v31  ;;  %876 = vmatpush1.msra.mxu1 %v508_v32  ;;  %v236_v31 = vld [vmem:[%s2701_s14 + $0x180] sm:$0xff]  ;;  %v550_v32 = vld [vmem:[%s3899_s1 + $0x250] sm:$0xff] }
  0x2c   : > { %652 = vmatprep.subr.mxu0 %v3902_v2  ;;  %877 = vmatprep.subr.mxu1 %v3902_v2 }
  0x2d   : > { %653 = vmatpush2.msra.mxu0 %v507_v33  ;;  %878 = vmatpush2.msra.mxu1 %v539_v34  ;;  %v584_v33 = vld [vmem:[%s3899_s1 + $0x360] sm:$0xff]  ;;  %v233_v34 = vld [vmem:[%s2701_s14 + $0x168] sm:$0xff] }
  0x2e   : > { %654 = vmatprep.subr.mxu0 %v3902_v2  ;;  %879 = vmatprep.subr.mxu1 %v3902_v2 }
  0x2f   : > { %655 = vmatpush2.msra.mxu0 %v506_v35  ;;  %880 = vmatpush2.msra.mxu1 %v538_v36  ;;  %v235_v35 = vld [vmem:[%s2701_s14 + $0x178] sm:$0xff] }
  0x30   : > { %656 = vmatprep.subr.mxu0 %v3902_v2  ;;  %881 = vmatprep.subr.mxu1 %v3902_v2  ;;  %v243_v36 = vld [vmem:[%s2701_s14 + $0x1b8] sm:$0xff] }
  0x31   : > { %657 = vmatpush2.msra.mxu0 %v505_v37  ;;  %882 = vmatpush2.msra.mxu1 %v537_v38  ;;  %v245_v37 = vld [vmem:[%s2701_s14 + $0x1c8] sm:$0xff] }
  0x32   : > { %658 = vmatprep.subr.mxu0 %v3902_v2  ;;  %883 = vmatprep.subr.mxu1 %v3902_v2  ;;  %v549_v38 = vld [vmem:[%s3899_s1 + $0x248] sm:$0xff] }
  0x33   : > { %659 = vmatpush2.msra.mxu0 %v504_v39  ;;  %884 = vmatpush2.msra.mxu1 %v536_v40  ;;  %v583_v39 = vld [vmem:[%s3899_s1 + $0x358] sm:$0xff]  ;;  %v242_v40 = vld [vmem:[%s2701_s14 + $0x1b0] sm:$0xff] }
  0x34   : > { %660 = vmatprep.subr.mxu0 %v3902_v2  ;;  %885 = vmatprep.subr.mxu1 %v3902_v2 }
  0x35   : > { %661 = vmatpush2.msra.mxu0 %v503_v41  ;;  %886 = vmatpush2.msra.mxu1 %v535_v42  ;;  %v244_v41 = vld [vmem:[%s2701_s14 + $0x1c0] sm:$0xff] }
  0x36   : > { %662 = vmatprep.subr.mxu0 %v3902_v2  ;;  %887 = vmatprep.subr.mxu1 %v3902_v2  ;;  %v252_v42 = vld [vmem:[%s2701_s14 + $0x200] sm:$0xff] }
  0x37   : > { %663 = vmatpush2.msra.mxu0 %v502_v43  ;;  %888 = vmatpush2.msra.mxu1 %v534_v44  ;;  %v254_v43 = vld [vmem:[%s2701_s14 + $0x210] sm:$0xff]  ;;  %v548_v44 = vld [vmem:[%s3899_s1 + $0x240] sm:$0xff] }
  0x38   : > { %664 = vmatprep.subr.mxu0 %v3902_v2  ;;  %889 = vmatprep.subr.mxu1 %v3902_v2 }
  0x39   : > { %665 = vmatpush2.msra.mxu0 %v501_v45  ;;  %890 = vmatpush2.msra.mxu1 %v533_v46  ;;  %v582_v45 = vld [vmem:[%s3899_s1 + $0x350] sm:$0xff]  ;;  %v251_v46 = vld [vmem:[%s2701_s14 + $0x1f8] sm:$0xff] }
  0x3a   : > { %666 = vmatprep.subr.mxu0 %v3902_v2  ;;  %891 = vmatprep.subr.mxu1 %v3902_v2 }
  0x3b   : > { %667 = vmatpush2.msra.mxu0 %v500_v47  ;;  %892 = vmatpush2.msra.mxu1 %v532_v48  ;;  %v253_v47 = vld [vmem:[%s2701_s14 + $0x208] sm:$0xff] }
  0x3c   : > { %668 = vmatprep.subr.mxu0 %v3902_v2  ;;  %893 = vmatprep.subr.mxu1 %v3902_v2  ;;  %v261_v48 = vld [vmem:[%s2701_s14 + $0x248] sm:$0xff] }
  0x3d   : > { %669 = vmatpush2.msra.mxu0 %v499_v49  ;;  %894 = vmatpush2.msra.mxu1 %v531_v50  ;;  %v263_v49 = vld [vmem:[%s2701_s14 + $0x258] sm:$0xff] }
  0x3e   : > { %670 = vmatprep.subr.mxu0 %v3902_v2  ;;  %895 = vmatprep.subr.mxu1 %v3902_v2  ;;  %v547_v50 = vld [vmem:[%s3899_s1 + $0x238] sm:$0xff] }
  0x3f   : > { %671 = vmatpush2.msra.mxu0 %v498_v51  ;;  %896 = vmatpush2.msra.mxu1 %v530_v52  ;;  %v581_v51 = vld [vmem:[%s3899_s1 + $0x348] sm:$0xff]  ;;  %v260_v52 = vld [vmem:[%s2701_s14 + $0x240] sm:$0xff] }
  0x40   : > { %672 = vmatprep.subr.mxu0 %v3902_v2  ;;  %897 = vmatprep.subr.mxu1 %v3902_v2 }
  0x41   : > { %673 = vmatpush2.msra.mxu0 %v497_v53  ;;  %898 = vmatpush2.msra.mxu1 %v529_v54  ;;  %v262_v53 = vld [vmem:[%s2701_s14 + $0x250] sm:$0xff] }
  0x42   : > { %674 = vmatprep.subr.mxu0 %v3902_v2  ;;  %899 = vmatprep.subr.mxu1 %v3902_v2  ;;  %v270_v54 = vld [vmem:[%s2701_s14 + $0x290] sm:$0xff] }
  0x43   : > { %675 = vmatpush2.msra.mxu0 %v496_v55  ;;  %900 = vmatpush2.msra.mxu1 %v528_v56  ;;  %v272_v55 = vld [vmem:[%s2701_s14 + $0x2a0] sm:$0xff]  ;;  %v546_v56 = vld [vmem:[%s3899_s1 + $0x230] sm:$0xff] }
  0x44   : > { %676 = vmatprep.subr.mxu0 %v3902_v2  ;;  %901 = vmatprep.subr.mxu1 %v3902_v2 }
  0x45   : > { %677 = vmatpush2.msra.mxu0 %v495_v57  ;;  %902 = vmatpush2.msra.mxu1 %v527_v58  ;;  %v580_v57 = vld [vmem:[%s3899_s1 + $0x340] sm:$0xff]  ;;  %v269_v58 = vld [vmem:[%s2701_s14 + $0x288] sm:$0xff] }
  0x46   : > { %678 = vmatprep.subr.mxu0 %v3902_v2  ;;  %903 = vmatprep.subr.mxu1 %v3902_v2 }
  0x47   : > { %679 = vmatpush2.msra.mxu0 %v494_v59  ;;  %904 = vmatpush2.msra.mxu1 %v526_v60  ;;  %v271_v59 = vld [vmem:[%s2701_s14 + $0x298] sm:$0xff] }
  0x48   : > { %680 = vmatprep.subr.mxu0 %v3902_v2  ;;  %905 = vmatprep.subr.mxu1 %v3902_v2  ;;  %v279_v60 = vld [vmem:[%s2701_s14 + $0x2d8] sm:$0xff] }
  0x49   : > { %681 = vmatpush2.msra.mxu0 %v493_v61  ;;  %906 = vmatpush2.msra.mxu1 %v525_v62  ;;  %v281_v61 = vld [vmem:[%s2701_s14 + $0x2e8] sm:$0xff] }
  0x4a   : > { %682 = vmatprep.subr.mxu0 %v3902_v2  ;;  %907 = vmatprep.subr.mxu1 %v3902_v2  ;;  %v545_v62 = vld [vmem:[%s3899_s1 + $0x228] sm:$0xff] }
  0x4b   : > { %683 = vmatpush2.msra.mxu0 %v492_v63  ;;  %684 = vmatprep.mubr.f32.mxu0 %v189_v0  ;;  %v579_v63 = vld [vmem:[%s3899_s1 + $0x338] sm:$0xff]  ;;  %v278_v0 = vld [vmem:[%s2701_s14 + $0x2d0] sm:$0xff] }
  0x4c   : > { %908 = vmatpush2.msra.mxu1 %v524_v1  ;;  %909 = vmatprep.mubr.f32.mxu1 %v191_v3  ;;  %v280_v1 = vld [vmem:[%s2701_s14 + $0x2e0] sm:$0xff] }
  0x4d   : > { %685 = vmatmul.mubr.f32.vlgmr.msra.gmra.mxu0 %v188_v4  ;;  %910 = vmatmul.mubr.f32.vlgmr.msra.gmra.mxu1 %v190_v5  ;;  %v288_v3 = vld [vmem:[%s2701_s14 + $0x320] sm:$0xff]  ;;  %v290_v4 = vld [vmem:[%s2701_s14 + $0x330] sm:$0xff] }
  0x4e   : > { %1070 = vmatprep.subr.mxu0 %v3902_v2  ;;  %689 = vmatprep.mubr.f32.mxu0 %v198_v6  ;;  %v544_v5 = vld [vmem:[%s3899_s1 + $0x220] sm:$0xff]  ;;  %v578_v6 = vld [vmem:[%s3899_s1 + $0x330] sm:$0xff] }
  0x4f   : > { %1071 = vmatpush1.msra.mxu0 %v555_v7  ;;  %914 = vmatprep.mubr.f32.mxu1 %v200_v8  ;;  %v287_v7 = vld [vmem:[%s2701_s14 + $0x318] sm:$0xff]  ;;  %v289_v8 = vld [vmem:[%s2701_s14 + $0x328] sm:$0xff] }
  0x50   : > { %1072 = vmatprep.subr.mxu0 %v3902_v2  ;;  %1295 = vmatprep.subr.mxu1 %v3902_v2 }
  0x51   : > { %690 = vmatmul.mubr.f32.gmra.mxu0 %v197_v9  ;;  %915 = vmatmul.mubr.f32.gmra.mxu1 %v199_v10  ;;  %v297_v9 = vld [vmem:[%s2701_s14 + $0x368] sm:$0xff]  ;;  %v299_v10 = vld [vmem:[%s2701_s14 + $0x378] sm:$0xff] }
  0x52   : > { %1073 = vmatpush1.msra.mxu0 %v554_v11  ;;  %694 = vmatprep.mubr.f32.mxu0 %v207_v12  ;;  %v543_v11 = vld [vmem:[%s3899_s1 + $0x218] sm:$0xff]  ;;  %v577_v12 = vld [vmem:[%s3899_s1 + $0x328] sm:$0xff] }
  0x53   : > { %919 = vmatprep.mubr.f32.mxu1 %v209_v13  ;;  %1074 = vmatprep.subr.mxu0 %v3902_v2  ;;  %v296_v13 = vld [vmem:[%s2701_s14 + $0x360] sm:$0xff] }
  0x54   : > { %1075 = vmatpush1.msra.mxu0 %v553_v14  ;;  %1296 = vmatpush1.msra.mxu1 %v587_v15  ;;  %v298_v14 = vld [vmem:[%s2701_s14 + $0x370] sm:$0xff] }
  0x55   : > { %695 = vmatmul.mubr.f32.gmra.mxu0 %v206_v16  ;;  %920 = vmatmul.mubr.f32.gmra.mxu1 %v208_v17  ;;  %v306_v15 = vld [vmem:[%s2701_s14 + $0x3b0] sm:$0xff]  ;;  %v308_v16 = vld [vmem:[%s2701_s14 + $0x3c0] sm:$0xff] }
  0x56   : > { %699 = vmatprep.mubr.f32.mxu0 %v216_v18  ;;  %924 = vmatprep.mubr.f32.mxu1 %v218_v19  ;;  %v542_v17 = vld [vmem:[%s3899_s1 + $0x210] sm:$0xff]  ;;  %v576_v18 = vld [vmem:[%s3899_s1 + $0x320] sm:$0xff]  ;;  %v305_v19 = vld [vmem:[%s2701_s14 + $0x3a8] sm:$0xff] }
  0x57   : > { %1076 = vmatprep.subr.mxu0 %v3902_v2  ;;  %1297 = vmatprep.subr.mxu1 %v3902_v2 }
  0x58   : > { %1077 = vmatpush1.msra.mxu0 %v552_v20  ;;  %1298 = vmatpush1.msra.mxu1 %v586_v21  ;;  %v307_v20 = vld [vmem:[%s2701_s14 + $0x3b8] sm:$0xff] }
  0x59   : > { %700 = vmatmul.mubr.f32.gmra.mxu0 %v215_v22  ;;  %925 = vmatmul.mubr.f32.gmra.mxu1 %v217_v23  ;;  %v315_v21 = vld [vmem:[%s2701_s14 + $0x3f8] sm:$0xff]  ;;  %v317_v22 = vld [vmem:[%s2701_s14 + $0x408] sm:$0xff] }
  0x5a   : > { %704 = vmatprep.mubr.f32.mxu0 %v225_v24  ;;  %929 = vmatprep.mubr.f32.mxu1 %v227_v25  ;;  %v541_v23 = vld [vmem:[%s3899_s1 + $0x208] sm:$0xff]  ;;  %v575_v24 = vld [vmem:[%s3899_s1 + $0x318] sm:$0xff]  ;;  %v314_v25 = vld [vmem:[%s2701_s14 + $0x3f0] sm:$0xff] }
  0x5b   : > { %1078 = vmatprep.subr.mxu0 %v3902_v2  ;;  %1299 = vmatprep.subr.mxu1 %v3902_v2 }
  0x5c   : > { %1079 = vmatpush1.msra.mxu0 %v551_v26  ;;  %1300 = vmatpush1.msra.mxu1 %v585_v27  ;;  %v316_v26 = vld [vmem:[%s2701_s14 + $0x400] sm:$0xff] }
  0x5d   : > { %705 = vmatmul.mubr.f32.gmra.mxu0 %v224_v28  ;;  %930 = vmatmul.mubr.f32.gmra.mxu1 %v226_v29  ;;  %v324_v27 = vld [vmem:[%s2701_s14 + $0x440] sm:$0xff]  ;;  %v326_v28 = vld [vmem:[%s2701_s14 + $0x450] sm:$0xff] }
  0x5e   : > { %709 = vmatprep.mubr.f32.mxu0 %v234_v30  ;;  %934 = vmatprep.mubr.f32.mxu1 %v236_v31  ;;  %v540_v29 = vld [vmem:[%s3899_s1 + $0x200] sm:$0xff]  ;;  %v574_v30 = vld [vmem:[%s3899_s1 + $0x310] sm:$0xff]  ;;  %v323_v31 = vld [vmem:[%s2701_s14 + $0x438] sm:$0xff] }
  0x5f   : > { %1080 = vmatprep.subr.mxu0 %v3902_v2  ;;  %1301 = vmatprep.subr.mxu1 %v3902_v2 }
  0x60   : > { %1081 = vmatpush1.msra.mxu0 %v550_v32  ;;  %1302 = vmatpush1.msra.mxu1 %v584_v33  ;;  %v325_v32 = vld [vmem:[%s2701_s14 + $0x448] sm:$0xff] }
  0x61   : > { %710 = vmatmul.mubr.f32.gmra.mxu0 %v233_v34  ;;  %935 = vmatmul.mubr.f32.gmra.mxu1 %v235_v35  ;;  %v333_v33 = vld [vmem:[%s2701_s14 + $0x488] sm:$0xff]  ;;  %v335_v34 = vld [vmem:[%s2701_s14 + $0x498] sm:$0xff] }
  0x62   : > { %714 = vmatprep.mubr.f32.mxu0 %v243_v36  ;;  %939 = vmatprep.mubr.f32.mxu1 %v245_v37  ;;  %v571_v35 = vld [vmem:[%s3899_s1 + $0x2f8] sm:$0xff]  ;;  %v573_v36 = vld [vmem:[%s3899_s1 + $0x308] sm:$0xff]  ;;  %v332_v37 = vld [vmem:[%s2701_s14 + $0x480] sm:$0xff] }
  0x63   : > { %1082 = vmatprep.subr.mxu0 %v3902_v2  ;;  %1303 = vmatprep.subr.mxu1 %v3902_v2 }
  0x64   : > { %1083 = vmatpush1.msra.mxu0 %v549_v38  ;;  %1304 = vmatpush1.msra.mxu1 %v583_v39  ;;  %v334_v38 = vld [vmem:[%s2701_s14 + $0x490] sm:$0xff] }
  0x65   : > { %715 = vmatmul.mubr.f32.gmra.mxu0 %v242_v40  ;;  %940 = vmatmul.mubr.f32.gmra.mxu1 %v244_v41  ;;  %v342_v39 = vld [vmem:[%s2701_s14 + $0x4d0] sm:$0xff]  ;;  %v344_v40 = vld [vmem:[%s2701_s14 + $0x4e0] sm:$0xff] }
  0x66   : > { %719 = vmatprep.mubr.f32.mxu0 %v252_v42  ;;  %944 = vmatprep.mubr.f32.mxu1 %v254_v43  ;;  %v570_v41 = vld [vmem:[%s3899_s1 + $0x2f0] sm:$0xff]  ;;  %v572_v42 = vld [vmem:[%s3899_s1 + $0x300] sm:$0xff]  ;;  %v341_v43 = vld [vmem:[%s2701_s14 + $0x4c8] sm:$0xff] }
  0x67   : > { %1084 = vmatprep.subr.mxu0 %v3902_v2  ;;  %1305 = vmatprep.subr.mxu1 %v3902_v2 }
  0x68   : > { %1085 = vmatpush1.msra.mxu0 %v548_v44  ;;  %1306 = vmatpush1.msra.mxu1 %v582_v45  ;;  %v343_v44 = vld [vmem:[%s2701_s14 + $0x4d8] sm:$0xff] }
  0x69   : > { %720 = vmatmul.mubr.f32.gmra.mxu0 %v251_v46  ;;  %945 = vmatmul.mubr.f32.gmra.mxu1 %v253_v47  ;;  %v351_v45 = vld [vmem:[%s2701_s14 + $0x518] sm:$0xff]  ;;  %v353_v46 = vld [vmem:[%s2701_s14 + $0x528] sm:$0xff] }
  0x6a   : > { %724 = vmatprep.mubr.f32.mxu0 %v261_v48  ;;  %949 = vmatprep.mubr.f32.mxu1 %v263_v49  ;;  %v569_v47 = vld [vmem:[%s3899_s1 + $0x2e8] sm:$0xff]  ;;  %v603_v48 = vld [vmem:[%s3899_s1 + $0x3f8] sm:$0xff]  ;;  %v350_v49 = vld [vmem:[%s2701_s14 + $0x510] sm:$0xff] }
  0x6b   : > { %1086 = vmatprep.subr.mxu0 %v3902_v2  ;;  %1307 = vmatprep.subr.mxu1 %v3902_v2 }
  0x6c   : > { %1087 = vmatpush1.msra.mxu0 %v547_v50  ;;  %1308 = vmatpush1.msra.mxu1 %v581_v51  ;;  %v352_v50 = vld [vmem:[%s2701_s14 + $0x520] sm:$0xff] }
  0x6d   : > { %725 = vmatmul.mubr.f32.gmra.mxu0 %v260_v52  ;;  %950 = vmatmul.mubr.f32.gmra.mxu1 %v262_v53  ;;  %v360_v51 = vld [vmem:[%s2701_s14 + $0x560] sm:$0xff]  ;;  %v362_v52 = vld [vmem:[%s2701_s14 + $0x570] sm:$0xff] }
  0x6e   : > { %729 = vmatprep.mubr.f32.mxu0 %v270_v54  ;;  %954 = vmatprep.mubr.f32.mxu1 %v272_v55  ;;  %v568_v53 = vld [vmem:[%s3899_s1 + $0x2e0] sm:$0xff]  ;;  %v602_v54 = vld [vmem:[%s3899_s1 + $0x3f0] sm:$0xff]  ;;  %v359_v55 = vld [vmem:[%s2701_s14 + $0x558] sm:$0xff] }
  0x6f   : > { %1088 = vmatprep.subr.mxu0 %v3902_v2  ;;  %1309 = vmatprep.subr.mxu1 %v3902_v2 }
  0x70   : > { %1089 = vmatpush1.msra.mxu0 %v546_v56  ;;  %1310 = vmatpush1.msra.mxu1 %v580_v57  ;;  %v361_v56 = vld [vmem:[%s2701_s14 + $0x568] sm:$0xff] }
  0x71   : > { %730 = vmatmul.mubr.f32.gmra.mxu0 %v269_v58  ;;  %955 = vmatmul.mubr.f32.gmra.mxu1 %v271_v59  ;;  %v369_v57 = vld [vmem:[%s2701_s14 + $0x5a8] sm:$0xff]  ;;  %v371_v58 = vld [vmem:[%s2701_s14 + $0x5b8] sm:$0xff] }
  0x72   : > { %734 = vmatprep.mubr.f32.mxu0 %v279_v60  ;;  %959 = vmatprep.mubr.f32.mxu1 %v281_v61  ;;  %v567_v59 = vld [vmem:[%s3899_s1 + $0x2d8] sm:$0xff]  ;;  %v601_v60 = vld [vmem:[%s3899_s1 + $0x3e8] sm:$0xff]  ;;  %v368_v61 = vld [vmem:[%s2701_s14 + $0x5a0] sm:$0xff] }
  0x73   : > { %1090 = vmatprep.subr.mxu0 %v3902_v2  ;;  %1311 = vmatprep.subr.mxu1 %v3902_v2 }
  0x74   : > { %1091 = vmatpush1.msra.mxu0 %v545_v62  ;;  %1312 = vmatpush1.msra.mxu1 %v579_v63  ;;  %v370_v62 = vld [vmem:[%s2701_s14 + $0x5b0] sm:$0xff] }
  0x75   : > { %735 = vmatmul.mubr.f32.gmra.mxu0 %v278_v0  ;;  %960 = vmatmul.mubr.f32.gmra.mxu1 %v280_v1  ;;  %v378_v63 = vld [vmem:[%s2701_s14 + $0x5f0] sm:$0xff]  ;;  %v380_v0 = vld [vmem:[%s2701_s14 + $0x600] sm:$0xff] }
  0x76   : > { %739 = vmatprep.mubr.f32.mxu0 %v288_v3  ;;  %964 = vmatprep.mubr.f32.mxu1 %v290_v4  ;;  %v566_v1 = vld [vmem:[%s3899_s1 + $0x2d0] sm:$0xff]  ;;  %v600_v3 = vld [vmem:[%s3899_s1 + $0x3e0] sm:$0xff]  ;;  %v377_v4 = vld [vmem:[%s2701_s14 + $0x5e8] sm:$0xff] }
  0x77   : > { %1092 = vmatprep.subr.mxu0 %v3902_v2  ;;  %1313 = vmatprep.subr.mxu1 %v3902_v2 }
  0x78   : > { %1093 = vmatpush1.msra.mxu0 %v544_v5  ;;  %1314 = vmatpush1.msra.mxu1 %v578_v6  ;;  %v379_v5 = vld [vmem:[%s2701_s14 + $0x5f8] sm:$0xff] }
  0x79   : > { %740 = vmatmul.mubr.f32.gmra.mxu0 %v287_v7  ;;  %965 = vmatmul.mubr.f32.gmra.mxu1 %v289_v8  ;;  %v387_v6 = vld [vmem:[%s2701_s14 + $0x638] sm:$0xff]  ;;  %v389_v7 = vld [vmem:[%s2701_s14 + $0x648] sm:$0xff] }
  0x7a   : > { %744 = vmatprep.mubr.f32.mxu0 %v297_v9  ;;  %969 = vmatprep.mubr.f32.mxu1 %v299_v10  ;;  %v565_v8 = vld [vmem:[%s3899_s1 + $0x2c8] sm:$0xff]  ;;  %v599_v9 = vld [vmem:[%s3899_s1 + $0x3d8] sm:$0xff]  ;;  %v386_v10 = vld [vmem:[%s2701_s14 + $0x630] sm:$0xff] }
  0x7b   : > { %1094 = vmatprep.subr.mxu0 %v3902_v2  ;;  %1315 = vmatprep.subr.mxu1 %v3902_v2 }
  0x7c   : > { %1095 = vmatpush1.msra.mxu0 %v543_v11  ;;  %1316 = vmatpush1.msra.mxu1 %v577_v12  ;;  %v388_v11 = vld [vmem:[%s2701_s14 + $0x640] sm:$0xff] }
  0x7d   : > { %745 = vmatmul.mubr.f32.gmra.mxu0 %v296_v13  ;;  %970 = vmatmul.mubr.f32.gmra.mxu1 %v298_v14  ;;  %v396_v12 = vld [vmem:[%s2701_s14 + $0x680] sm:$0xff]  ;;  %v398_v13 = vld [vmem:[%s2701_s14 + $0x690] sm:$0xff] }
  0x7e   : > { %749 = vmatprep.mubr.f32.mxu0 %v306_v15  ;;  %974 = vmatprep.mubr.f32.mxu1 %v308_v16  ;;  %v564_v14 = vld [vmem:[%s3899_s1 + $0x2c0] sm:$0xff]  ;;  %v598_v15 = vld [vmem:[%s3899_s1 + $0x3d0] sm:$0xff]  ;;  %v395_v16 = vld [vmem:[%s2701_s14 + $0x678] sm:$0xff] }
  0x7f   : > { %1096 = vmatprep.subr.mxu0 %v3902_v2  ;;  %1317 = vmatprep.subr.mxu1 %v3902_v2 }
  0x80   : > { %1097 = vmatpush1.msra.mxu0 %v542_v17  ;;  %1318 = vmatpush1.msra.mxu1 %v576_v18  ;;  %v397_v17 = vld [vmem:[%s2701_s14 + $0x688] sm:$0xff] }
  0x81   : > { %750 = vmatmul.mubr.f32.gmra.mxu0 %v305_v19  ;;  %975 = vmatmul.mubr.f32.gmra.mxu1 %v307_v20  ;;  %v405_v18 = vld [vmem:[%s2701_s14 + $0x6c8] sm:$0xff]  ;;  %v407_v19 = vld [vmem:[%s2701_s14 + $0x6d8] sm:$0xff] }
  0x82   : > { %754 = vmatprep.mubr.f32.mxu0 %v315_v21  ;;  %979 = vmatprep.mubr.f32.mxu1 %v317_v22  ;;  %v563_v20 = vld [vmem:[%s3899_s1 + $0x2b8] sm:$0xff]  ;;  %v597_v21 = vld [vmem:[%s3899_s1 + $0x3c8] sm:$0xff]  ;;  %v404_v22 = vld [vmem:[%s2701_s14 + $0x6c0] sm:$0xff] }
  0x83   : > { %1098 = vmatprep.subr.mxu0 %v3902_v2  ;;  %1319 = vmatprep.subr.mxu1 %v3902_v2 }
  0x84   : > { %1099 = vmatpush1.msra.mxu0 %v541_v23  ;;  %1320 = vmatpush1.msra.mxu1 %v575_v24  ;;  %v406_v23 = vld [vmem:[%s2701_s14 + $0x6d0] sm:$0xff] }
  0x85   : > { %755 = vmatmul.mubr.f32.gmra.mxu0 %v314_v25  ;;  %980 = vmatmul.mubr.f32.gmra.mxu1 %v316_v26  ;;  %v414_v24 = vld [vmem:[%s2701_s14 + $0x710] sm:$0xff]  ;;  %v416_v25 = vld [vmem:[%s2701_s14 + $0x720] sm:$0xff] }
  0x86   : > { %759 = vmatprep.mubr.f32.mxu0 %v324_v27  ;;  %984 = vmatprep.mubr.f32.mxu1 %v326_v28  ;;  %v562_v26 = vld [vmem:[%s3899_s1 + $0x2b0] sm:$0xff]  ;;  %v596_v27 = vld [vmem:[%s3899_s1 + $0x3c0] sm:$0xff]  ;;  %v413_v28 = vld [vmem:[%s2701_s14 + $0x708] sm:$0xff] }
  0x87   : > { %1100 = vmatprep.subr.mxu0 %v3902_v2  ;;  %1321 = vmatprep.subr.mxu1 %v3902_v2 }
  0x88   : > { %1101 = vmatpush1.msra.mxu0 %v540_v29  ;;  %1322 = vmatpush1.msra.mxu1 %v574_v30  ;;  %v415_v29 = vld [vmem:[%s2701_s14 + $0x718] sm:$0xff] }
  0x89   : > { %760 = vmatmul.mubr.f32.gmra.mxu0 %v323_v31  ;;  %985 = vmatmul.mubr.f32.gmra.mxu1 %v325_v32  ;;  %v423_v30 = vld [vmem:[%s2701_s14 + $0x758] sm:$0xff]  ;;  %v425_v31 = vld [vmem:[%s2701_s14 + $0x768] sm:$0xff] }
  0x8a   : > { %764 = vmatprep.mubr.f32.mxu0 %v333_v33  ;;  %989 = vmatprep.mubr.f32.mxu1 %v335_v34  ;;  %v561_v32 = vld [vmem:[%s3899_s1 + $0x2a8] sm:$0xff]  ;;  %v595_v33 = vld [vmem:[%s3899_s1 + $0x3b8] sm:$0xff]  ;;  %v422_v34 = vld [vmem:[%s2701_s14 + $0x750] sm:$0xff] }
  0x8b   : > { %1102 = vmatprep.subr.mxu0 %v3902_v2  ;;  %1323 = vmatprep.subr.mxu1 %v3902_v2 }
  0x8c   : > { %1103 = vmatpush2.msra.mxu0 %v571_v35  ;;  %1324 = vmatpush1.msra.mxu1 %v573_v36  ;;  %v424_v35 = vld [vmem:[%s2701_s14 + $0x760] sm:$0xff] }
  0x8d   : > { %765 = vmatmul.mubr.f32.gmra.mxu0 %v332_v37  ;;  %990 = vmatmul.mubr.f32.gmra.mxu1 %v334_v38  ;;  %v432_v36 = vld [vmem:[%s2701_s14 + $0x7a0] sm:$0xff]  ;;  %v434_v37 = vld [vmem:[%s2701_s14 + $0x7b0] sm:$0xff] }
  0x8e   : > { %769 = vmatprep.mubr.f32.mxu0 %v342_v39  ;;  %994 = vmatprep.mubr.f32.mxu1 %v344_v40  ;;  %v560_v38 = vld [vmem:[%s3899_s1 + $0x2a0] sm:$0xff]  ;;  %v594_v39 = vld [vmem:[%s3899_s1 + $0x3b0] sm:$0xff]  ;;  %v431_v40 = vld [vmem:[%s2701_s14 + $0x798] sm:$0xff] }
  0x8f   : > { %1104 = vmatprep.subr.mxu0 %v3902_v2  ;;  %1325 = vmatprep.subr.mxu1 %v3902_v2 }
  0x90   : > { %1105 = vmatpush2.msra.mxu0 %v570_v41  ;;  %1326 = vmatpush1.msra.mxu1 %v572_v42  ;;  %v433_v41 = vld [vmem:[%s2701_s14 + $0x7a8] sm:$0xff] }
  0x91   : > { %770 = vmatmul.mubr.f32.gmra.mxu0 %v341_v43  ;;  %995 = vmatmul.mubr.f32.gmra.mxu1 %v343_v44  ;;  %v441_v42 = vld [vmem:[%s2701_s14 + $0x7e8] sm:$0xff]  ;;  %v443_v43 = vld [vmem:[%s2701_s14 + $0x7f8] sm:$0xff] }
  0x92   : > { %774 = vmatprep.mubr.f32.mxu0 %v351_v45  ;;  %999 = vmatprep.mubr.f32.mxu1 %v353_v46  ;;  %v559_v44 = vld [vmem:[%s3899_s1 + $0x298] sm:$0xff]  ;;  %v593_v45 = vld [vmem:[%s3899_s1 + $0x3a8] sm:$0xff]  ;;  %v440_v46 = vld [vmem:[%s2701_s14 + $0x7e0] sm:$0xff] }
  0x93   : > { %1106 = vmatprep.subr.mxu0 %v3902_v2  ;;  %1327 = vmatprep.subr.mxu1 %v3902_v2 }
  0x94   : > { %1107 = vmatpush2.msra.mxu0 %v569_v47  ;;  %1328 = vmatpush2.msra.mxu1 %v603_v48  ;;  %v442_v47 = vld [vmem:[%s2701_s14 + $0x7f0] sm:$0xff] }
  0x95   : > { %775 = vmatmul.mubr.f32.gmra.mxu0 %v350_v49  ;;  %1000 = vmatmul.mubr.f32.gmra.mxu1 %v352_v50  ;;  %v450_v48 = vld [vmem:[%s2701_s14 + $0x830] sm:$0xff]  ;;  %v452_v49 = vld [vmem:[%s2701_s14 + $0x840] sm:$0xff] }
  0x96   : > { %779 = vmatprep.mubr.f32.mxu0 %v360_v51  ;;  %1004 = vmatprep.mubr.f32.mxu1 %v362_v52  ;;  %v558_v50 = vld [vmem:[%s3899_s1 + $0x290] sm:$0xff]  ;;  %v592_v51 = vld [vmem:[%s3899_s1 + $0x3a0] sm:$0xff]  ;;  %v449_v52 = vld [vmem:[%s2701_s14 + $0x828] sm:$0xff] }
  0x97   : > { %1108 = vmatprep.subr.mxu0 %v3902_v2  ;;  %1329 = vmatprep.subr.mxu1 %v3902_v2 }
  0x98   : > { %1109 = vmatpush2.msra.mxu0 %v568_v53  ;;  %1330 = vmatpush2.msra.mxu1 %v602_v54  ;;  %v451_v53 = vld [vmem:[%s2701_s14 + $0x838] sm:$0xff] }
  0x99   : > { %780 = vmatmul.mubr.f32.gmra.mxu0 %v359_v55  ;;  %1005 = vmatmul.mubr.f32.gmra.mxu1 %v361_v56  ;;  %v459_v54 = vld [vmem:[%s2701_s14 + $0x878] sm:$0xff]  ;;  %v461_v55 = vld [vmem:[%s2701_s14 + $0x888] sm:$0xff] }
  0x9a   : > { %784 = vmatprep.mubr.f32.mxu0 %v369_v57  ;;  %1009 = vmatprep.mubr.f32.mxu1 %v371_v58  ;;  %v557_v56 = vld [vmem:[%s3899_s1 + $0x288] sm:$0xff]  ;;  %v591_v57 = vld [vmem:[%s3899_s1 + $0x398] sm:$0xff]  ;;  %v458_v58 = vld [vmem:[%s2701_s14 + $0x870] sm:$0xff] }
  0x9b   : > { %1110 = vmatprep.subr.mxu0 %v3902_v2  ;;  %1331 = vmatprep.subr.mxu1 %v3902_v2 }
  0x9c   : > { %1111 = vmatpush2.msra.mxu0 %v567_v59  ;;  %1332 = vmatpush2.msra.mxu1 %v601_v60  ;;  %v460_v59 = vld [vmem:[%s2701_s14 + $0x880] sm:$0xff] }
  0x9d   : > { %785 = vmatmul.mubr.f32.gmra.mxu0 %v368_v61  ;;  %1010 = vmatmul.mubr.f32.gmra.mxu1 %v370_v62  ;;  %v468_v60 = vld [vmem:[%s2701_s14 + $0x8c0] sm:$0xff]  ;;  %v470_v61 = vld [vmem:[%s2701_s14 + $0x8d0] sm:$0xff] }
  0x9e   : > { %789 = vmatprep.mubr.f32.mxu0 %v378_v63  ;;  %1014 = vmatprep.mubr.f32.mxu1 %v380_v0  ;;  %v590_v62 = vld [vmem:[%s3899_s1 + $0x390] sm:$0xff]  ;;  %v467_v63 = vld [vmem:[%s2701_s14 + $0x8b8] sm:$0xff]  ;;  %v469_v0 = vld [vmem:[%s2701_s14 + $0x8c8] sm:$0xff] }
  0x9f   : > { %1112 = vmatprep.subr.mxu0 %v3902_v2  ;;  %1333 = vmatprep.subr.mxu1 %v3902_v2 }
  0xa0   : > { %1113 = vmatpush2.msra.mxu0 %v566_v1  ;;  %1334 = vmatpush2.msra.mxu1 %v600_v3  ;;  %v556_v1 = vld [vmem:[%s3899_s1 + $0x280] sm:$0xff]  ;;  %v589_v3 = vld [vmem:[%s3899_s1 + $0x388] sm:$0xff] }
  0xa1   : > { %790 = vmatmul.mubr.f32.gmra.mxu0 %v377_v4  ;;  %1015 = vmatmul.mubr.f32.gmra.mxu1 %v379_v5  ;;  %v193_v4 = vld [vmem:[%s2701_s14 + $0x28] sm:$0xff]  ;;  %v588_v5 = vld [vmem:[%s3899_s1 + $0x380] sm:$0xff] }
  0xa2   : > { %794 = vmatprep.mubr.f32.mxu0 %v387_v6  ;;  %1019 = vmatprep.mubr.f32.mxu1 %v389_v7  ;;  %v195_v6 = vld [vmem:[%s2701_s14 + $0x38] sm:$0xff]  ;;  %v192_v7 = vld [vmem:[%s2701_s14 + $0x20] sm:$0xff] }
  0xa3   : > { %1114 = vmatprep.subr.mxu0 %v3902_v2  ;;  %1335 = vmatprep.subr.mxu1 %v3902_v2 }
  0xa4   : > { %1115 = vmatpush2.msra.mxu0 %v565_v8  ;;  %1336 = vmatpush2.msra.mxu1 %v599_v9  ;;  %v194_v8 = vld [vmem:[%s2701_s14 + $0x30] sm:$0xff]  ;;  %v619_v9 = vld [vmem:[%s3899_s1 + $0x478] sm:$0xff] }
  0xa5   : > { %795 = vmatmul.mubr.f32.gmra.mxu0 %v386_v10  ;;  %1020 = vmatmul.mubr.f32.gmra.mxu1 %v388_v11  ;;  %v202_v10 = vld [vmem:[%s2701_s14 + $0x70] sm:$0xff]  ;;  %v204_v11 = vld [vmem:[%s2701_s14 + $0x80] sm:$0xff] }
  0xa6   : > { %799 = vmatprep.mubr.f32.mxu0 %v396_v12  ;;  %1024 = vmatprep.mubr.f32.mxu1 %v398_v13  ;;  %v618_v12 = vld [vmem:[%s3899_s1 + $0x470] sm:$0xff]  ;;  %v201_v13 = vld [vmem:[%s2701_s14 + $0x68] sm:$0xff] }
  0xa7   : > { %1116 = vmatprep.subr.mxu0 %v3902_v2  ;;  %1337 = vmatprep.subr.mxu1 %v3902_v2 }
  0xa8   : > { %1117 = vmatpush2.msra.mxu0 %v564_v14  ;;  %1338 = vmatpush2.msra.mxu1 %v598_v15  ;;  %v203_v14 = vld [vmem:[%s2701_s14 + $0x78] sm:$0xff] }
  0xa9   : > { %800 = vmatmul.mubr.f32.gmra.mxu0 %v395_v16  ;;  %1025 = vmatmul.mubr.f32.gmra.mxu1 %v397_v17  ;;  %v211_v15 = vld [vmem:[%s2701_s14 + $0xb8] sm:$0xff]  ;;  %v213_v16 = vld [vmem:[%s2701_s14 + $0xc8] sm:$0xff] }
  0xaa   : > { %804 = vmatprep.mubr.f32.mxu0 %v405_v18  ;;  %1029 = vmatprep.mubr.f32.mxu1 %v407_v19  ;;  %v617_v17 = vld [vmem:[%s3899_s1 + $0x468] sm:$0xff]  ;;  %v210_v18 = vld [vmem:[%s2701_s14 + $0xb0] sm:$0xff]  ;;  %v212_v19 = vld [vmem:[%s2701_s14 + $0xc0] sm:$0xff] }
  0xab   : > { %1118 = vmatprep.subr.mxu0 %v3902_v2  ;;  %1339 = vmatprep.subr.mxu1 %v3902_v2 }
  0xac   : > { %1119 = vmatpush2.msra.mxu0 %v563_v20  ;;  %1340 = vmatpush2.msra.mxu1 %v597_v21  ;;  %v220_v20 = vld [vmem:[%s2701_s14 + $0x100] sm:$0xff]  ;;  %v222_v21 = vld [vmem:[%s2701_s14 + $0x110] sm:$0xff] }
  0xad   : > { %805 = vmatmul.mubr.f32.gmra.mxu0 %v404_v22  ;;  %1030 = vmatmul.mubr.f32.gmra.mxu1 %v406_v23  ;;  %v616_v22 = vld [vmem:[%s3899_s1 + $0x460] sm:$0xff]  ;;  %v219_v23 = vld [vmem:[%s2701_s14 + $0xf8] sm:$0xff] }
  0xae   : > { %809 = vmatprep.mubr.f32.mxu0 %v414_v24  ;;  %1034 = vmatprep.mubr.f32.mxu1 %v416_v25  ;;  %v221_v24 = vld [vmem:[%s2701_s14 + $0x108] sm:$0xff] }
  0xaf   : > { %1120 = vmatprep.subr.mxu0 %v3902_v2  ;;  %1341 = vmatprep.subr.mxu1 %v3902_v2  ;;  %v229_v25 = vld [vmem:[%s2701_s14 + $0x148] sm:$0xff] }
  0xb0   : > { %1121 = vmatpush2.msra.mxu0 %v562_v26  ;;  %1342 = vmatpush2.msra.mxu1 %v596_v27  ;;  %v231_v26 = vld [vmem:[%s2701_s14 + $0x158] sm:$0xff] }
  0xb1   : > { %810 = vmatmul.mubr.f32.gmra.mxu0 %v413_v28  ;;  %1035 = vmatmul.mubr.f32.gmra.mxu1 %v415_v29  ;;  %v615_v27 = vld [vmem:[%s3899_s1 + $0x458] sm:$0xff]  ;;  %v228_v28 = vld [vmem:[%s2701_s14 + $0x140] sm:$0xff]  ;;  %v230_v29 = vld [vmem:[%s2701_s14 + $0x150] sm:$0xff] }
  0xb2   : > { %814 = vmatprep.mubr.f32.mxu0 %v423_v30  ;;  %1039 = vmatprep.mubr.f32.mxu1 %v425_v31  ;;  %v238_v30 = vld [vmem:[%s2701_s14 + $0x190] sm:$0xff]  ;;  %v240_v31 = vld [vmem:[%s2701_s14 + $0x1a0] sm:$0xff] }
  0xb3   : > { %1122 = vmatprep.subr.mxu0 %v3902_v2  ;;  %1343 = vmatprep.subr.mxu1 %v3902_v2 }
  0xb4   : > { %1123 = vmatpush2.msra.mxu0 %v561_v32  ;;  %1344 = vmatpush2.msra.mxu1 %v595_v33  ;;  %v614_v32 = vld [vmem:[%s3899_s1 + $0x450] sm:$0xff]  ;;  %v237_v33 = vld [vmem:[%s2701_s14 + $0x188] sm:$0xff] }
  0xb5   : > { %815 = vmatmul.mubr.f32.gmra.mxu0 %v422_v34  ;;  %1040 = vmatmul.mubr.f32.gmra.mxu1 %v424_v35  ;;  %v239_v34 = vld [vmem:[%s2701_s14 + $0x198] sm:$0xff] }
  0xb6   : > { %819 = vmatprep.mubr.f32.mxu0 %v432_v36  ;;  %1044 = vmatprep.mubr.f32.mxu1 %v434_v37  ;;  %v247_v35 = vld [vmem:[%s2701_s14 + $0x1d8] sm:$0xff]  ;;  %v249_v36 = vld [vmem:[%s2701_s14 + $0x1e8] sm:$0xff] }
  0xb7   : > { %1124 = vmatprep.subr.mxu0 %v3902_v2  ;;  %1345 = vmatprep.subr.mxu1 %v3902_v2  ;;  %v613_v37 = vld [vmem:[%s3899_s1 + $0x448] sm:$0xff] }
  0xb8   : > { %1125 = vmatpush2.msra.mxu0 %v560_v38  ;;  %1346 = vmatpush2.msra.mxu1 %v594_v39  ;;  %v246_v38 = vld [vmem:[%s2701_s14 + $0x1d0] sm:$0xff]  ;;  %v248_v39 = vld [vmem:[%s2701_s14 + $0x1e0] sm:$0xff] }
  0xb9   : > { %820 = vmatmul.mubr.f32.gmra.mxu0 %v431_v40  ;;  %1045 = vmatmul.mubr.f32.gmra.mxu1 %v433_v41  ;;  %v256_v40 = vld [vmem:[%s2701_s14 + $0x220] sm:$0xff]  ;;  %v258_v41 = vld [vmem:[%s2701_s14 + $0x230] sm:$0xff] }
  0xba   : > { %824 = vmatprep.mubr.f32.mxu0 %v441_v42  ;;  %1049 = vmatprep.mubr.f32.mxu1 %v443_v43  ;;  %v612_v42 = vld [vmem:[%s3899_s1 + $0x440] sm:$0xff]  ;;  %v255_v43 = vld [vmem:[%s2701_s14 + $0x218] sm:$0xff] }
  0xbb   : > { %1126 = vmatprep.subr.mxu0 %v3902_v2  ;;  %1347 = vmatprep.subr.mxu1 %v3902_v2 }
  0xbc   : > { %1127 = vmatpush2.msra.mxu0 %v559_v44  ;;  %1348 = vmatpush2.msra.mxu1 %v593_v45  ;;  %v257_v44 = vld [vmem:[%s2701_s14 + $0x228] sm:$0xff] }
  0xbd   : > { %825 = vmatmul.mubr.f32.gmra.mxu0 %v440_v46  ;;  %1050 = vmatmul.mubr.f32.gmra.mxu1 %v442_v47  ;;  %v265_v45 = vld [vmem:[%s2701_s14 + $0x268] sm:$0xff]  ;;  %v267_v46 = vld [vmem:[%s2701_s14 + $0x278] sm:$0xff] }
  0xbe   : > { %829 = vmatprep.mubr.f32.mxu0 %v450_v48  ;;  %1054 = vmatprep.mubr.f32.mxu1 %v452_v49  ;;  %v611_v47 = vld [vmem:[%s3899_s1 + $0x438] sm:$0xff]  ;;  %v264_v48 = vld [vmem:[%s2701_s14 + $0x260] sm:$0xff]  ;;  %v266_v49 = vld [vmem:[%s2701_s14 + $0x270] sm:$0xff] }
  0xbf   : > { %1128 = vmatprep.subr.mxu0 %v3902_v2  ;;  %1349 = vmatprep.subr.mxu1 %v3902_v2 }
  0xc0   : > { %1129 = vmatpush2.msra.mxu0 %v558_v50  ;;  %1350 = vmatpush2.msra.mxu1 %v592_v51  ;;  %v274_v50 = vld [vmem:[%s2701_s14 + $0x2b0] sm:$0xff]  ;;  %v276_v51 = vld [vmem:[%s2701_s14 + $0x2c0] sm:$0xff] }
  0xc1   : > { %830 = vmatmul.mubr.f32.gmra.mxu0 %v449_v52  ;;  %1055 = vmatmul.mubr.f32.gmra.mxu1 %v451_v53  ;;  %v610_v52 = vld [vmem:[%s3899_s1 + $0x430] sm:$0xff]  ;;  %v273_v53 = vld [vmem:[%s2701_s14 + $0x2a8] sm:$0xff] }
  0xc2   : > { %834 = vmatprep.mubr.f32.mxu0 %v459_v54  ;;  %1059 = vmatprep.mubr.f32.mxu1 %v461_v55  ;;  %v275_v54 = vld [vmem:[%s2701_s14 + $0x2b8] sm:$0xff] }
  0xc3   : > { %1130 = vmatprep.subr.mxu0 %v3902_v2  ;;  %1351 = vmatprep.subr.mxu1 %v3902_v2  ;;  %v283_v55 = vld [vmem:[%s2701_s14 + $0x2f8] sm:$0xff] }
  0xc4   : > { %1131 = vmatpush2.msra.mxu0 %v557_v56  ;;  %1352 = vmatpush2.msra.mxu1 %v591_v57  ;;  %v285_v56 = vld [vmem:[%s2701_s14 + $0x308] sm:$0xff] }
  0xc5   : > { %835 = vmatmul.mubr.f32.gmra.mxu0 %v458_v58  ;;  %1060 = vmatmul.mubr.f32.gmra.mxu1 %v460_v59  ;;  %v609_v57 = vld [vmem:[%s3899_s1 + $0x428] sm:$0xff]  ;;  %v282_v58 = vld [vmem:[%s2701_s14 + $0x2f0] sm:$0xff]  ;;  %v284_v59 = vld [vmem:[%s2701_s14 + $0x300] sm:$0xff] }
  0xc6   : > { %1353 = vmatprep.subr.mxu1 %v3902_v2  ;;  %839 = vmatprep.mubr.f32.mxu0 %v468_v60  ;;  %v292_v60 = vld [vmem:[%s2701_s14 + $0x340] sm:$0xff] }
  0xc7   : > { %1064 = vmatprep.mubr.f32.mxu1 %v470_v61  ;;  %1354 = vmatpush2.msra.mxu1 %v590_v62  ;;  %v294_v61 = vld [vmem:[%s2701_s14 + $0x350] sm:$0xff]  ;;  %v608_v62 = vld [vmem:[%s3899_s1 + $0x420] sm:$0xff] }
  0xc8   : > { %1132 = vmatprep.subr.mxu0 %v3902_v2  ;;  %1355 = vmatprep.subr.mxu1 %v3902_v2 }
  0xc9   : > { %840 = vmatmul.mubr.f32.gmra.mxu0 %v467_v63  ;;  %1065 = vmatmul.mubr.f32.gmra.mxu1 %v469_v0  ;;  %v291_v63 = vld [vmem:[%s2701_s14 + $0x338] sm:$0xff]  ;;  %v293_v0 = vld [vmem:[%s2701_s14 + $0x348] sm:$0xff] }
  0xca   : > { %1133 = vmatpush2.msra.mxu0 %v556_v1  ;;  %1356 = vmatpush2.msra.mxu1 %v589_v3  ;;  %v301_v1 = vld [vmem:[%s2701_s14 + $0x388] sm:$0xff]  ;;  %v303_v3 = vld [vmem:[%s2701_s14 + $0x398] sm:$0xff] }
  0xcb   : > { %1357 = vmatprep.subr.mxu1 %v3902_v2  ;;  %1134 = vmatprep.mubr.f32.mxu0 %v193_v4  ;;  %v607_v4 = vld [vmem:[%s3899_s1 + $0x418] sm:$0xff] }
  0xcc   : > { %1358 = vmatpush2.msra.mxu1 %v588_v5  ;;  %1359 = vmatprep.mubr.f32.mxu1 %v195_v6  ;;  %v300_v5 = vld [vmem:[%s2701_s14 + $0x380] sm:$0xff]  ;;  %v302_v6 = vld [vmem:[%s2701_s14 + $0x390] sm:$0xff] }
  0xcd   : > { %1135 = vmatmul.mubr.f32.vlgmr.msra.gmra.mxu0 %v192_v7  ;;  %1360 = vmatmul.mubr.f32.vlgmr.msra.gmra.mxu1 %v194_v8  ;;  %v310_v7 = vld [vmem:[%s2701_s14 + $0x3d0] sm:$0xff]  ;;  %v312_v8 = vld [vmem:[%s2701_s14 + $0x3e0] sm:$0xff] }
  0xce   : > { %2295 = vmatprep.subr.mxu0 %v619_v9  ;;  %1139 = vmatprep.mubr.f32.mxu0 %v202_v10  ;;  %v309_v10 = vld [vmem:[%s2701_s14 + $0x3c8] sm:$0xff] }
  0xcf   : > { %2296 = vmatpush3.msra.mxu0 %v619_v9  ;;  %1364 = vmatprep.mubr.f32.mxu1 %v204_v11  ;;  %v311_v11 = vld [vmem:[%s2701_s14 + $0x3d8] sm:$0xff] }
  0xd0   : > { %2297 = vmatprep.subr.mxu0 %v618_v12  ;;  %2375 = vmatprep.subr.mxu1 %v619_v9 }
  0xd1   : > { %1140 = vmatmul.mubr.f32.gmra.mxu0 %v201_v13  ;;  %1365 = vmatmul.mubr.f32.gmra.mxu1 %v203_v14  ;;  %v321_v13 = vld [vmem:[%s2701_s14 + $0x428] sm:$0xff] }
  0xd2   : > { %1144 = vmatprep.mubr.f32.mxu0 %v211_v15  ;;  %1369 = vmatprep.mubr.f32.mxu1 %v213_v16  ;;  %v605_v14 = vld [vmem:[%s3899_s1 + $0x408] sm:$0xff]  ;;  %v318_v15 = vld [vmem:[%s2701_s14 + $0x410] sm:$0xff]  ;;  %v320_v16 = vld [vmem:[%s2701_s14 + $0x420] sm:$0xff] }
  0xd3   : > { %2298 = vmatpush3.msra.mxu0 %v618_v12  ;;  %2391 = vmatpush3.msra.mxu1 %v619_v9  ;;  %v606_v9 = vld [vmem:[%s3899_s1 + $0x410] sm:$0xff] }
  0xd4   : > { %2299 = vmatprep.subr.mxu0 %v617_v17  ;;  %2376 = vmatprep.subr.mxu1 %v618_v12 }
  0xd5   : > { %1145 = vmatmul.mubr.f32.gmra.mxu0 %v210_v18  ;;  %1370 = vmatmul.mubr.f32.gmra.mxu1 %v212_v19  ;;  %v330_v18 = vld [vmem:[%s2701_s14 + $0x470] sm:$0xff]  ;;  %v604_v19 = vld [vmem:[%s3899_s1 + $0x400] sm:$0xff] }
  0xd6   : > { %1149 = vmatprep.mubr.f32.mxu0 %v220_v20  ;;  %1374 = vmatprep.mubr.f32.mxu1 %v222_v21  ;;  %v327_v20 = vld [vmem:[%s2701_s14 + $0x458] sm:$0xff]  ;;  %v329_v21 = vld [vmem:[%s2701_s14 + $0x468] sm:$0xff] }
  0xd7   : > { %2300 = vmatpush3.msra.mxu0 %v617_v17  ;;  %2392 = vmatpush3.msra.mxu1 %v618_v12  ;;  %v319_v12 = vld [vmem:[%s2701_s14 + $0x418] sm:$0xff] }
  0xd8   : > { %2301 = vmatprep.subr.mxu0 %v616_v22  ;;  %2377 = vmatprep.subr.mxu1 %v617_v17 }
  0xd9   : > { %1150 = vmatmul.mubr.f32.gmra.mxu0 %v219_v23  ;;  %1375 = vmatmul.mubr.f32.gmra.mxu1 %v221_v24  ;;  %v339_v23 = vld [vmem:[%s2701_s14 + $0x4b8] sm:$0xff]  ;;  %v336_v24 = vld [vmem:[%s2701_s14 + $0x4a0] sm:$0xff] }
  0xda   : > { %1154 = vmatprep.mubr.f32.mxu0 %v229_v25  ;;  %1379 = vmatprep.mubr.f32.mxu1 %v231_v26  ;;  %v338_v25 = vld [vmem:[%s2701_s14 + $0x4b0] sm:$0xff] }
  0xdb   : > { %2302 = vmatpush3.msra.mxu0 %v616_v22  ;;  %2393 = vmatpush3.msra.mxu1 %v617_v17  ;;  %v328_v17 = vld [vmem:[%s2701_s14 + $0x460] sm:$0xff]  ;;  %v346_v26 = vld [vmem:[%s2701_s14 + $0x4f0] sm:$0xff] }
  0xdc   : > { %2303 = vmatprep.subr.mxu0 %v615_v27  ;;  %2378 = vmatprep.subr.mxu1 %v616_v22 }
  0xdd   : > { %1155 = vmatmul.mubr.f32.gmra.mxu0 %v228_v28  ;;  %1380 = vmatmul.mubr.f32.gmra.mxu1 %v230_v29 }
  0xde   : > { %1159 = vmatprep.mubr.f32.mxu0 %v238_v30  ;;  %1384 = vmatprep.mubr.f32.mxu1 %v240_v31  ;;  %v345_v31 = vld [vmem:[%s2701_s14 + $0x4e8] sm:$0xff] }
  0xdf   : > { %2304 = vmatpush3.msra.mxu0 %v615_v27  ;;  %2394 = vmatpush3.msra.mxu1 %v616_v22  ;;  %v337_v22 = vld [vmem:[%s2701_s14 + $0x4a8] sm:$0xff] }
  0xe0   : > { %2305 = vmatprep.subr.mxu0 %v614_v32  ;;  %2379 = vmatprep.subr.mxu1 %v615_v27 }
  0xe1   : > { %1160 = vmatmul.mubr.f32.gmra.mxu0 %v237_v33  ;;  %1385 = vmatmul.mubr.f32.gmra.mxu1 %v239_v34 }
  0xe2   : > { %1164 = vmatprep.mubr.f32.mxu0 %v247_v35  ;;  %1389 = vmatprep.mubr.f32.mxu1 %v249_v36  ;;  %v355_v35 = vld [vmem:[%s2701_s14 + $0x538] sm:$0xff]  ;;  %v357_v36 = vld [vmem:[%s2701_s14 + $0x548] sm:$0xff] }
  0xe3   : > { %2306 = vmatpush3.msra.mxu0 %v614_v32  ;;  %2395 = vmatpush3.msra.mxu1 %v615_v27  ;;  %v348_v27 = vld [vmem:[%s2701_s14 + $0x500] sm:$0xff] }
  0xe4   : > { %2307 = vmatprep.subr.mxu0 %v613_v37  ;;  %2380 = vmatprep.subr.mxu1 %v614_v32 }
  0xe5   : > { %1165 = vmatmul.mubr.f32.gmra.mxu0 %v246_v38  ;;  %1390 = vmatmul.mubr.f32.gmra.mxu1 %v248_v39 }
  0xe6   : > { %1169 = vmatprep.mubr.f32.mxu0 %v256_v40  ;;  %1394 = vmatprep.mubr.f32.mxu1 %v258_v41  ;;  %v354_v40 = vld [vmem:[%s2701_s14 + $0x530] sm:$0xff]  ;;  %v356_v41 = vld [vmem:[%s2701_s14 + $0x540] sm:$0xff] }
  0xe7   : > { %2308 = vmatpush3.msra.mxu0 %v613_v37  ;;  %2396 = vmatpush3.msra.mxu1 %v614_v32  ;;  %v347_v32 = vld [vmem:[%s2701_s14 + $0x4f8] sm:$0xff] }
  0xe8   : > { %2309 = vmatprep.subr.mxu0 %v612_v42  ;;  %2381 = vmatprep.subr.mxu1 %v613_v37 }
  0xe9   : > { %1170 = vmatmul.mubr.f32.gmra.mxu0 %v255_v43  ;;  %1395 = vmatmul.mubr.f32.gmra.mxu1 %v257_v44  ;;  %v364_v44 = vld [vmem:[%s2701_s14 + $0x580] sm:$0xff] }
  0xea   : > { %1174 = vmatprep.mubr.f32.mxu0 %v265_v45  ;;  %1399 = vmatprep.mubr.f32.mxu1 %v267_v46  ;;  %v366_v45 = vld [vmem:[%s2701_s14 + $0x590] sm:$0xff] }
  0xeb   : > { %2310 = vmatpush3.msra.mxu0 %v612_v42  ;;  %2397 = vmatpush3.msra.mxu1 %v613_v37 }
  0xec   : > { %2311 = vmatprep.subr.mxu0 %v611_v47  ;;  %2382 = vmatprep.subr.mxu1 %v612_v42 }
  0xed   : > { %1175 = vmatmul.mubr.f32.gmra.mxu0 %v264_v48  ;;  %1400 = vmatmul.mubr.f32.gmra.mxu1 %v266_v49  ;;  %v363_v49 = vld [vmem:[%s2701_s14 + $0x578] sm:$0xff] }
  0xee   : > { %1179 = vmatprep.mubr.f32.mxu0 %v274_v50  ;;  %1404 = vmatprep.mubr.f32.mxu1 %v276_v51  ;;  %v365_v50 = vld [vmem:[%s2701_s14 + $0x588] sm:$0xff] }
  0xef   : > { %2312 = vmatpush3.msra.mxu0 %v611_v47  ;;  %2398 = vmatpush3.msra.mxu1 %v612_v42 }
  0xf0   : > { %2313 = vmatprep.subr.mxu0 %v610_v52  ;;  %2383 = vmatprep.subr.mxu1 %v611_v47 }
  0xf1   : > { %1180 = vmatmul.mubr.f32.gmra.mxu0 %v273_v53  ;;  %1405 = vmatmul.mubr.f32.gmra.mxu1 %v275_v54  ;;  %v373_v53 = vld [vmem:[%s2701_s14 + $0x5c8] sm:$0xff]  ;;  %v375_v54 = vld [vmem:[%s2701_s14 + $0x5d8] sm:$0xff] }
  0xf2   : > { %1184 = vmatprep.mubr.f32.mxu0 %v283_v55  ;;  %1409 = vmatprep.mubr.f32.mxu1 %v285_v56 }
  0xf3   : > { %2314 = vmatpush3.msra.mxu0 %v610_v52  ;;  %2399 = vmatpush3.msra.mxu1 %v611_v47 }
  0xf4   : > { %2315 = vmatprep.subr.mxu0 %v609_v57  ;;  %2384 = vmatprep.subr.mxu1 %v610_v52 }
  0xf5   : > { %1185 = vmatmul.mubr.f32.gmra.mxu0 %v282_v58  ;;  %1410 = vmatmul.mubr.f32.gmra.mxu1 %v284_v59  ;;  %v372_v58 = vld [vmem:[%s2701_s14 + $0x5c0] sm:$0xff]  ;;  %v374_v59 = vld [vmem:[%s2701_s14 + $0x5d0] sm:$0xff] }
  0xf6   : > { %1189 = vmatprep.mubr.f32.mxu0 %v292_v60  ;;  %1414 = vmatprep.mubr.f32.mxu1 %v294_v61 }
  0xf7   : > { %2316 = vmatpush3.msra.mxu0 %v609_v57  ;;  %2400 = vmatpush3.msra.mxu1 %v610_v52 }
  0xf8   : > { %2317 = vmatprep.subr.mxu0 %v608_v62  ;;  %2385 = vmatprep.subr.mxu1 %v609_v57 }
  0xf9   : > { %1190 = vmatmul.mubr.f32.gmra.mxu0 %v291_v63  ;;  %1415 = vmatmul.mubr.f32.gmra.mxu1 %v293_v0  ;;  %v384_v63 = vld [vmem:[%s2701_s14 + $0x620] sm:$0xff] }
  0xfa   : > { %1194 = vmatprep.mubr.f32.mxu0 %v301_v1  ;;  %1419 = vmatprep.mubr.f32.mxu1 %v303_v3 }
  0xfb   : > { %2318 = vmatpush3.msra.mxu0 %v608_v62  ;;  %2401 = vmatpush3.msra.mxu1 %v609_v57 }
  0xfc   : > { %2319 = vmatprep.subr.mxu0 %v607_v4  ;;  %2386 = vmatprep.subr.mxu1 %v608_v62 }
  0xfd   : > { %1195 = vmatmul.mubr.f32.gmra.mxu0 %v300_v5  ;;  %1420 = vmatmul.mubr.f32.gmra.mxu1 %v302_v6  ;;  %v383_v5 = vld [vmem:[%s2701_s14 + $0x618] sm:$0xff] }
  0xfe   : > { %1199 = vmatprep.mubr.f32.mxu0 %v310_v7  ;;  %1424 = vmatprep.mubr.f32.mxu1 %v312_v8  ;;  %v391_v8 = vld [vmem:[%s2701_s14 + $0x658] sm:$0xff] }
  0xff   : > { %2320 = vmatpush3.msra.mxu0 %v607_v4  ;;  %2402 = vmatpush3.msra.mxu1 %v608_v62  ;;  %v382_v62 = vld [vmem:[%s2701_s14 + $0x610] sm:$0xff] }
 0x100   : > { %2321 = vmatprep.subr.mxu0 %v606_v9  ;;  %2387 = vmatprep.subr.mxu1 %v607_v4 }
 0x101   : > { %1200 = vmatmul.mubr.f32.gmra.mxu0 %v309_v10  ;;  %1425 = vmatmul.mubr.f32.gmra.mxu1 %v311_v11 }
 0x102   : > { %1204 = vmatprep.mubr.f32.mxu0 %v319_v12  ;;  %1429 = vmatprep.mubr.f32.mxu1 %v321_v13  ;;  %v390_v13 = vld [vmem:[%s2701_s14 + $0x650] sm:$0xff] }
 0x103   : > { %2322 = vmatpush3.msra.mxu0 %v606_v9  ;;  %2403 = vmatpush3.msra.mxu1 %v607_v4  ;;  %v381_v4 = vld [vmem:[%s2701_s14 + $0x608] sm:$0xff] }
 0x104   : > { %2323 = vmatprep.subr.mxu0 %v605_v14  ;;  %2388 = vmatprep.subr.mxu1 %v606_v9 }
 0x105   : > { %1205 = vmatmul.mubr.f32.gmra.mxu0 %v318_v15  ;;  %1430 = vmatmul.mubr.f32.gmra.mxu1 %v320_v16 }
 0x106   : > { %1209 = vmatprep.mubr.f32.mxu0 %v328_v17  ;;  %1434 = vmatprep.mubr.f32.mxu1 %v330_v18  ;;  %v400_v17 = vld [vmem:[%s2701_s14 + $0x6a0] sm:$0xff]  ;;  %v402_v18 = vld [vmem:[%s2701_s14 + $0x6b0] sm:$0xff] }
 0x107   : > { %2324 = vmatpush3.msra.mxu0 %v605_v14  ;;  %2404 = vmatpush3.msra.mxu1 %v606_v9  ;;  %v393_v9 = vld [vmem:[%s2701_s14 + $0x668] sm:$0xff] }
 0x108   : > { %2325 = vmatprep.subr.mxu0 %v604_v19  ;;  %2389 = vmatprep.subr.mxu1 %v605_v14 }
 0x109   : > { %1210 = vmatmul.mubr.f32.gmra.mxu0 %v327_v20  ;;  %1435 = vmatmul.mubr.f32.gmra.mxu1 %v329_v21 }
 0x10a   : > { %1214 = vmatprep.mubr.f32.mxu0 %v337_v22  ;;  %1439 = vmatprep.mubr.f32.mxu1 %v339_v23  ;;  %v399_v22 = vld [vmem:[%s2701_s14 + $0x698] sm:$0xff]  ;;  %v401_v23 = vld [vmem:[%s2701_s14 + $0x6a8] sm:$0xff] }
 0x10b   : > { %2326 = vmatpush3.msra.mxu0 %v604_v19  ;;  %2405 = vmatpush3.msra.mxu1 %v605_v14  ;;  %v392_v14 = vld [vmem:[%s2701_s14 + $0x660] sm:$0xff] }
 0x10c   : > { %2390 = vmatprep.subr.mxu1 %v604_v19 }
 0x10d   : > { %v686_v28 = vpop.f32.mrf.mxu0  ;;  %v911_v29 = vpop.f32.mrf.mxu1  ;;  %1215 = vmatmul.mubr.f32.gmra.mxu0 %v336_v24  ;;  %1440 = vmatmul.mubr.f32.gmra.mxu1 %v338_v25 }
 0x10e   : > { %v3223_v30 = vadd.f32 %v911_v29, %v686_v28  ;;  %1219 = vmatprep.mubr.f32.mxu0 %v346_v26  ;;  %1444 = vmatprep.mubr.f32.mxu1 %v348_v27  ;;  %v409_v26 = vld [vmem:[%s2701_s14 + $0x6e8] sm:$0xff]  ;;  %v411_v27 = vld [vmem:[%s2701_s14 + $0x6f8] sm:$0xff] }
 0x10f   : > { %v688_v33 = vpop.f32.mrf.mxu0  ;;  %v913_v34 = vpop.f32.mrf.mxu1  ;;  %2406 = vmatpush3.msra.mxu1 %v604_v19 }
 0x110   : > { %v410_v33 = vld [vmem:[%s2701_s14 + $0x6f0] sm:$0xff] }
 0x111   : > { %v691_v37 = vpop.f32.mrf.mxu0  ;;  %v916_v38 = vpop.f32.mrf.mxu1  ;;  %1220 = vmatmul.mubr.f32.gmra.mxu0 %v345_v31  ;;  %1445 = vmatmul.mubr.f32.gmra.mxu1 %v347_v32  ;;  %v408_v32 = vld [vmem:[%s2701_s14 + $0x6e0] sm:$0xff] }
 0x112   : > { %v3229_v39 = vadd.f32 %v916_v38, %v691_v37  ;;  %1224 = vmatprep.mubr.f32.mxu0 %v355_v35  ;;  %1449 = vmatprep.mubr.f32.mxu1 %v357_v36  ;;  %v418_v36 = vld [vmem:[%s2701_s14 + $0x730] sm:$0xff]  ;;  %v420_v37 = vld [vmem:[%s2701_s14 + $0x740] sm:$0xff] }
 0x113   : > { %v693_v42 = vpop.f32.mrf.mxu0  ;;  %v918_v43 = vpop.f32.mrf.mxu1 }
 0x114   : > { %v417_v42 = vld [vmem:[%s2701_s14 + $0x728] sm:$0xff]  ;;  %v419_v43 = vld [vmem:[%s2701_s14 + $0x738] sm:$0xff] }
 0x115   : > { %v696_v46 = vpop.f32.mrf.mxu0  ;;  %v921_v47 = vpop.f32.mrf.mxu1  ;;  %1225 = vmatmul.mubr.f32.gmra.mxu0 %v354_v40  ;;  %1450 = vmatmul.mubr.f32.gmra.mxu1 %v356_v41 }
 0x116   : > { %v3235_v48 = vadd.f32 %v921_v47, %v696_v46  ;;  %1229 = vmatprep.mubr.f32.mxu0 %v364_v44  ;;  %1454 = vmatprep.mubr.f32.mxu1 %v366_v45  ;;  %v427_v46 = vld [vmem:[%s2701_s14 + $0x778] sm:$0xff]  ;;  %v429_v47 = vld [vmem:[%s2701_s14 + $0x788] sm:$0xff] }
 0x117   : > { %v698_v51 = vpop.f32.mrf.mxu0  ;;  %v923_v52 = vpop.f32.mrf.mxu1 }
 0x118   : > { %v426_v52 = vld [vmem:[%s2701_s14 + $0x770] sm:$0xff] }
 0x119   : > { %v701_v55 = vpop.f32.mrf.mxu0  ;;  %v926_v56 = vpop.f32.mrf.mxu1  ;;  %1230 = vmatmul.mubr.f32.gmra.mxu0 %v363_v49  ;;  %1455 = vmatmul.mubr.f32.gmra.mxu1 %v365_v50 }
 0x11a   : > { %v3241_v57 = vadd.f32 %v926_v56, %v701_v55  ;;  %1234 = vmatprep.mubr.f32.mxu0 %v373_v53  ;;  %1459 = vmatprep.mubr.f32.mxu1 %v375_v54  ;;  %v428_v53 = vld [vmem:[%s2701_s14 + $0x780] sm:$0xff] }
 0x11b   : > { %v703_v60 = vpop.f32.mrf.mxu0  ;;  %v928_v61 = vpop.f32.mrf.mxu1  ;;  %v436_v56 = vld [vmem:[%s2701_s14 + $0x7c0] sm:$0xff] }
 0x11d   : > { %v706_v0 = vpop.f32.mrf.mxu0  ;;  %v931_v1 = vpop.f32.mrf.mxu1  ;;  %1235 = vmatmul.mubr.f32.gmra.mxu0 %v372_v58  ;;  %1460 = vmatmul.mubr.f32.gmra.mxu1 %v374_v59  ;;  %v438_v58 = vld [vmem:[%s2701_s14 + $0x7d0] sm:$0xff] }
 0x11e   : > { %v3247_v3 = vadd.f32 %v931_v1, %v706_v0  ;;  %1239 = vmatprep.mubr.f32.mxu0 %v382_v62  ;;  %1464 = vmatprep.mubr.f32.mxu1 %v384_v63  ;;  %v435_v62 = vld [vmem:[%s2701_s14 + $0x7b8] sm:$0xff]  ;;  %v437_v63 = vld [vmem:[%s2701_s14 + $0x7c8] sm:$0xff] }
 0x11f   : > { %v708_v6 = vpop.f32.mrf.mxu0  ;;  %v933_v7 = vpop.f32.mrf.mxu1 }
 0x121   : > { %v711_v10 = vpop.f32.mrf.mxu0  ;;  %v936_v11 = vpop.f32.mrf.mxu1  ;;  %1240 = vmatmul.mubr.f32.gmra.mxu0 %v381_v4  ;;  %1465 = vmatmul.mubr.f32.gmra.mxu1 %v383_v5  ;;  %v445_v4 = vld [vmem:[%s2701_s14 + $0x808] sm:$0xff]  ;;  %v447_v5 = vld [vmem:[%s2701_s14 + $0x818] sm:$0xff] }
 0x122   : > { %v3253_v12 = vadd.f32 %v936_v11, %v711_v10  ;;  %1244 = vmatprep.mubr.f32.mxu0 %v391_v8  ;;  %1469 = vmatprep.mubr.f32.mxu1 %v393_v9  ;;  %v444_v9 = vld [vmem:[%s2701_s14 + $0x800] sm:$0xff]  ;;  %v446_v10 = vld [vmem:[%s2701_s14 + $0x810] sm:$0xff] }
 0x123   : > { %v713_v15 = vpop.f32.mrf.mxu0  ;;  %v938_v16 = vpop.f32.mrf.mxu1 }
 0x124   : > { %v456_v15 = vld [vmem:[%s2701_s14 + $0x860] sm:$0xff] }
 0x125   : > { %v716_v19 = vpop.f32.mrf.mxu0  ;;  %v941_v20 = vpop.f32.mrf.mxu1  ;;  %1245 = vmatmul.mubr.f32.gmra.mxu0 %v390_v13  ;;  %1470 = vmatmul.mubr.f32.gmra.mxu1 %v392_v14  ;;  %v454_v14 = vld [vmem:[%s2701_s14 + $0x850] sm:$0xff] }
 0x126   : > { %v3259_v21 = vadd.f32 %v941_v20, %v716_v19  ;;  %1249 = vmatprep.mubr.f32.mxu0 %v400_v17  ;;  %1474 = vmatprep.mubr.f32.mxu1 %v402_v18  ;;  %v453_v19 = vld [vmem:[%s2701_s14 + $0x848] sm:$0xff]  ;;  %v455_v20 = vld [vmem:[%s2701_s14 + $0x858] sm:$0xff] }
 0x127   : > { %v718_v24 = vpop.f32.mrf.mxu0  ;;  %v943_v25 = vpop.f32.mrf.mxu1 }
 0x128   : > { %v463_v24 = vld [vmem:[%s2701_s14 + $0x898] sm:$0xff]  ;;  %v465_v25 = vld [vmem:[%s2701_s14 + $0x8a8] sm:$0xff] }
 0x129   : > { %v721_v28 = vpop.f32.mrf.mxu0  ;;  %v946_v29 = vpop.f32.mrf.mxu1  ;;  %1250 = vmatmul.mubr.f32.gmra.mxu0 %v399_v22  ;;  %1475 = vmatmul.mubr.f32.gmra.mxu1 %v401_v23 }
 0x12a   : > { %v3265_v31 = vadd.f32 %v946_v29, %v721_v28  ;;  %1254 = vmatprep.mubr.f32.mxu0 %v409_v26  ;;  %1479 = vmatprep.mubr.f32.mxu1 %v411_v27  ;;  %v462_v29 = vld [vmem:[%s2701_s14 + $0x890] sm:$0xff] }
 0x12b   : > { %v723_v34 = vpop.f32.mrf.mxu0  ;;  %v948_v35 = vpop.f32.mrf.mxu1 }
 0x12c   : > { %v472_v35 = vld [vmem:[%s2701_s14 + $0x8e0] sm:$0xff] }
 0x12d   : > { %v726_v38 = vpop.f32.mrf.mxu0  ;;  %v951_v40 = vpop.f32.mrf.mxu1  ;;  %1255 = vmatmul.mubr.f32.gmra.mxu0 %v408_v32  ;;  %1480 = vmatmul.mubr.f32.gmra.mxu1 %v410_v33  ;;  %v464_v32 = vld [vmem:[%s2701_s14 + $0x8a0] sm:$0xff] }
 0x12e   : > { %v3271_v41 = vadd.f32 %v951_v40, %v726_v38  ;;  %1259 = vmatprep.mubr.f32.mxu0 %v418_v36  ;;  %1484 = vmatprep.mubr.f32.mxu1 %v420_v37  ;;  %v474_v36 = vld [vmem:[%s2701_s14 + $0x8f0] sm:$0xff] }
 0x12f   : > { %v728_v44 = vpop.f32.mrf.mxu0  ;;  %v953_v45 = vpop.f32.mrf.mxu1 }
 0x131   : > { %v731_v49 = vpop.f32.mrf.mxu0  ;;  %v956_v50 = vpop.f32.mrf.mxu1  ;;  %1260 = vmatmul.mubr.f32.gmra.mxu0 %v417_v42  ;;  %1485 = vmatmul.mubr.f32.gmra.mxu1 %v419_v43  ;;  %v471_v42 = vld [vmem:[%s2701_s14 + $0x8d8] sm:$0xff]  ;;  %v473_v43 = vld [vmem:[%s2701_s14 + $0x8e8] sm:$0xff] }
 0x132   : > { %v3277_v51 = vadd.f32 %v956_v50, %v731_v49  ;;  %1264 = vmatprep.mubr.f32.mxu0 %v427_v46  ;;  %1489 = vmatprep.mubr.f32.mxu1 %v429_v47  ;;  %v196_v46 = vld [vmem:[%s2701_s14 + $0x40] sm:$0xff] }
 0x133   : > { %v733_v54 = vpop.f32.mrf.mxu0  ;;  %v958_v55 = vpop.f32.mrf.mxu1  ;;  %v340_v47 = vld [vmem:[%s2701_s14 + $0x4c0] sm:$0xff] }
 0x134   : > { %v349_v54 = vld [vmem:[%s2701_s14 + $0x508] sm:$0xff] }
 0x135   : > { %v736_v59 = vpop.f32.mrf.mxu0  ;;  %v961_v60 = vpop.f32.mrf.mxu1  ;;  %1265 = vmatmul.mubr.f32.gmra.mxu0 %v426_v52  ;;  %1490 = vmatmul.mubr.f32.gmra.mxu1 %v428_v53  ;;  %v205_v53 = vld [vmem:[%s2701_s14 + $0x88] sm:$0xff] }
 0x136   : > { %v3283_v61 = vadd.f32 %v961_v60, %v736_v59  ;;  %1269 = vmatprep.mubr.f32.mxu0 %v436_v56  ;;  %1494 = vmatprep.mubr.f32.mxu1 %v438_v58  ;;  %v214_v58 = vld [vmem:[%s2701_s14 + $0xd0] sm:$0xff] }
 0x137   : > { %v738_v0 = vpop.f32.mrf.mxu0  ;;  %v963_v1 = vpop.f32.mrf.mxu1  ;;  %v358_v59 = vld [vmem:[%s2701_s14 + $0x550] sm:$0xff] }
 0x138   : > { %v223_v0 = vld [vmem:[%s2701_s14 + $0x118] sm:$0xff] }
 0x139   : > { %v741_v6 = vpop.f32.mrf.mxu0  ;;  %v966_v7 = vpop.f32.mrf.mxu1  ;;  %1270 = vmatmul.mubr.f32.gmra.mxu0 %v435_v62  ;;  %1495 = vmatmul.mubr.f32.gmra.mxu1 %v437_v63  ;;  %v367_v1 = vld [vmem:[%s2701_s14 + $0x598] sm:$0xff] }
 0x13a   : > { %v3289_v8 = vadd.f32 %v966_v7, %v741_v6  ;;  %1274 = vmatprep.mubr.f32.mxu0 %v445_v4  ;;  %1499 = vmatprep.mubr.f32.mxu1 %v447_v5  ;;  %v232_v6 = vld [vmem:[%s2701_s14 + $0x160] sm:$0xff] }
 0x13b   : > { %v743_v11 = vpop.f32.mrf.mxu0  ;;  %v968_v13 = vpop.f32.mrf.mxu1  ;;  %v376_v7 = vld [vmem:[%s2701_s14 + $0x5e0] sm:$0xff] }
 0x13c   : > { %v241_v13 = vld [vmem:[%s2701_s14 + $0x1a8] sm:$0xff] }
 0x13d   : > { %v746_v16 = vpop.f32.mrf.mxu0  ;;  %v971_v17 = vpop.f32.mrf.mxu1  ;;  %1275 = vmatmul.mubr.f32.gmra.mxu0 %v444_v9  ;;  %1500 = vmatmul.mubr.f32.gmra.mxu1 %v446_v10 }
 0x13e   : > { %v3295_v18 = vadd.f32 %v971_v17, %v746_v16  ;;  %1279 = vmatprep.mubr.f32.mxu0 %v454_v14  ;;  %1504 = vmatprep.mubr.f32.mxu1 %v456_v15  ;;  %v385_v14 = vld [vmem:[%s2701_s14 + $0x628] sm:$0xff]  ;;  %v250_v17 = vld [vmem:[%s2701_s14 + $0x1f0] sm:$0xff] }
 0x13f   : > { %v748_v22 = vpop.f32.mrf.mxu0  ;;  %v973_v23 = vpop.f32.mrf.mxu1 }
 0x141   : > { %v751_v26 = vpop.f32.mrf.mxu0  ;;  %v976_v27 = vpop.f32.mrf.mxu1  ;;  %1280 = vmatmul.mubr.f32.gmra.mxu0 %v453_v19  ;;  %1505 = vmatmul.mubr.f32.gmra.mxu1 %v455_v20  ;;  %v394_v19 = vld [vmem:[%s2701_s14 + $0x670] sm:$0xff] }
 0x142   : > { %v3301_v28 = vadd.f32 %v976_v27, %v751_v26  ;;  %1284 = vmatprep.mubr.f32.mxu0 %v463_v24  ;;  %1509 = vmatprep.mubr.f32.mxu1 %v465_v25  ;;  %v259_v24 = vld [vmem:[%s2701_s14 + $0x238] sm:$0xff] }
 0x143   : > { %v753_v33 = vpop.f32.mrf.mxu0  ;;  %v978_v34 = vpop.f32.mrf.mxu1  ;;  %v403_v25 = vld [vmem:[%s2701_s14 + $0x6b8] sm:$0xff] }
 0x145   : > { %v756_v37 = vpop.f32.mrf.mxu0  ;;  %v981_v38 = vpop.f32.mrf.mxu1  ;;  %1285 = vmatmul.mubr.f32.gmra.mxu0 %v462_v29  ;;  %1510 = vmatmul.mubr.f32.gmra.mxu1 %v464_v32  ;;  %v268_v29 = vld [vmem:[%s2701_s14 + $0x280] sm:$0xff] }
 0x146   : > { %v3307_v40 = vadd.f32 %v981_v38, %v756_v37  ;;  %1289 = vmatprep.mubr.f32.mxu0 %v472_v35  ;;  %1514 = vmatprep.mubr.f32.mxu1 %v474_v36  ;;  %v412_v32 = vld [vmem:[%s2701_s14 + $0x700] sm:$0xff]  ;;  %v277_v36 = vld [vmem:[%s2701_s14 + $0x2c8] sm:$0xff] }
 0x147   : > { %v758_v44 = vpop.f32.mrf.mxu0  ;;  %v983_v45 = vpop.f32.mrf.mxu1  ;;  %v421_v37 = vld [vmem:[%s2701_s14 + $0x748] sm:$0xff] }
 0x148   : > { %v430_v44 = vld [vmem:[%s2701_s14 + $0x790] sm:$0xff] }
 0x149   : > { %v761_v49 = vpop.f32.mrf.mxu0  ;;  %v986_v50 = vpop.f32.mrf.mxu1  ;;  %1290 = vmatmul.mubr.f32.gmra.mxu0 %v471_v42  ;;  %1515 = vmatmul.mubr.f32.gmra.mxu1 %v473_v43  ;;  %v286_v43 = vld [vmem:[%s2701_s14 + $0x310] sm:$0xff] }
 0x14a   : > { %v3313_v52 = vadd.f32 %v986_v50, %v761_v49  ;;  %2327 = vmatprep.mubr.f32.mxu0 %v196_v46  ;;  %2351 = vmatprep.mubr.f32.mxu1 %v340_v47  ;;  %v295_v49 = vld [vmem:[%s2701_s14 + $0x358] sm:$0xff] }
 0x14b   : > { %v763_v55 = vpop.f32.mrf.mxu0  ;;  %v988_v56 = vpop.f32.mrf.mxu1  ;;  %v439_v50 = vld [vmem:[%s2701_s14 + $0x7d8] sm:$0xff] }
 0x14c   : > { %v304_v55 = vld [vmem:[%s2701_s14 + $0x3a0] sm:$0xff] }
 0x14d   : > { %v766_v60 = vpop.f32.mrf.mxu0  ;;  %v991_v62 = vpop.f32.mrf.mxu1  ;;  %2328 = vmatmul.mubr.f32.vlgmr.msra.gmra.mxu0 %v205_v53  ;;  %2352 = vmatmul.mubr.f32.vlgmr.msra.gmra.mxu1 %v349_v54  ;;  %v448_v56 = vld [vmem:[%s2701_s14 + $0x820] sm:$0xff] }
 0x14e   : > { %v3319_v63 = vadd.f32 %v991_v62, %v766_v60  ;;  %2330 = vmatprep.mubr.f32.mxu0 %v214_v58  ;;  %2354 = vmatprep.mubr.f32.mxu1 %v358_v59  ;;  %v313_v62 = vld [vmem:[%s2701_s14 + $0x3e8] sm:$0xff] }
 0x14f   : > { %v768_v4 = vpop.f32.mrf.mxu0  ;;  %v993_v5 = vpop.f32.mrf.mxu1 }
 0x150   : > { %v322_v5 = vld [vmem:[%s2701_s14 + $0x430] sm:$0xff] }
 0x151   : > { %v771_v9 = vpop.f32.mrf.mxu0  ;;  %v996_v10 = vpop.f32.mrf.mxu1  ;;  %2331 = vmatmul.mubr.f32.gmra.mxu0 %v223_v0  ;;  %2355 = vmatmul.mubr.f32.gmra.mxu1 %v367_v1  ;;  %v457_v0 = vld [vmem:[%s2701_s14 + $0x868] sm:$0xff] }
 0x152   : > { %v3325_v11 = vadd.f32 %v996_v10, %v771_v9  ;;  %2333 = vmatprep.mubr.f32.mxu0 %v232_v6  ;;  %2357 = vmatprep.mubr.f32.mxu1 %v376_v7  ;;  %v466_v6 = vld [vmem:[%s2701_s14 + $0x8b0] sm:$0xff] }
 0x153   : > { %v773_v15 = vpop.f32.mrf.mxu0  ;;  %v998_v16 = vpop.f32.mrf.mxu1 }
 0x155   : > { %v776_v20 = vpop.f32.mrf.mxu0  ;;  %v1001_v22 = vpop.f32.mrf.mxu1  ;;  %2334 = vmatmul.mubr.f32.gmra.mxu0 %v241_v13  ;;  %2358 = vmatmul.mubr.f32.gmra.mxu1 %v385_v14  ;;  %v331_v13 = vld [vmem:[%s2701_s14 + $0x478] sm:$0xff] }
 0x156   : > { %v3331_v23 = vadd.f32 %v1001_v22, %v776_v20  ;;  %2336 = vmatprep.mubr.f32.mxu0 %v250_v17  ;;  %2360 = vmatprep.mubr.f32.mxu1 %v394_v19  ;;  %v475_v14 = vld [vmem:[%s2701_s14 + $0x8f8] sm:$0xff]  ;;  %s2212_s14 = sshll.u32 %s2452_s13, 8  ;;  %s3966_s13 = smov (!%p184_p4, %s2452_s13), 1 }
 0x157   : > { %v778_v26 = vpop.f32.mrf.mxu0  ;;  %v1003_v27 = vpop.f32.mrf.mxu1  ;;  %s2211_s25 = sshll.u32 %s3966_s13, 3 }
 0x158   : > { %s187_s28 = scalar_lea.vmem %s3901_s3, %s2211_s25 }
 0x159   : > { %v781_v33 = vpop.f32.mrf.mxu0  ;;  %v1006_v34 = vpop.f32.mrf.mxu1  ;;  %2337 = vmatmul.mubr.f32.gmra.mxu0 %v259_v24  ;;  %2361 = vmatmul.mubr.f32.gmra.mxu1 %v403_v25 }
 0x15a   : > { %v3337_v35 = vadd.f32 %v1006_v34, %v781_v33  ;;  %2339 = vmatprep.mubr.f32.mxu0 %v268_v29  ;;  %2363 = vmatprep.mubr.f32.mxu1 %v412_v32 }
 0x15b   : > { %v783_v38 = vpop.f32.mrf.mxu0  ;;  %v1008_v42 = vpop.f32.mrf.mxu1 }
 0x15d   : > { %v786_v45 = vpop.f32.mrf.mxu0  ;;  %v1011_v46 = vpop.f32.mrf.mxu1  ;;  %2340 = vmatmul.mubr.f32.gmra.mxu0 %v277_v36  ;;  %2364 = vmatmul.mubr.f32.gmra.mxu1 %v421_v37 }
 0x15e   : > { %v3343_v47 = vadd.f32 %v1011_v46, %v786_v45  ;;  %2342 = vmatprep.mubr.f32.mxu0 %v286_v43  ;;  %2366 = vmatprep.mubr.f32.mxu1 %v430_v44 }
 0x15f   : > { %v788_v53 = vpop.f32.mrf.mxu0  ;;  %v1013_v54 = vpop.f32.mrf.mxu1 }
 0x161   : > { %v791_v58 = vpop.f32.mrf.mxu0  ;;  %v1016_v59 = vpop.f32.mrf.mxu1  ;;  %2343 = vmatmul.mubr.f32.gmra.mxu0 %v295_v49  ;;  %2367 = vmatmul.mubr.f32.gmra.mxu1 %v439_v50 }
 0x162   : > { %v3349_v60 = vadd.f32 %v1016_v59, %v791_v58  ;;  %2345 = vmatprep.mubr.f32.mxu0 %v304_v55  ;;  %2369 = vmatprep.mubr.f32.mxu1 %v448_v56 }
 0x163   : > { %v793_v1 = vpop.f32.mrf.mxu0  ;;  %v1018_v4 = vpop.f32.mrf.mxu1 }
 0x165   : > { %v796_v7 = vpop.f32.mrf.mxu0  ;;  %v1021_v9 = vpop.f32.mrf.mxu1  ;;  %2346 = vmatmul.mubr.f32.gmra.mxu0 %v313_v62  ;;  %2370 = vmatmul.mubr.f32.gmra.mxu1 %v457_v0 }
 0x166   : > { %v3355_v10 = vadd.f32 %v1021_v9, %v796_v7  ;;  %2348 = vmatprep.mubr.f32.mxu0 %v322_v5  ;;  %2372 = vmatprep.mubr.f32.mxu1 %v466_v6 }
 0x167   : > { %v798_v15 = vpop.f32.mrf.mxu0  ;;  %v1023_v16 = vpop.f32.mrf.mxu1 }
 0x169   : > { %v801_v17 = vpop.f32.mrf.mxu0  ;;  %v1026_v19 = vpop.f32.mrf.mxu1  ;;  %2349 = vmatmul.mubr.f32.gmra.mxu0 %v331_v13  ;;  %2373 = vmatmul.mubr.f32.gmra.mxu1 %v475_v14 }
 0x16a   : > { %v3359_v20 = vadd.f32 %v1026_v19, %v801_v17 }
 0x16b   : > { %v803_v22 = vpop.f32.mrf.mxu0  ;;  %v1028_v24 = vpop.f32.mrf.mxu1 }
 0x16d   : > { %v806_v25 = vpop.f32.mrf.mxu0  ;;  %v1031_v26 = vpop.f32.mrf.mxu1 }
 0x16e   : > { %v3361_v27 = vadd.f32 %v1031_v26, %v806_v25 }
 0x16f   : > { %v808_v29 = vpop.f32.mrf.mxu0  ;;  %v1033_v32 = vpop.f32.mrf.mxu1 }
 0x171   : > { %v811_v33 = vpop.f32.mrf.mxu0  ;;  %v1036_v34 = vpop.f32.mrf.mxu1 }
 0x172   : > { %v3363_v36 = vadd.f32 %v1036_v34, %v811_v33 }
 0x173   : > { %v813_v37 = vpop.f32.mrf.mxu0  ;;  %v1038_v38 = vpop.f32.mrf.mxu1 }
 0x175   : > { %v816_v42 = vpop.f32.mrf.mxu0  ;;  %v1041_v43 = vpop.f32.mrf.mxu1 }
 0x176   : > { %v3365_v44 = vadd.f32 %v1041_v43, %v816_v42 }
 0x177   : > { %v818_v45 = vpop.f32.mrf.mxu0  ;;  %v1043_v46 = vpop.f32.mrf.mxu1 }
 0x178   : > { %3908 = vst [vmem:[#allocation2_spill] sm:$0xff] %v3365_v44 }
 0x179   : > { %v821_v49 = vpop.f32.mrf.mxu0  ;;  %v1046_v50 = vpop.f32.mrf.mxu1 }
 0x17a   : > { %v3367_v53 = vadd.f32 %v1046_v50, %v821_v49 }
 0x17b   : > { %v823_v54 = vpop.f32.mrf.mxu0  ;;  %v1048_v55 = vpop.f32.mrf.mxu1 }
 0x17d   : > { %v826_v56 = vpop.f32.mrf.mxu0  ;;  %v1051_v58 = vpop.f32.mrf.mxu1 }
 0x17e   : > { %v3369_v59 = vadd.f32 %v1051_v58, %v826_v56 }
 0x17f   : > { %v828_v62 = vpop.f32.mrf.mxu0  ;;  %v1053_v0 = vpop.f32.mrf.mxu1 }
 0x180   : > { %3909 = vst [vmem:[#allocation3_spill] sm:$0xff] %v3369_v59 }
 0x181   : > { %v831_v1 = vpop.f32.mrf.mxu0  ;;  %v1056_v4 = vpop.f32.mrf.mxu1 }
 0x182   : > { %v3371_v5 = vadd.f32 %v1056_v4, %v831_v1 }
 0x183   : > { %v833_v6 = vpop.f32.mrf.mxu0  ;;  %v1058_v7 = vpop.f32.mrf.mxu1 }
 0x184   : > { %3910 = vst [vmem:[#allocation4_spill] sm:$0xff] %v3371_v5 }
 0x185   : > { %v836_v9 = vpop.f32.mrf.mxu0  ;;  %v1061_v13 = vpop.f32.mrf.mxu1 }
 0x186   : > { %v3373_v14 = vadd.f32 %v1061_v13, %v836_v9 }
 0x187   : > { %v838_v15 = vpop.f32.mrf.mxu0  ;;  %v1063_v16 = vpop.f32.mrf.mxu1 }
 0x188   : > { %3911 = vst [vmem:[#allocation5_spill] sm:$0xff] %v3373_v14 }
 0x189   : > { %v841_v17 = vpop.f32.mrf.mxu0  ;;  %v1066_v19 = vpop.f32.mrf.mxu1 }
 0x18a   : > { %v3375_v22 = vadd.f32 %v1066_v19, %v841_v17 }
 0x18b   : > { %v843_v24 = vpop.f32.mrf.mxu0  ;;  %v1068_v25 = vpop.f32.mrf.mxu1 }
 0x18c   : > { %3912 = vst [vmem:[#allocation6_spill] sm:$0xff] %v3375_v22 }
 0x18d   : > { %v1136_v26 = vpop.f32.mrf.mxu0  ;;  %v1361_v29 = vpop.f32.mrf.mxu1 }
 0x18e   : > { %v1137_v32 = vadd.f32 %v1136_v26, %v3223_v30 }
 0x18f   : > { %v1138_v33 = vpop.f32.mrf.mxu0  ;;  %v1363_v34 = vpop.f32.mrf.mxu1 }
 0x190   : > { %v3378_v37 = vadd.f32 %v1361_v29, %v1137_v32 }
 0x191   : > { %v1141_v38 = vpop.f32.mrf.mxu0  ;;  %v1366_v42 = vpop.f32.mrf.mxu1 }
 0x192   : > { %v1142_v43 = vadd.f32 %v1141_v38, %v3229_v39 }
 0x193   : > { %v1143_v45 = vpop.f32.mrf.mxu0  ;;  %v1368_v46 = vpop.f32.mrf.mxu1 }
 0x194   : > { %v3381_v49 = vadd.f32 %v1366_v42, %v1142_v43 }
 0x195   : > { %v1146_v50 = vpop.f32.mrf.mxu0  ;;  %v1371_v54 = vpop.f32.mrf.mxu1 }
 0x196   : > { %v1147_v55 = vadd.f32 %v1146_v50, %v3235_v48 }
 0x197   : > { %v1148_v56 = vpop.f32.mrf.mxu0  ;;  %v1373_v58 = vpop.f32.mrf.mxu1 }
 0x198   : > { %v3384_v62 = vadd.f32 %v1371_v54, %v1147_v55 }
 0x199   : > { %v1151_v30 = vpop.f32.mrf.mxu0  ;;  %v1376_v0 = vpop.f32.mrf.mxu1 }
 0x19a   : > { %v1152_v1 = vadd.f32 %v1151_v30, %v3241_v57 }
 0x19b   : > { %v1153_v4 = vpop.f32.mrf.mxu0  ;;  %v1378_v6 = vpop.f32.mrf.mxu1 }
 0x19c   : > { %v3387_v7 = vadd.f32 %v1376_v0, %v1152_v1 }
 0x19d   : > { %v1156_v39 = vpop.f32.mrf.mxu0  ;;  %v1381_v9 = vpop.f32.mrf.mxu1 }
 0x19e   : > { %v1157_v13 = vadd.f32 %v1156_v39, %v3247_v3 }
 0x19f   : > { %v1158_v15 = vpop.f32.mrf.mxu0  ;;  %v1383_v16 = vpop.f32.mrf.mxu1 }
 0x1a0   : > { %v3390_v17 = vadd.f32 %v1381_v9, %v1157_v13 }
 0x1a1   : > { %v1161_v48 = vpop.f32.mrf.mxu0  ;;  %v1386_v19 = vpop.f32.mrf.mxu1 }
 0x1a2   : > { %v1162_v24 = vadd.f32 %v1161_v48, %v3253_v12 }
 0x1a3   : > { %v1163_v25 = vpop.f32.mrf.mxu0  ;;  %v1388_v26 = vpop.f32.mrf.mxu1 }
 0x1a4   : > { %v3393_v29 = vadd.f32 %v1386_v19, %v1162_v24 }
 0x1a5   : > { %v1166_v57 = vpop.f32.mrf.mxu0  ;;  %v1391_v32 = vpop.f32.mrf.mxu1 }
 0x1a6   : > { %v1167_v33 = vadd.f32 %v1166_v57, %v3259_v21 }
 0x1a7   : > { %v1168_v34 = vpop.f32.mrf.mxu0  ;;  %v1393_v38 = vpop.f32.mrf.mxu1 }
 0x1a8   : > { %v3396_v42 = vadd.f32 %v1391_v32, %v1167_v33 }
 0x1a9   : > { %v1171_v3 = vpop.f32.mrf.mxu0  ;;  %v1396_v43 = vpop.f32.mrf.mxu1 }
 0x1aa   : > { %v1172_v45 = vadd.f32 %v1171_v3, %v3265_v31 }
 0x1ab   : > { %v1173_v46 = vpop.f32.mrf.mxu0  ;;  %v1398_v50 = vpop.f32.mrf.mxu1 }
 0x1ac   : > { %v3399_v54 = vadd.f32 %v1396_v43, %v1172_v45 }
 0x1ad   : > { %v1176_v12 = vpop.f32.mrf.mxu0  ;;  %v1401_v55 = vpop.f32.mrf.mxu1 }
 0x1ae   : > { %v1177_v56 = vadd.f32 %v1176_v12, %v3271_v41 }
 0x1af   : > { %v1178_v58 = vpop.f32.mrf.mxu0  ;;  %v1403_v30 = vpop.f32.mrf.mxu1 }
 0x1b0   : > { %v3402_v0 = vadd.f32 %v1401_v55, %v1177_v56 }
 0x1b1   : > { %v1181_v21 = vpop.f32.mrf.mxu0  ;;  %v1406_v1 = vpop.f32.mrf.mxu1 }
 0x1b2   : > { %3913 = vst [vmem:[#allocation7_spill] sm:$0xff] %v3402_v0  ;;  %v1182_v4 = vadd.f32 %v1181_v21, %v3277_v51 }
 0x1b3   : > { %v1183_v6 = vpop.f32.mrf.mxu0  ;;  %v1408_v39 = vpop.f32.mrf.mxu1 }
 0x1b4   : > { %v3405_v9 = vadd.f32 %v1406_v1, %v1182_v4 }
 0x1b5   : > { %v1186_v31 = vpop.f32.mrf.mxu0  ;;  %v1411_v13 = vpop.f32.mrf.mxu1 }
 0x1b6   : > { %v1187_v15 = vadd.f32 %v1186_v31, %v3283_v61 }
 0x1b7   : > { %v1188_v16 = vpop.f32.mrf.mxu0  ;;  %v1413_v48 = vpop.f32.mrf.mxu1 }
 0x1b8   : > { %v3408_v19 = vadd.f32 %v1411_v13, %v1187_v15 }
 0x1b9   : > { %v1191_v41 = vpop.f32.mrf.mxu0  ;;  %v1416_v24 = vpop.f32.mrf.mxu1 }
 0x1ba   : > { %3914 = vst [vmem:[#allocation8_spill] sm:$0xff] %v3408_v19  ;;  %v1192_v25 = vadd.f32 %v1191_v41, %v3289_v8 }
 0x1bb   : > { %v1193_v26 = vpop.f32.mrf.mxu0  ;;  %v1418_v57 = vpop.f32.mrf.mxu1 }
 0x1bc   : > { %v3411_v32 = vadd.f32 %v1416_v24, %v1192_v25 }
 0x1bd   : > { %v1196_v51 = vpop.f32.mrf.mxu0  ;;  %v1421_v33 = vpop.f32.mrf.mxu1 }
 0x1be   : > { %3915 = vst [vmem:[#allocation9_spill] sm:$0xff] %v3411_v32  ;;  %v1197_v34 = vadd.f32 %v1196_v51, %v3295_v18 }
 0x1bf   : > { %v1198_v38 = vpop.f32.mrf.mxu0  ;;  %v1423_v3 = vpop.f32.mrf.mxu1 }
 0x1c0   : > { %v3414_v43 = vadd.f32 %v1421_v33, %v1197_v34 }
 0x1c1   : > { %v1201_v61 = vpop.f32.mrf.mxu0  ;;  %v1426_v45 = vpop.f32.mrf.mxu1 }
 0x1c2   : > { %3916 = vst [vmem:[#allocation10_spill] sm:$0xff] %v3414_v43  ;;  %v1202_v46 = vadd.f32 %v1201_v61, %v3301_v28 }
 0x1c3   : > { %v1203_v50 = vpop.f32.mrf.mxu0  ;;  %v1428_v12 = vpop.f32.mrf.mxu1 }
 0x1c4   : > { %v3417_v55 = vadd.f32 %v1426_v45, %v1202_v46 }
 0x1c5   : > { %v1206_v8 = vpop.f32.mrf.mxu0  ;;  %v1431_v56 = vpop.f32.mrf.mxu1 }
 0x1c6   : > { %3917 = vst [vmem:[#allocation11_spill] sm:$0xff] %v3417_v55  ;;  %v1207_v58 = vadd.f32 %v1206_v8, %v3307_v40 }
 0x1c7   : > { %v1208_v30 = vpop.f32.mrf.mxu0  ;;  %v1433_v21 = vpop.f32.mrf.mxu1 }
 0x1c8   : > { %v3420_v1 = vadd.f32 %v1431_v56, %v1207_v58 }
 0x1c9   : > { %v1211_v18 = vpop.f32.mrf.mxu0  ;;  %v1436_v4 = vpop.f32.mrf.mxu1 }
 0x1ca   : > { %3918 = vst [vmem:[#allocation12_spill] sm:$0xff] %v3420_v1  ;;  %v1212_v6 = vadd.f32 %v1211_v18, %v3313_v52 }
 0x1cb   : > { %v1213_v39 = vpop.f32.mrf.mxu0  ;;  %v1438_v31 = vpop.f32.mrf.mxu1 }
 0x1cc   : > { %v3423_v13 = vadd.f32 %v1436_v4, %v1212_v6 }
 0x1cd   : > { %v1216_v28 = vpop.f32.mrf.mxu0  ;;  %v1441_v15 = vpop.f32.mrf.mxu1 }
 0x1ce   : > { %3919 = vst [vmem:[#allocation13_spill] sm:$0xff] %v3423_v13  ;;  %v1217_v16 = vadd.f32 %v1216_v28, %v3319_v63 }
 0x1cf   : > { %v1218_v48 = vpop.f32.mrf.mxu0  ;;  %v1443_v41 = vpop.f32.mrf.mxu1 }
 0x1d0   : > { %v3426_v24 = vadd.f32 %v1441_v15, %v1217_v16 }
 0x1d1   : > { %v3428_v40 = vpop.f32.mrf.mxu0  ;;  %v3430_v25 = vpop.f32.mrf.mxu1 }
 0x1d3   : > { %v1223_v26 = vpop.f32.mrf.mxu0  ;;  %v1448_v57 = vpop.f32.mrf.mxu1 }
 0x1d4   : > { %v1778_v57 = vlaneseq }
 0x1d5   : > { %v3432_v51 = vpop.f32.mrf.mxu0  ;;  %v3434_v52 = vpop.f32.mrf.mxu1 }
 0x1d7   : > { %v1228_v33 = vpop.f32.mrf.mxu0  ;;  %v1453_v34 = vpop.f32.mrf.mxu1 }
 0x1d9   : > { %v3436_v38 = vpop.f32.mrf.mxu0  ;;  %v3438_v3 = vpop.f32.mrf.mxu1 }
 0x1db   : > { %v1233_v63 = vpop.f32.mrf.mxu0  ;;  %v1458_v61 = vpop.f32.mrf.mxu1 }
 0x1dd   : > { %v3440_v45 = vpop.f32.mrf.mxu0  ;;  %v3442_v46 = vpop.f32.mrf.mxu1 }
 0x1df   : > { %v1238_v50 = vpop.f32.mrf.mxu0  ;;  %v1463_v12 = vpop.f32.mrf.mxu1 }
 0x1e0   : > { %v3464_v50 = vshrl.u32 %v1778_v57, 7 }
 0x1e1   : > { %v3444_v8 = vpop.f32.mrf.mxu0  ;;  %v3446_v56 = vpop.f32.mrf.mxu1 }
 0x1e2   : > { %v1795_v2 = vadd.s32 128, %v3464_v50  ;;  %v1782_v13 = vadd.s32 24, %v3464_v50  ;;  %v1798_v43 = vadd.s32 152, %v3464_v50  ;;  %v1781_v14 = vadd.s32 16, %v3464_v50 }
 0x1e3   : > { %v1243_v58 = vpop.f32.mrf.mxu0  ;;  %v1468_v30 = vpop.f32.mrf.mxu1 }
 0x1e5   : > { %v3448_v21 = vpop.f32.mrf.mxu0  ;;  %v3450_v18 = vpop.f32.mrf.mxu1 }
 0x1e7   : > { %v1248_v4 = vpop.f32.mrf.mxu0  ;;  %v1473_v6 = vpop.f32.mrf.mxu1 }
 0x1e8   : > { %v1780_v6 = vadd.s32 8, %v3464_v50 }
 0x1e9   : > { %v3452_v39 = vpop.f32.mrf.mxu0  ;;  %v3454_v31 = vpop.f32.mrf.mxu1 }
 0x1eb   : > { %v1253_v28 = vpop.f32.mrf.mxu0  ;;  %v1478_v15 = vpop.f32.mrf.mxu1 }
 0x1ed   : > { %v3456_v16 = vpop.f32.mrf.mxu0  ;;  %v3458_v48 = vpop.f32.mrf.mxu1 }
 0x1ef   : > { %v1258_v41 = vpop.f32.mrf.mxu0  ;;  %v1483_v26 = vpop.f32.mrf.mxu1 }
 0x1f0   : > { %v3476_v41 = vstv %s2212_s14  ;;  %v1796_v26 = vadd.s32 136, %v3464_v50 }
 0x1f1   : > { %v3460_v33 = vpop.f32.mrf.mxu0  ;;  %v3462_v34 = vpop.f32.mrf.mxu1 }
 0x1f3   : > { %v1263_v63 = vpop.f32.mrf.mxu0  ;;  %v1488_v61 = vpop.f32.mrf.mxu1 }
 0x1f4   : > { %v1813_v61 = vadd.s32 %v3476_v41, %v1780_v6  ;;  %v1812_v6 = vadd.s32 %v3476_v41, %v3464_v50 }
 0x1f5   : > { %v3466_v12 = vpop.f32.mrf.mxu0  ;;  %v3468_v58 = vpop.f32.mrf.mxu1 }
 0x1f6   : > { %3920 = vst [vmem:[#allocation14_spill] sm:$0xff] %v3466_v12  ;;  %3921 = vst [vmem:[#allocation15_spill] sm:$0xff] %v3468_v58  ;;  %vm1845_vm0 = vcmp.lt.s32.totalorder %v1813_v61, 512  ;;  %v1783_v61 = vadd.s32 32, %v3464_v50  ;;  %vm1844_vm2 = vcmp.lt.s32.totalorder %v1812_v6, 512  ;;  %v1788_v6 = vadd.s32 72, %v3464_v50 }
 0x1f7   : > { %v1268_v30 = vpop.f32.mrf.mxu0  ;;  %v1493_v4 = vpop.f32.mrf.mxu1  ;;  %v1222_v12 = vadd.f32 %v3428_v40, %v3325_v11  ;;  %v1799_v40 = vadd.s32 160, %v3464_v50 }
 0x1f8   : > { %v1829_v4 = vadd.s32 %v3476_v41, %v1796_v26  ;;  %v1815_v26 = vadd.s32 %v3476_v41, %v1782_v13  ;;  %v1816_v5 = vadd.s32 %v3476_v41, %v1783_v61 }
 0x1f9   : > { %v3472_v28 = vpop.f32.mrf.mxu0  ;;  %v3474_v15 = vpop.f32.mrf.mxu1 }
 0x1fa   : > { %3922 = vst [vmem:[#allocation16_spill] sm:$0xff] %v3474_v15  ;;  %vm1861_vm1 = vcmp.lt.s32.totalorder %v1829_v4, 512  ;;  %vm1847_vm4 = vcmp.lt.s32.totalorder %v1815_v26, 512  ;;  %v1787_v15 = vadd.s32 64, %v3464_v50  ;;  %vm1848_vm9 = vcmp.lt.s32.totalorder %v1816_v5, 512 }
 0x1fb   : > { %v1273_v63 = vpop.f32.mrf.mxu0  ;;  %v1498_v57 = vpop.f32.mrf.mxu1  ;;  %v1821_v26 = vadd.s32 %v3476_v41, %v1788_v6 }
 0x1fc   : > { %v1828_v63 = vadd.s32 %v3476_v41, %v1795_v2  ;;  %v3927_v2 = vmov 0.0  }
 0x1fd   : > { %v3481_v1 = vpop.f32.mrf.mxu0  ;;  %v3483_v30 = vpop.f32.mrf.mxu1  ;;  %v3503_v32 = vsel %vm1845_vm0, 1.0, %v3927_v2  ;;  %v3507_v4 = vsel %vm1861_vm1, 1.0, %v3927_v2  ;;  %v3533_v61 = vsel %vm1847_vm4, 1.0, %v3927_v2  ;;  %vm1853_vm12 = vcmp.lt.s32.totalorder %v1821_v26, 512 }
 0x1fe   : > { %3923 = vst [vmem:[#allocation17_spill] sm:$0xff] %v3481_v1  ;;  %3924 = vst [vmem:[#allocation18_spill] sm:$0xff] %v3483_v30  ;;  %v1831_v30 = vadd.s32 %v3476_v41, %v1798_v43  ;;  %v1797_v1 = vadd.s32 144, %v3464_v50  ;;  %vm1860_vm3 = vcmp.lt.s32.totalorder %v1828_v63, 512  ;;  %v1785_v43 = vadd.s32 48, %v3464_v50 }
 0x1ff   : > { %v1278_v55 = vpop.f32.mrf.mxu0  ;;  %v1503_v22 = vpop.f32.mrf.mxu1  ;;  %3928 = vst [vmem:[#allocation21_spill] sm:$0xff] %v3507_v4 }
 0x200   : > { %v1814_v55 = vadd.s32 %v3476_v41, %v1781_v14  ;;  %v1784_v22 = vadd.s32 40, %v3464_v50  ;;  %vm1863_vm5 = vcmp.lt.s32.totalorder %v1831_v30, 512  ;;  %v1820_v30 = vadd.s32 %v3476_v41, %v1787_v15 }
 0x201   : > { %v3492_v57 = vpop.f32.mrf.mxu0  ;;  %v3494_v19 = vpop.f32.mrf.mxu1  ;;  %v3542_v44 = vsel %vm1863_vm5, 1.0, %v3927_v2 }
 0x202   : > { %3925 = vst [vmem:[#allocation19_spill] sm:$0xff] %v3492_v57  ;;  %3926 = vst [vmem:[#allocation20_spill] sm:$0xff] %v3494_v19  ;;  %v1786_v19 = vadd.s32 56, %v3464_v50  ;;  %vm1846_vm6 = vcmp.lt.s32.totalorder %v1814_v55, 512  ;;  %v1817_v57 = vadd.s32 %v3476_v41, %v1784_v22  ;;  %v3529_v22 = vsel %vm1860_vm3, 1.0, %v3927_v2 }
 0x203   : > { %v1283_v59 = vpop.f32.mrf.mxu0  ;;  %v1508_v58 = vpop.f32.mrf.mxu1  ;;  %3931 = vst [vmem:[#allocation24_spill] sm:$0xff] %v3529_v22  ;;  %3933 = vst [vmem:[#allocation26_spill] sm:$0xff] %v3542_v44  ;;  %v3546_v11 = vsel %vm1846_vm6, 1.0, %v3927_v2  ;;  %v1789_v44 = vadd.s32 80, %v3464_v50  ;;  %vm1852_vm13 = vcmp.lt.s32.totalorder %v1820_v30, 512  ;;  %v1237_v30 = vadd.f32 %v3440_v45, %v3343_v47 }
 0x204   : > { %v1830_v59 = vadd.s32 %v3476_v41, %v1797_v1  ;;  %v1800_v58 = vadd.s32 168, %v3464_v50  ;;  %v1790_v1 = vadd.s32 88, %v3464_v50  ;;  %vm1849_vm8 = vcmp.lt.s32.totalorder %v1817_v57, 512 }
 0x205   : > { %v3510_v13 = vpop.f32.mrf.mxu0  ;;  %v3512_v14 = vpop.f32.mrf.mxu1  ;;  %v1252_v45 = vadd.f32 %v3452_v39, %v3359_v20  ;;  %v1247_v20 = vadd.f32 %v3448_v21, %v3355_v10  ;;  %v1791_v39 = vadd.s32 96, %v3464_v50 }
 0x206   : > { %3929 = vst [vmem:[#allocation22_spill] sm:$0xff] %v3510_v13  ;;  %3930 = vst [vmem:[#allocation23_spill] sm:$0xff] %v3512_v14  ;;  %v3520_v13 = vsel %vm1844_vm2, 1.0, %v3927_v2  ;;  %v1819_v14 = vadd.s32 %v3476_v41, %v1786_v19  ;;  %vm1862_vm7 = vcmp.lt.s32.totalorder %v1830_v59, 512  ;;  %v3551_v63 = vadd.s32 %v3476_v41, %v1800_v58 }
 0x207   : > { %v1288_v4 = vpop.f32.mrf.mxu0  ;;  %v1513_v0 = vpop.f32.mrf.mxu1  ;;  %v1823_v55 = vadd.s32 %v3476_v41, %v1790_v1  ;;  %v1447_v59 = vadd.f32 %v3430_v25, %v1222_v12  ;;  %v3561_v58 = vsel %vm1862_vm7, 1.0, %v3927_v2  ;;  %v3570_v1 = vsel %vm1849_vm8, 1.0, %v3927_v2 }
 0x208   : > { %v1818_v0 = vadd.s32 %v3476_v41, %v1785_v43  ;;  %vm1851_vm10 = vcmp.lt.s32.totalorder %v1819_v14, 512  ;;  %3934 = vst [vmem:[#allocation27_spill] sm:$0xff] %v3561_v58  ;;  %v3574_v25 = vsel %vm1848_vm9, 1.0, %v3927_v2  ;;  %v1227_v58 = vadd.f32 %v3432_v51, %v3331_v23 }
 0x209   : > { %v3536_v4 = vpop.f32.mrf.mxu0  ;;  %v3538_v19 = vpop.f32.mrf.mxu1  ;;  %v3587_v57 = vsel %vm1851_vm10, 1.0, %v3927_v2  ;;  %vm1855_vm14 = vcmp.lt.s32.totalorder %v1823_v55, 512  ;;  %v1242_v14 = vadd.f32 %v3444_v8, %v3349_v60  ;;  %v3608_v51 = vsel %vm1853_vm12, 1.0, %v3927_v2 }
 0x20a   : > { %3932 = vst [vmem:[#allocation25_spill] sm:$0xff] %v3538_v19  ;;  %v1232_v19 = vadd.f32 %v3436_v38, %v3337_v35  ;;  %vm1850_vm11 = vcmp.lt.s32.totalorder %v1818_v0, 512  ;;  %v3577_v35 = vadd.s32 %v3476_v41, %v1799_v40  ;;  %v3580_v38 = vadd.s32 184, %v3464_v50 }
 0x20b   : > { %v1293_v43 = vpop.f32.mrf.mxu0  ;;  %v1518_v22 = vpop.f32.mrf.mxu1  ;;  %v1822_v40 = vadd.s32 %v3476_v41, %v1789_v44  ;;  %v3615_v8 = vsel %vm1852_vm13, 1.0, %v3927_v2  ;;  %v1467_v55 = vadd.f32 %v3446_v56, %v1242_v14  ;;  %vm1865_vm2 = vcmp.lt.s32.totalorder %v3551_v63, 512 }
 0x20c   : > { %3935 = vst [vmem:[#allocation28_spill] sm:$0xff] %v3580_v38  ;;  %v3590_v43 = vsel %vm1850_vm11, 1.0, %v3927_v2  ;;  %vm1864_vm3 = vcmp.lt.s32.totalorder %v3577_v35, 512 }
 0x20d   : > { %v2329_v6 = vpop.f32.mrf.mxu0  ;;  %v2353_v15 = vpop.f32.mrf.mxu1  ;;  %vm1854_vm15 = vcmp.lt.s32.totalorder %v1822_v40, 512  ;;  %v1477_v40 = vadd.f32 %v3454_v31, %v1252_v45 }
 0x20e   : > { %v1592_v12 = vadd.f32 %v2329_v6, %v3381_v49  ;;  %v3583_v22 = vadd.f32 %v2353_v15, %v1447_v59  ;;  %v1457_v49 = vadd.f32 %v3438_v3, %v1232_v19  ;;  %v1792_v59 = vadd.s32 104, %v3464_v50 }
 0x20f   : > { %v1586_v5 = vpop.f32.mrf.mxu0  ;;  %v1666_v0 = vpop.f32.mrf.mxu1 }
 0x210   : > { %1746 = vst [vmem:[%s3566_s24 + $0x8] sm:$0xff] %v1592_v12  ;;  %1762 = vst [vmem:[%s3566_s24 + $0x88] sm:$0xff] %v3583_v22  ;;  %v2010_v6 = vmul.f32 %v1592_v12, %v1592_v12  ;;  %v1587_v15 = vadd.f32 %v1586_v5, %v3378_v37  ;;  %v3604_v44 = vadd.f32 %v1666_v0, %v3426_v24  ;;  %v3619_v37 = vsel %vm1855_vm14, 1.0, %v3927_v2 }
 0x211   : > { %v2332_v38 = vpop.f32.mrf.mxu0  ;;  %v2356_v23 = vpop.f32.mrf.mxu1  ;;  %v1941_v24 = vmul.f32 %v3503_v32, %v1592_v12  ;;  %v1452_v5 = vadd.f32 %v3434_v52, %v1227_v58  ;;  %v3634_v12 = vadd.s32 %v3476_v41, %v1792_v59 }
 0x212   : > { %v1602_v60 = vadd.f32 %v2332_v38, %v3387_v7  ;;  %v3611_v3 = vadd.f32 %v2356_v23, %v1457_v49  ;;  %1745 = vst [vmem:[%s3566_s24] sm:$0xff] %v1587_v15  ;;  %v1940_v19 = vmul.f32 %v3520_v13, %v1587_v15  ;;  %v2009_v26 = vmul.f32 %v1587_v15, %v1587_v15 }
 0x213   : > { %1761 = vst [vmem:[%s3566_s24 + $0x80] sm:$0xff] %v3604_v44  ;;  %v1596_v7 = vpop.f32.mrf.mxu0  ;;  %v1676_v38 = vpop.f32.mrf.mxu1  ;;  %v2042_v0 = vmul.f32 %v3503_v32, %v2010_v6  ;;  %vm1857_vm0 = vcmp.lt.s32.totalorder %v3634_v12, 512 }
 0x214   : > { %1748 = vst [vmem:[%s3566_s24 + $0x18] sm:$0xff] %v1602_v60  ;;  %1764 = vst [vmem:[%s3566_s24 + $0x98] sm:$0xff] %v3611_v3  ;;  %v1972_v49 = vadd.f32 %v1941_v24, %v1940_v19  ;;  %v2041_v15 = vmul.f32 %v3520_v13, %v2009_v26  ;;  %v1597_v23 = vadd.f32 %v1596_v7, %v3384_v62 }
 0x215   : > { %v2335_v52 = vpop.f32.mrf.mxu0  ;;  %v2359_v47 = vpop.f32.mrf.mxu1  ;;  %v2012_v56 = vmul.f32 %v1602_v60, %v1602_v60  ;;  %v3641_v58 = vadd.f32 %v1676_v38, %v1452_v5  ;;  %v1462_v19 = vadd.f32 %v3442_v46, %v1237_v30  ;;  %v1262_v26 = vadd.f32 %v3460_v33, %v3363_v36 }
 0x216   : > { %v1612_v14 = vadd.f32 %v2335_v52, %v3393_v29  ;;  %v2073_v59 = vadd.f32 %v2042_v0, %v2041_v15  ;;  %1747 = vst [vmem:[%s3566_s24 + $0x10] sm:$0xff] %v1597_v23  ;;  %v1942_v32 = vmul.f32 %v3546_v11, %v1597_v23  ;;  %v2011_v13 = vmul.f32 %v1597_v23, %v1597_v23 }
 0x217   : > { %v3646_v6 = vadd.f32 %v2359_v47, %v1467_v55  ;;  %v1606_v62 = vpop.f32.mrf.mxu0  ;;  %v1686_v24 = vpop.f32.mrf.mxu1  ;;  %1763 = vst [vmem:[%s3566_s24 + $0x90] sm:$0xff] %v3641_v58  ;;  %v3656_v29 = vsel %vm1854_vm15, 1.0, %v3927_v2  ;;  %v1943_v7 = vmul.f32 %v3533_v61, %v1602_v60  ;;  %v2044_v5 = vmul.f32 %v3533_v61, %v2012_v56 }
 0x218   : > { %1750 = vst [vmem:[%s3566_s24 + $0x28] sm:$0xff] %v1612_v14  ;;  %v1973_v38 = vadd.f32 %v1972_v49, %v1942_v32  ;;  %v2043_v46 = vmul.f32 %v3546_v11, %v2011_v13  ;;  %v1607_v30 = vadd.f32 %v1606_v62, %v3390_v17  ;;  %v3668_v55 = vadd.f32 %v1686_v24, %v1462_v19 }
 0x219   : > { %1766 = vst [vmem:[%s3566_s24 + $0xa8] sm:$0xff] %v3646_v6  ;;  %v2338_v10 = vpop.f32.mrf.mxu0  ;;  %v2362_v21 = vpop.f32.mrf.mxu1  ;;  %v2014_v33 = vmul.f32 %v1612_v14, %v1612_v14  ;;  %v1472_v15 = vadd.f32 %v3450_v18, %v1247_v20  ;;  %v3678_v17 = vadd.s32 120, %v3464_v50  ;;  %v1257_v23 = vadd.f32 %v3456_v16, %v3361_v27 }
 0x21a   : > { %v2074_v36 = vadd.f32 %v2073_v59, %v2043_v46  ;;  %v1974_v60 = vadd.f32 %v1973_v38, %v1943_v7  ;;  %v1622_v11 = vadd.f32 %v2338_v10, %v3399_v54  ;;  %1749 = vst [vmem:[%s3566_s24 + $0x20] sm:$0xff] %v1607_v30  ;;  %v1944_v31 = vmul.f32 %v3574_v25, %v1607_v30 }
 0x21b   : > { %v1616_v0 = vpop.f32.mrf.mxu0  ;;  %v1696_v49 = vpop.f32.mrf.mxu1  ;;  %v2013_v61 = vmul.f32 %v1607_v30, %v1607_v30  ;;  %1765 = vst [vmem:[%s3566_s24 + $0xa0] sm:$0xff] %v3668_v55  ;;  %v1487_v54 = vadd.f32 %v3462_v34, %v1262_v26  ;;  %v3684_v47 = vadd.f32 %v2362_v21, %v1477_v40  ;;  %v1945_v56 = vmul.f32 %v3570_v1, %v1612_v14  ;;  %v3936_v30 = vld [vmem:[#allocation2_spill] sm:$0xff] }
 0x21c   : > { %v2075_v52 = vadd.f32 %v2074_v36, %v2044_v5  ;;  %1752 = vst [vmem:[%s3566_s24 + $0x38] sm:$0xff] %v1622_v11  ;;  %v1975_v59 = vadd.f32 %v1974_v60, %v1944_v31  ;;  %v1617_v13 = vadd.f32 %v1616_v0, %v3396_v42  ;;  %v1272_v27 = vadd.f32 %v3472_v28, %v3367_v53  ;;  %v3937_v36 = vld [vmem:[#allocation14_spill] sm:$0xff]  ;;  %v3941_v31 = vld [vmem:[#allocation19_spill] sm:$0xff] }
 0x21d   : > { %v2341_v18 = vpop.f32.mrf.mxu0  ;;  %v2365_v45 = vpop.f32.mrf.mxu1  ;;  %v2045_v32 = vmul.f32 %v3574_v25, %v2013_v61  ;;  %v2046_v16 = vmul.f32 %v3570_v1, %v2014_v33  ;;  %v2016_v34 = vmul.f32 %v1622_v11, %v1622_v11  ;;  %1768 = vst [vmem:[%s3566_s24 + $0xb8] sm:$0xff] %v3684_v47  ;;  %v3694_v62 = vadd.f32 %v1696_v49, %v1472_v15  ;;  %v3940_v15 = vld [vmem:[#allocation4_spill] sm:$0xff] }
 0x21e   : > { %1751 = vst [vmem:[%s3566_s24 + $0x30] sm:$0xff] %v1617_v13  ;;  %v1946_v14 = vmul.f32 %v3590_v43, %v1617_v13  ;;  %v1976_v26 = vadd.f32 %v1975_v59, %v1945_v56  ;;  %v2015_v25 = vmul.f32 %v1617_v13, %v1617_v13  ;;  %v1947_v42 = vmul.f32 %v3587_v57, %v1622_v11  ;;  %v3939_v11 = vld [vmem:[#allocation7_spill] sm:$0xff]  ;;  %v3942_v13 = vld [vmem:[#allocation9_spill] sm:$0xff] }
 0x21f   : > { %v1626_v24 = vpop.f32.mrf.mxu0  ;;  %v1706_v19 = vpop.f32.mrf.mxu1  ;;  %v2076_v20 = vadd.f32 %v2075_v52, %v2045_v32  ;;  %1767 = vst [vmem:[%s3566_s24 + $0xb0] sm:$0xff] %v3694_v62  ;;  %v1632_v53 = vadd.f32 %v2341_v18, %v3405_v9  ;;  %v1824_v7 = vadd.s32 %v3476_v41, %v1791_v39  ;;  %v1793_v38 = vadd.s32 112, %v3464_v50  ;;  %v3938_v9 = vld [vmem:[#allocation16_spill] sm:$0xff] }
 0x220   : > { %v1977_v46 = vadd.f32 %v1976_v26, %v1946_v14  ;;  %v2047_v10 = vmul.f32 %v3590_v43, %v2015_v25  ;;  %v3705_v40 = vadd.f32 %v2365_v45, %v1487_v54  ;;  %v1482_v5 = vadd.f32 %v3458_v48, %v1257_v23  ;;  %v3943_v14 = vld [vmem:[#allocation15_spill] sm:$0xff] }
 0x221   : > { %v2344_v28 = vpop.f32.mrf.mxu0  ;;  %v2368_v1 = vpop.f32.mrf.mxu1  ;;  %v2077_v21 = vadd.f32 %v2076_v20, %v2046_v16  ;;  %v1267_v33 = vadd.f32 %v3937_v36, %v3936_v30  ;;  %v1497_v60 = vadd.f32 %v3938_v9, %v1272_v27  ;;  %1754 = vst [vmem:[%s3566_s24 + $0x48] sm:$0xff] %v1632_v53  ;;  %v1627_v39 = vadd.f32 %v1626_v24, %v3939_v11  ;;  %v3944_v25 = vld [vmem:[#allocation3_spill] sm:$0xff]  ;;  %v3948_v36 = vld [vmem:[#allocation6_spill] sm:$0xff] }
 0x222   : > { %v1282_v61 = vadd.f32 %v3941_v31, %v3940_v15  ;;  %v2048_v43 = vmul.f32 %v3587_v57, %v2016_v34  ;;  %1770 = vst [vmem:[%s3566_s24 + $0xc8] sm:$0xff] %v3705_v40  ;;  %v1978_v48 = vadd.f32 %v1977_v46, %v1947_v42  ;;  %v2018_v23 = vmul.f32 %v1632_v53, %v1632_v53  ;;  %v3945_v42 = vld [vmem:[#allocation17_spill] sm:$0xff]  ;;  %v3949_v11 = vld [vmem:[#allocation11_spill] sm:$0xff] }
 0x223   : > { %v1636_v0 = vpop.f32.mrf.mxu0  ;;  %v1716_v49 = vpop.f32.mrf.mxu1  ;;  %v2078_v52 = vadd.f32 %v2077_v21, %v2047_v10  ;;  %1753 = vst [vmem:[%s3566_s24 + $0x40] sm:$0xff] %v1627_v39  ;;  %v1948_v54 = vmul.f32 %v3615_v8, %v1627_v39  ;;  %v2017_v18 = vmul.f32 %v1627_v39, %v1627_v39  ;;  %v3720_v45 = vadd.f32 %v1706_v19, %v1482_v5  ;;  %v3947_v21 = vld [vmem:[#allocation8_spill] sm:$0xff] }
 0x224   : > { %v1642_v27 = vadd.f32 %v2344_v28, %v3942_v13  ;;  %v3723_v57 = vadd.f32 %v2368_v1, %v1497_v60  ;;  %v3728_v16 = vsel %vm1857_vm0, 1.0, %v3927_v2  ;;  %v1949_v34 = vmul.f32 %v3608_v51, %v1632_v53  ;;  %v3946_v1 = vld [vmem:[#allocation20_spill] sm:$0xff] }
 0x225   : > { %v2347_v56 = vpop.f32.mrf.mxu0  ;;  %v2371_v59 = vpop.f32.mrf.mxu1  ;;  %v2079_v32 = vadd.f32 %v2078_v52, %v2048_v43  ;;  %v1979_v24 = vadd.f32 %v1978_v48, %v1948_v54  ;;  %v2049_v19 = vmul.f32 %v3615_v8, %v2017_v18  ;;  %1769 = vst [vmem:[%s3566_s24 + $0xc0] sm:$0xff] %v3720_v45  ;;  %vm1856_vm1 = vcmp.lt.s32.totalorder %v1824_v7, 512  ;;  %v3951_v48 = vld [vmem:[#allocation5_spill] sm:$0xff] }
 0x226   : > { %v1492_v26 = vadd.f32 %v3943_v14, %v1267_v33  ;;  %v1277_v28 = vadd.f32 %v3945_v42, %v3944_v25  ;;  %v1507_v46 = vadd.f32 %v3946_v1, %v1282_v61  ;;  %1756 = vst [vmem:[%s3566_s24 + $0x58] sm:$0xff] %v1642_v27  ;;  %1772 = vst [vmem:[%s3566_s24 + $0xd8] sm:$0xff] %v3723_v57  ;;  %v3955_v25 = vld [vmem:[#allocation13_spill] sm:$0xff]  ;;  %vm2110_vm0 = vcmask 1040384  }
 0x227   : > { %v1646_v20 = vpop.f32.mrf.mxu0  ;;  %v1726_v12 = vpop.f32.mrf.mxu1  ;;  %v1826_v53 = vadd.s32 %v3476_v41, %v1793_v38  ;;  %v2050_v8 = vmul.f32 %v3608_v51, %v2018_v23  ;;  %v2080_v10 = vadd.f32 %v2079_v32, %v2049_v19  ;;  %v1637_v5 = vadd.f32 %v1636_v0, %v3947_v21  ;;  %v3950_v0 = vld [vmem:[#allocation18_spill] sm:$0xff]  ;;  %v3953_v32 = vld [vmem:[#allocation25_spill] sm:$0xff] }
 0x228   : > { %v1980_v30 = vadd.f32 %v1979_v24, %v1949_v34  ;;  %v1292_v33 = vadd.f32 %v3536_v4, %v3948_v36  ;;  %v2020_v9 = vmul.f32 %v1642_v27, %v1642_v27  ;;  %v3746_v60 = vadd.f32 %v1716_v49, %v1492_v26  ;;  %v3952_v23 = vld [vmem:[#allocation22_spill] sm:$0xff]  ;;  %v3957_v36 = vld [vmem:[#allocation12_spill] sm:$0xff] }
 0x229   : > { %v1652_v39 = vadd.f32 %v2347_v56, %v3949_v11  ;;  %1755 = vst [vmem:[%s3566_s24 + $0x50] sm:$0xff] %v1637_v5  ;;  %v1950_v15 = vmul.f32 %v3656_v29, %v1637_v5  ;;  %v2019_v38 = vmul.f32 %v1637_v5, %v1637_v5  ;;  %v2081_v31 = vadd.f32 %v2080_v10, %v2050_v8  ;;  %v2350_v61 = vpop.f32.mrf.mxu0  ;;  %v2374_v52 = vpop.f32.mrf.mxu1  ;;  %v3954_v34 = vld [vmem:[#allocation10_spill] sm:$0xff] }
 0x22a   : > { %v3751_v51 = vadd.f32 %v2371_v59, %v1507_v46  ;;  %v1502_v43 = vadd.f32 %v3950_v0, %v1277_v28  ;;  %1771 = vst [vmem:[%s3566_s24 + $0xd0] sm:$0xff] %v3746_v60  ;;  %v2225_v4 = vsel %vm1856_vm1, 1.0, %v3927_v2  ;;  %v1827_v49 = vadd.s32 %v3476_v41, %v3678_v17 }
 0x22b   : > { %1758 = vst [vmem:[%s3566_s24 + $0x68] sm:$0xff] %v1652_v39  ;;  %vm1858_vm4 = vcmp.lt.s32.totalorder %v1826_v53, 512  ;;  %v1287_v54 = vadd.f32 %v3952_v23, %v3951_v48  ;;  %v1951_v18 = vmul.f32 %v3619_v37, %v1642_v27  ;;  %v1981_v56 = vadd.f32 %v1980_v30, %v1950_v15  ;;  %v1656_v42 = vpop.f32.mrf.mxu0 }
 0x22c   : > { %v2051_v59 = vmul.f32 %v3656_v29, %v2019_v38  ;;  %1774 = vst [vmem:[%s3566_s24 + $0xe8] sm:$0xff] %v3751_v51  ;;  %v1517_v7 = vadd.f32 %v3953_v32, %v1292_v33  ;;  %v2052_v13 = vmul.f32 %v3619_v37, %v2020_v9  ;;  %v1647_v17 = vadd.f32 %v1646_v20, %v3954_v34  ;;  %v1736_v37 = vpop.f32.mrf.mxu1  ;;  %v3956_v20 = vld [vmem:[#allocation23_spill] sm:$0xff] }
 0x22d   : > { %v3772_v24 = vadd.f32 %v1726_v12, %v1502_v43  ;;  %v2022_v14 = vmul.f32 %v1652_v39, %v1652_v39  ;;  %v1982_v26 = vadd.f32 %v1981_v56, %v1951_v18  ;;  %v1662_v27 = vadd.f32 %v2350_v61, %v3955_v25  ;;  %v3958_v43 = vld [vmem:[#allocation28_spill] sm:$0xff] }
 0x22e   : > { %v2082_v19 = vadd.f32 %v2081_v31, %v2051_v59  ;;  %v1801_v28 = vadd.s32 176, %v3464_v50  ;;  %1757 = vst [vmem:[%s3566_s24 + $0x60] sm:$0xff] %v1647_v17  ;;  %v1952_v29 = vmul.f32 %v2225_v4, %v1647_v17  ;;  %v2021_v1 = vmul.f32 %v1647_v17, %v1647_v17 }
 0x22f   : > { %1773 = vst [vmem:[%s3566_s24 + $0xe0] sm:$0xff] %v3772_v24  ;;  %vm1859_vm5 = vcmp.lt.s32.totalorder %v1827_v49, 512  ;;  %v1512_v46 = vadd.f32 %v3956_v20, %v1287_v54  ;;  %1760 = vst [vmem:[%s3566_s24 + $0x78] sm:$0xff] %v1662_v27  ;;  %v3781_v8 = vadd.f32 %v2374_v52, %v1517_v7  ;;  %v2227_v10 = vsel %vm1858_vm4, 1.0, %v3927_v2  ;;  %v3959_v7 = vld [vmem:[#allocation24_spill] sm:$0xff] }
 0x230   : > { %v2083_v12 = vadd.f32 %v2082_v19, %v2052_v13  ;;  %v1953_v21 = vmul.f32 %v3728_v16, %v1652_v39  ;;  %v1983_v5 = vadd.f32 %v1982_v26, %v1952_v29  ;;  %v2053_v30 = vmul.f32 %v2225_v4, %v2021_v1 }
 0x231   : > { %v1657_v33 = vadd.f32 %v1656_v42, %v3957_v36  ;;  %v2054_v9 = vmul.f32 %v3728_v16, %v2022_v14  ;;  %v2228_v11 = vsel %vm1859_vm5, 1.0, %v3927_v2  ;;  %v2024_v15 = vmul.f32 %v1662_v27, %v1662_v27  ;;  %1776 = vst [vmem:[%s3566_s24 + $0xf8] sm:$0xff] %v3781_v8  ;;  %v3960_v14 = vld [vmem:[#allocation21_spill] sm:$0xff] }
 0x232   : > { %v3791_v38 = vadd.f32 %v1736_v37, %v1512_v46  ;;  %v2084_v31 = vadd.f32 %v2083_v12, %v2053_v30  ;;  %v1984_v61 = vadd.f32 %v1983_v5, %v1953_v21  ;;  %v2025_v39 = vmul.f32 %v3604_v44, %v3604_v44  ;;  %v3961_v37 = vld [vmem:[#allocation27_spill] sm:$0xff] }
 0x233   : > { %1759 = vst [vmem:[%s3566_s24 + $0x70] sm:$0xff] %v1657_v33  ;;  %v1954_v53 = vmul.f32 %v2227_v10, %v1657_v33  ;;  %v2023_v0 = vmul.f32 %v1657_v33, %v1657_v33  ;;  %v1835_v4 = vadd.s32 %v3476_v41, %v3958_v43  ;;  %v1834_v16 = vadd.s32 %v3476_v41, %v1801_v28 }
 0x234   : > { %v1804_v49 = vadd.s32 200, %v3464_v50  ;;  %1775 = vst [vmem:[%s3566_s24 + $0xf0] sm:$0xff] %v3791_v38  ;;  %v1955_v52 = vmul.f32 %v2228_v11, %v1662_v27  ;;  %v2085_v54 = vadd.f32 %v2084_v31, %v2054_v9  ;;  %v2026_v18 = vmul.f32 %v3583_v22, %v3583_v22 }
 0x235   : > { %v1985_v48 = vadd.f32 %v1984_v61, %v1954_v53  ;;  %v2055_v23 = vmul.f32 %v2227_v10, %v2023_v0  ;;  %v2234_v56 = vsel %vm1865_vm2, 1.0, %v3927_v2  ;;  %v2233_v59 = vsel %vm1864_vm3, 1.0, %v3927_v2  ;;  %v3962_v10 = vld [vmem:[#allocation26_spill] sm:$0xff] }
 0x236   : > { %v1803_v32 = vadd.s32 192, %v3464_v50  ;;  %v1956_v13 = vmul.f32 %v3959_v7, %v3604_v44  ;;  %v2056_v34 = vmul.f32 %v2228_v11, %v2024_v15  ;;  %v1957_v26 = vmul.f32 %v3960_v14, %v3583_v22 }
 0x237   : > { %v1986_v17 = vadd.f32 %v1985_v48, %v1955_v52  ;;  %v2086_v19 = vadd.f32 %v2085_v54, %v2055_v23  ;;  %vm1867_vm6 = vcmp.lt.s32.totalorder %v1835_v4, 512  ;;  %vm1866_vm7 = vcmp.lt.s32.totalorder %v1834_v16, 512 }
 0x238   : > { %v1837_v63 = vadd.s32 %v3476_v41, %v1804_v49  ;;  %v2057_v25 = vmul.f32 %v3959_v7, %v2025_v39  ;;  %v2027_v35 = vmul.f32 %v3641_v58, %v3641_v58  ;;  %v2058_v28 = vmul.f32 %v3960_v14, %v2026_v18 }
 0x239   : > { %v1987_v27 = vadd.f32 %v1986_v17, %v1956_v13  ;;  %v2087_v42 = vadd.f32 %v2086_v19, %v2056_v34  ;;  %v1836_v44 = vadd.s32 %v3476_v41, %v1803_v32  ;;  %v1806_v29 = vadd.s32 216, %v3464_v50 }
 0x23a   : > { %v1805_v1 = vadd.s32 208, %v3464_v50  ;;  %v2028_v22 = vmul.f32 %v3611_v3, %v3611_v3  ;;  %v1958_v20 = vmul.f32 %v3961_v37, %v3641_v58  ;;  %v1959_v21 = vmul.f32 %v3962_v10, %v3611_v3 }
 0x23b   : > { %v1988_v46 = vadd.f32 %v1987_v27, %v1957_v26  ;;  %v2088_v12 = vadd.f32 %v2087_v42, %v2057_v25  ;;  %v2236_v5 = vsel %vm1867_vm6, 1.0, %v3927_v2  ;;  %v2235_v30 = vsel %vm1866_vm7, 1.0, %v3927_v2 }
 0x23c   : > { %vm1869_vm8 = vcmp.lt.s32.totalorder %v1837_v63, 512  ;;  %v2059_v36 = vmul.f32 %v3961_v37, %v2027_v35  ;;  %v2029_v33 = vmul.f32 %v3668_v55, %v3668_v55  ;;  %v2030_v58 = vmul.f32 %v3646_v6, %v3646_v6 }
 0x23d   : > { %v1989_v9 = vadd.f32 %v1988_v46, %v1958_v20  ;;  %v2089_v11 = vadd.f32 %v2088_v12, %v2058_v28  ;;  %vm1868_vm9 = vcmp.lt.s32.totalorder %v1836_v44, 512  ;;  %v1839_v3 = vadd.s32 %v3476_v41, %v1806_v29 }
 0x23e   : > { %v1838_v15 = vadd.s32 %v3476_v41, %v1805_v1  ;;  %v2060_v31 = vmul.f32 %v3962_v10, %v2028_v22  ;;  %v1960_v53 = vmul.f32 %v2233_v59, %v3668_v55  ;;  %v1961_v39 = vmul.f32 %v2234_v56, %v3646_v6 }
 0x23f   : > { %v1990_v61 = vadd.f32 %v1989_v9, %v1959_v21  ;;  %v2090_v0 = vadd.f32 %v2089_v11, %v2059_v36  ;;  %v2238_v43 = vsel %vm1869_vm8, 1.0, %v3927_v2  ;;  %v1808_v4 = vadd.s32 232, %v3464_v50 }
 0x240   : > { %v1807_v16 = vadd.s32 224, %v3464_v50  ;;  %v2061_v49 = vmul.f32 %v2233_v59, %v2029_v33  ;;  %v2031_v52 = vmul.f32 %v3694_v62, %v3694_v62  ;;  %v2062_v54 = vmul.f32 %v2234_v56, %v2030_v58 }
 0x241   : > { %v1991_v48 = vadd.f32 %v1990_v61, %v1960_v53  ;;  %v2091_v23 = vadd.f32 %v2090_v0, %v2060_v31  ;;  %v2237_v55 = vsel %vm1868_vm9, 1.0, %v3927_v2  ;;  %vm1871_vm10 = vcmp.lt.s32.totalorder %v1839_v3, 512 }
 0x242   : > { %vm1870_vm11 = vcmp.lt.s32.totalorder %v1838_v15, 512  ;;  %v2032_v6 = vmul.f32 %v3684_v47, %v3684_v47  ;;  %v1962_v18 = vmul.f32 %v2235_v30, %v3694_v62  ;;  %v1963_v59 = vmul.f32 %v2236_v5, %v3684_v47 }
 0x243   : > { %v1992_v32 = vadd.f32 %v1991_v48, %v1961_v39  ;;  %v2092_v7 = vadd.f32 %v2091_v23, %v2061_v49  ;;  %v1841_v13 = vadd.s32 %v3476_v41, %v1808_v4  ;;  %v1840_v34 = vadd.s32 %v3476_v41, %v1807_v16 }
 0x244   : > { %v1809_v56 = vadd.s32 240, %v3464_v50  ;;  %v2063_v17 = vmul.f32 %v2235_v30, %v2031_v52  ;;  %v2033_v19 = vmul.f32 %v3720_v45, %v3720_v45  ;;  %v2034_v63 = vmul.f32 %v3705_v40, %v3705_v40 }
 0x245   : > { %v2093_v14 = vadd.f32 %v2092_v7, %v2062_v54  ;;  %v1993_v26 = vadd.f32 %v1992_v32, %v1962_v18  ;;  %v2240_v62 = vsel %vm1871_vm10, 1.0, %v3927_v2  ;;  %v2239_v25 = vsel %vm1870_vm11, 1.0, %v3927_v2 }
 0x246   : > { %v1810_v47 = vadd.s32 248, %v3464_v50  ;;  %v2064_v35 = vmul.f32 %v2236_v5, %v2032_v6  ;;  %v1964_v27 = vmul.f32 %v2237_v55, %v3720_v45  ;;  %v1965_v44 = vmul.f32 %v2238_v43, %v3705_v40 }
 0x247   : > { %v1994_v42 = vadd.f32 %v1993_v26, %v1963_v59  ;;  %v2094_v28 = vadd.f32 %v2093_v14, %v2063_v17  ;;  %vm1873_vm12 = vcmp.lt.s32.totalorder %v1841_v13, 512  ;;  %vm1872_vm13 = vcmp.lt.s32.totalorder %v1840_v34, 512 }
 0x248   : > { %v1842_v29 = vadd.s32 %v3476_v41, %v1809_v56  ;;  %v2065_v1 = vmul.f32 %v2237_v55, %v2033_v19  ;;  %v2035_v22 = vmul.f32 %v3746_v60, %v3746_v60  ;;  %v2066_v46 = vmul.f32 %v2238_v43, %v2034_v63 }
 0x249   : > { %v1995_v37 = vadd.f32 %v1994_v42, %v1964_v27  ;;  %v2095_v20 = vadd.f32 %v2094_v28, %v2064_v35  ;;  %v1843_v50 = vadd.s32 %v3476_v41, %v1810_v47  ;;  %v2036_v45 = vmul.f32 %v3723_v57, %v3723_v57 }
 0x24a   : > { %v1966_v12 = vmul.f32 %v2239_v25, %v3746_v60  ;;  %v1967_v21 = vmul.f32 %v2240_v62, %v3723_v57  ;;  %v2242_v5 = vsel %vm1873_vm12, 1.0, %v3927_v2  ;;  %v2241_v30 = vsel %vm1872_vm13, 1.0, %v3927_v2 }
 0x24b   : > { %v1996_v10 = vadd.f32 %v1995_v37, %v1965_v44  ;;  %v2096_v40 = vadd.f32 %v2095_v20, %v2065_v1  ;;  %vm1874_vm14 = vcmp.lt.s32.totalorder %v1842_v29, 512  ;;  %v2067_v36 = vmul.f32 %v2239_v25, %v2035_v22 }
 0x24c   : > { %v2037_v33 = vmul.f32 %v3772_v24, %v3772_v24  ;;  %v2038_v11 = vmul.f32 %v3751_v51, %v3751_v51  ;;  %vm1875_vm15 = vcmp.lt.s32.totalorder %v1843_v50, 512  ;;  %v2068_v60 = vmul.f32 %v2240_v62, %v2036_v45 }
 0x24d   : > { %v1997_v9 = vadd.f32 %v1996_v10, %v1966_v12  ;;  %v2097_v41 = vadd.f32 %v2096_v40, %v2066_v46  ;;  %v1968_v58 = vmul.f32 %v2241_v30, %v3772_v24  ;;  %v1969_v15 = vmul.f32 %v2242_v5, %v3751_v51 }
 0x24e   : > { %v2243_v31 = vsel %vm1874_vm14, 1.0, %v3927_v2  ;;  %v2069_v53 = vmul.f32 %v2241_v30, %v2037_v33  ;;  %v2039_v0 = vmul.f32 %v3791_v38, %v3791_v38  ;;  %v2070_v43 = vmul.f32 %v2242_v5, %v2038_v11 }
 0x24f   : > { %v1998_v3 = vadd.f32 %v1997_v9, %v1967_v21  ;;  %v2098_v57 = vadd.f32 %v2097_v41, %v2067_v36  ;;  %v2244_v4 = vsel %vm1875_vm15, 1.0, %v3927_v2  ;;  %v2040_v16 = vmul.f32 %v3781_v8, %v3781_v8 }
 0x250   : > { %v1970_v24 = vmul.f32 %v2243_v31, %v3791_v38  ;;  %v1971_v52 = vmul.f32 %v2244_v4, %v3781_v8  ;;  %v2071_v23 = vmul.f32 %v2243_v31, %v2039_v0  ;;  %vm2112_vm1 = vcmask 1041408  }
 0x251   : > { %v1999_v61 = vadd.f32 %v1998_v3, %v1968_v58  ;;  %v2099_v39 = vadd.f32 %v2098_v57, %v2068_v60  ;;  %v2072_v55 = vmul.f32 %v2244_v4, %v2040_v16 }
 0x253   : > { %v2000_v49 = vadd.f32 %v1999_v61, %v1969_v15  ;;  %v2100_v51 = vadd.f32 %v2099_v39, %v2069_v53 }
 0x255   : > { %v2001_v48 = vadd.f32 %v2000_v49, %v1970_v24  ;;  %v2101_v54 = vadd.f32 %v2100_v51, %v2070_v43 }
 0x257   : > { %v2002_v6 = vadd.f32 %v2001_v48, %v1971_v52  ;;  %v2102_v18 = vadd.f32 %v2101_v54, %v2071_v23 }
 0x259   : > { %v2003_v32 = vrot.slane %v2002_v6, 4  ;;  %v2103_v7 = vadd.f32 %v2102_v18, %v2072_v55 }
 0x25b   : > { %v2004_v2 = vadd.f32 %v2003_v32, %v2002_v6  ;;  %v2104_v59 = vrot.slane %v2103_v7, 4 }
 0x25d   : > { %v2005_v13 = vrot.slane %v2004_v2, 2  ;;  %v2105_v34 = vadd.f32 %v2104_v59, %v2103_v7 }
 0x25f   : > { %v2006_v38 = vadd.f32 %v2005_v13, %v2004_v2  ;;  %v2106_v56 = vrot.slane %v2105_v34, 2 }
 0x261   : > { %v2007_v17 = vrot.slane %v2006_v38, 1  ;;  %v2107_v19 = vadd.f32 %v2106_v56, %v2105_v34 }
 0x263   : > { %v2108_v8 = vrot.slane %v2107_v19, 1  ;;  %v2008_v14 = vadd.f32 %v2007_v17, %v2006_v38 }
 0x265   : > { %v2109_v26 = vadd.f32 %v2108_v8, %v2107_v19 }
 0x267   : > { %v2111_v63 = vsel %vm2110_vm0, %v2008_v14, %v2109_v26 }
 0x268   : > { %v2113_v62 = vsel %vm2112_vm1, %v2111_v63, 0.0 }
 0x269   : > { %2114 = vst [vmem:[%s187_s28] sm:$0xff] %v2113_v62 }
 0x26a PF: > { %s14_s12 = sadd.s32 1, %s2423_s12  }
 0x26b   : > { %p11_p5 = scmp.ge.s32.totalorder %s14_s12, 4  }
 0x26d   :  { %13 = sbr.rel (!%p11_p5) target bundleno = 1 (0x1), region = 70 }

</bundles_post_ra>
